<compile_context>
chip_gen: v6e
topology: v6e:2x2x1
jax: 0.10.0
libtpu: 0.0.40
codegen_flags: <defaults>
</compile_context>

<pallas_src>
import functools

import jax
import jax.numpy as jnp
from jax.experimental import pallas as pl
from jax.experimental.pallas import tpu as pltpu

C_IN = 128
C_OUT = 128
KH = KW = 3
EPS = 1e-5


# ----------------------------------------------------------------------------
# VMEM budgeting (per-generation) and row-tile selection.
# ----------------------------------------------------------------------------
def _vmem_budget_bytes():
    # ~half of physical VMEM per core, capped: ~64 MiB on v5e/v6e (128 MiB
    # physical), ~32 MiB on v7x (64 MiB physical).
    cap = 128 * 1024 * 1024
    try:
        info = pltpu.get_tpu_info()
        cap = int(getattr(info, "vmem_capacity_bytes", cap))
    except Exception:
        pass
    return min(cap // 2, 96 * 1024 * 1024)


def _conv_vmem_bytes(th, w):
    # Rough live-VMEM estimate for one conv grid step (double-buffered I/O).
    xpad = (th + 2) * (w + 2) * C_IN * 2                      # padded tile (bf16)
    slab = (th + 2) * w * KW * C_IN * 2                       # im2col concat temp
    acc = th * w * C_OUT * 4                                  # f32 accumulator
    io = 2 * th * w * C_IN * 2 + 2 * th * w * C_OUT * 2       # in/out tiles x2 bufs
    halo = 4 * 8 * w * C_IN * 2                               # up/dn halo blocks
    wgt = 2 * KH * KW * C_IN * C_OUT * 2
    return xpad + slab + acc + io + halo + wgt


def _pick_row_tile(h, w, budget):
    """Largest TH (multiple of 8, dividing H) whose working set fits `budget`.

    Whole image if H is not sublane-aligned (halo logic then unused)."""
    if h % 8 != 0:
        return h
    cands = [t for t in range(h, 7, -8) if h % t == 0]
    for t in cands:
        if _conv_vmem_bytes(t, w) <= budget:
            return t
    # TODO(synk): v5e fallback — drop the K=384 im2col slab and accumulate 9
    # K=128 matmuls from shifted views when even the smallest row tile is tight.
    return cands[-1]


# ----------------------------------------------------------------------------
# Shared conv core for one (image, row-tile) grid step.
#   x_mid_ref: (1, TH, W, Cin)  bf16   -- the rows this step produces
#   x_up_ref : (1, hb, W, Cin)  bf16   -- 8-row block containing row r0-1
#   x_dn_ref : (1, hb, W, Cin)  bf16   -- 8-row block containing row r0+TH
#   w_ref    : (KH, KW*Cin, Cout) bf16 -- kx-major along the K axis
#   xpad_ref : (TH+2, W+2, Cin) bf16 VMEM scratch (local SAME-padding)
#   acc_ref  : (TH*W, Cout) f32 VMEM scratch
# ----------------------------------------------------------------------------
def _conv3x3_tile(x_mid_ref, x_up_ref, x_dn_ref, w_ref, xpad_ref, acc_ref):
    TH, W = x_mid_ref.shape[1], x_mid_ref.shape[2]
    hup = x_up_ref.shape[1]
    hb = pl.program_id(1)
    nh = pl.num_programs(1)

    # Halo handled in-kernel: zero-fill gives the SAME-padding border (and the
    # top/bottom halo rows at the image boundary); interior copied from the
    # pipelined tile; interior halo rows patched in under pl.when.  No
    # wrapper-side jnp.pad pass over HBM.
    xpad_ref[...] = jnp.zeros_like(xpad_ref)
    xpad_ref[1:TH + 1, 1:W + 1, :] = x_mid_ref[0]

    @pl.when(hb > 0)
    def _():  # row r0 - 1 = last row of the previous 8-row block
        xpad_ref[0:1, 1:W + 1, :] = x_up_ref[0, hup - 1:hup, :, :]

    @pl.when(hb < nh - 1)
    def _():  # row r0 + TH = first row of the next 8-row block
        xpad_ref[TH + 1:TH + 2, 1:W + 1, :] = x_dn_ref[0, 0:1, :, :]

    # im2col: the 3 kx taps concatenated along Cin -> 3 MXU matmuls with K=384.
    # NOTE: keep W a multiple of 8 so the (TH, W) -> TH*W sublane merge below is
    # relayout-free.  TODO(synk): pad W in-kernel for unaligned widths.
    lhs_full = jnp.concatenate(
        [xpad_ref[:, kx:kx + W, :] for kx in range(KW)], axis=-1)
    for ky in range(KH):
        lhs = lhs_full[ky:ky + TH].reshape(TH * W, KW * C_IN)
        p = jnp.dot(lhs, w_ref[ky], preferred_element_type=jnp.float32)
        if ky == 0:
            acc_ref[...] = p          # init with first tap (no zeros + add)
        else:
            acc_ref[...] += p


# ----------------------------------------------------------------------------
# Kernel A (inference): conv + folded BN (scale/shift) + ReLU, single pass,
# bf16 writeback.
# ----------------------------------------------------------------------------
def conv_bn_relu_kernel(x_mid_ref, x_up_ref, x_dn_ref, w_ref, scale_ref,
                        shift_ref, out_ref, xpad_ref, acc_ref):
    _conv3x3_tile(x_mid_ref, x_up_ref, x_dn_ref, w_ref, xpad_ref, acc_ref)
    y = acc_ref[...] * scale_ref[...] + shift_ref[...]          # f32 epilogue
    out_ref[...] = jnp.maximum(y, 0.0).reshape(out_ref.shape).astype(out_ref.dtype)


# ----------------------------------------------------------------------------
# Kernel B (training): conv + per-(image,row-tile) partial sum / sum-of-squares
# from the f32 accumulator; y written back in bf16.
# ----------------------------------------------------------------------------
def conv_stats_kernel(x_mid_ref, x_up_ref, x_dn_ref, w_ref,
                      y_ref, sum_ref, sq_ref, xpad_ref, acc_ref):
    _conv3x3_tile(x_mid_ref, x_up_ref, x_dn_ref, w_ref, xpad_ref, acc_ref)
    acc = acc_ref[...]
    y_ref[...] = acc.reshape(y_ref.shape).astype(y_ref.dtype)    # bf16 writeback
    sum_ref[...] = jnp.sum(acc, axis=0).reshape(sum_ref.shape)
    sq_ref[...] = jnp.sum(acc * acc, axis=0).reshape(sq_ref.shape)


# ----------------------------------------------------------------------------
# Kernel C (training): BN normalize + affine + ReLU on flattened (M, C), bf16
# in / bf16 out, large lane-dense row tiles.
# ----------------------------------------------------------------------------
def bn_relu_kernel(y_ref, scale_ref, shift_ref, o_ref):
    y = y_ref[...].astype(jnp.float32)
    o_ref[...] = jnp.maximum(y * scale_ref[...] + shift_ref[...], 0.0
                             ).astype(o_ref.dtype)


# ----------------------------------------------------------------------------
# NHWC/bf16-native Conv_ReLU_Block.  Use this entry point directly for stacks
# of blocks so activations stay NHWC bf16 between layers (no per-layer
# transpose / pad / up-cast passes over HBM).
# TODO(synk): for stacked layers on v6e, fuse this block's BN+ReLU into the
# next block's conv prologue to remove the remaining training-path pass.
# ----------------------------------------------------------------------------
def conv_relu_block_nhwc(mu, var, x, l, use_runstat, weight_oihw, gamma, beta):
    N, H, W, C = x.shape
    assert C == C_IN
    x = x.astype(jnp.bfloat16)
    # torch (Cout, Cin, kh, kw) -> (kh, kw*Cin, Cout), kx-major along K=384.
    w = jnp.transpose(weight_oihw, (2, 3, 1, 0)).reshape(KH, KW * C_IN, C_OUT)
    w = w.astype(jnp.bfloat16)

    budget = _vmem_budget_bytes()
    TH = _pick_row_tile(H, W, budget)
    nH = H // TH
    hblk = min(8, TH)                   # halo-view block height
    th_blocks = max(TH // hblk, 1)
    h_blocks = max(H // hblk, 1)

    x_mid_spec = pl.BlockSpec((1, TH, W, C_IN), lambda n, hb: (n, hb, 0, 0))
    x_up_spec = pl.BlockSpec(
        (1, hblk, W, C_IN),
        lambda n, hb: (n, jnp.maximum(hb * th_blocks - 1, 0), 0, 0))
    x_dn_spec = pl.BlockSpec(
        (1, hblk, W, C_IN),
        lambda n, hb: (n, jnp.minimum((hb + 1) * th_blocks, h_blocks - 1), 0, 0))
    w_spec = pl.BlockSpec((KH, KW * C_IN, C_OUT), lambda n, hb: (0, 0, 0))
    vec_spec = pl.BlockSpec((1, C_OUT), lambda n, hb: (0, 0))
    # Output declared flat (N, H*W, C): plain lane-dense stores of the
    # accumulator; (N, H, W, C) view is a free metadata reshape outside.
    y_spec = pl.BlockSpec((1, TH * W, C_OUT), lambda n, hb: (n, hb, 0))

    scratch = [pltpu.VMEM((TH + 2, W + 2, C_IN), jnp.bfloat16),
               pltpu.VMEM((TH * W, C_OUT), jnp.float32)]
    params = pltpu.CompilerParams(
        dimension_semantics=("parallel", "parallel"),
        vmem_limit_bytes=int(budget))

    if use_runstat:
        # Inference: BN folded into the conv epilogue — single fused kernel,
        # single bf16 HBM pass over the activation.
        scale = (gamma * jax.lax.rsqrt(var[l] + EPS)).astype(jnp.float32)
        shift = (beta - mu[l] * scale).astype(jnp.float32)
        out_flat = pl.pallas_call(
            conv_bn_relu_kernel,
            out_shape=jax.ShapeDtypeStruct((N, H * W, C_OUT), jnp.bfloat16),
            grid=(N, nH),
            in_specs=[x_mid_spec, x_up_spec, x_dn_spec, w_spec, vec_spec, vec_spec],
            out_specs=y_spec,
            scratch_shapes=scratch,
            compiler_params=params,
        )(x, x, x, w, scale[None, :], shift[None, :])
        out = out_flat.reshape(N, H, W, C_OUT)
        mu_out, var_out = mu, var
    else:
        # Training: conv emits per-tile partial stats (from the f32 acc); tiny
        # (N, nH, 1, C) arrays are reduced in plain JAX.
        y_flat, psum, psq = pl.pallas_call(
            conv_stats_kernel,
            out_shape=(jax.ShapeDtypeStruct((N, H * W, C_OUT), jnp.bfloat16),
                       jax.ShapeDtypeStruct((N, nH, 1, C_OUT), jnp.float32),
                       jax.ShapeDtypeStruct((N, nH, 1, C_OUT), jnp.float32)),
            grid=(N, nH),
            in_specs=[x_mid_spec, x_up_spec, x_dn_spec, w_spec],
            out_specs=(y_spec,
                       pl.BlockSpec((1, 1, 1, C_OUT), lambda n, hb: (n, hb, 0, 0)),
                       pl.BlockSpec((1, 1, 1, C_OUT), lambda n, hb: (n, hb, 0, 0))),
            scratch_shapes=scratch,
            compiler_params=params,
        )(x, x, x, w)

        M = N * H * W
        mean = jnp.sum(psum, axis=(0, 1, 2)) / M
        # Biased batch variance (BN training mode); clamp guards the one-pass
        # E[y^2]-E[y]^2 cancellation.  TODO(synk): switch to per-tile centered
        # sums if stats precision matters when |mean| >> std.
        varc = jnp.maximum(jnp.sum(psq, axis=(0, 1, 2)) / M - mean * mean, 0.0)
        mu_out = mu.at[l].set(mean)
        var_out = var.at[l].set(varc)

        scale = gamma * jax.lax.rsqrt(varc + EPS)
        shift = beta - mean * scale

        # Second pass: bf16 in / bf16 out, cdiv grid, partial last tile masked.
        tm = M if M <= 4096 else 4096
        out_flat = pl.pallas_call(
            bn_relu_kernel,
            out_shape=jax.ShapeDtypeStruct((M, C_OUT), jnp.bfloat16),
            grid=(pl.cdiv(M, tm),),
            in_specs=[pl.BlockSpec((tm, C_OUT), lambda i: (i, 0)),
                      pl.BlockSpec((1, C_OUT), lambda i: (0, 0)),
                      pl.BlockSpec((1, C_OUT), lambda i: (0, 0))],
            out_specs=pl.BlockSpec((tm, C_OUT), lambda i: (i, 0)),
            compiler_params=pltpu.CompilerParams(
                dimension_semantics=("parallel",), vmem_limit_bytes=int(budget)),
        )(y_flat.reshape(M, C_OUT), scale[None, :], shift[None, :])
        out = out_flat.reshape(N, H, W, C_OUT)

    return (mu_out, var_out, out, l + 1, use_runstat)


# ----------------------------------------------------------------------------
# PyTorch-layout (NCHW, f32) compatibility wrapper == Conv_ReLU_Block.forward.
# The boundary transposes exist only to match the torch interface; chained
# blocks should call conv_relu_block_nhwc directly.
# ----------------------------------------------------------------------------
def conv_relu_block(mu, var, x_nchw, l, use_runstat, weight_oihw, gamma, beta):
    x = jnp.transpose(x_nchw, (0, 2, 3, 1)).astype(jnp.bfloat16)   # NCHW -> NHWC
    mu_o, var_o, out, l_o, urs = conv_relu_block_nhwc(
        mu, var, x, l, use_runstat, weight_oihw, gamma, beta)
    out_nchw = jnp.transpose(out, (0, 3, 1, 2)).astype(jnp.float32)
    return (mu_o, var_o, out_nchw, l_o, urs)


# ----------------------------------------------------------------------------
# Pure-JAX reference (bf16 MXU operands / f32 accumulation; training path also
# round-trips y through bf16 to match the kernel's activation writeback, so the
# comparison isolates kernel-structure correctness from the precision choice).
# ----------------------------------------------------------------------------
def reference(x_nchw, weight_oihw, gamma, beta,
              mu=None, var=None, use_runstat=False, l=0):
    y = jax.lax.conv_general_dilated(
        x_nchw.astype(jnp.bfloat16), weight_oihw.astype(jnp.bfloat16),
        window_strides=(1, 1), padding="SAME",
        dimension_numbers=("NCHW", "OIHW", "NCHW"),
        preferred_element_type=jnp.float32)
    if use_runstat:
        mean = mu[l]
        v = var[l]
    else:
        mean = y.mean(axis=(0, 2, 3))
        v = y.var(axis=(0, 2, 3))
        y = y.astype(jnp.bfloat16).astype(jnp.float32)   # match kernel writeback
    yn = (y - mean[None, :, None, None]) * jax.lax.rsqrt(
        v[None, :, None, None] + EPS)
    return jnp.maximum(yn * gamma[None, :, None, None]
                       + beta[None, :, None, None], 0.0)


if __name__ == "__main__":
    key = jax.random.PRNGKey(0)
    k_x, k_w, k_g, k_b, k_m, k_v = jax.random.split(key, 6)

    N, H, W = 2, 16, 16
    L = 4                      # number of BN layers whose stats are carried
    x = jax.random.normal(k_x, (N, C_IN, H, W), jnp.float32)
    weight = jax.random.normal(k_w, (C_OUT, C_IN, KH, KW), jnp.float32) * 0.05
    gamma = 0.5 + jax.random.uniform(k_g, (C_OUT,), jnp.float32)
    beta = 0.1 * jax.random.normal(k_b, (C_OUT,), jnp.float32)
    mu = 0.1 * jax.random.normal(k_m, (L, C_OUT), jnp.float32)
    var = 0.5 + jax.random.uniform(k_v, (L, C_OUT), jnp.float32)

    def rel_err(a, b):
        # bf16-aware metric: relative at large magnitudes, absolute near zero.
        return float(jnp.max(jnp.abs(a - b) / (jnp.abs(b) + 1.0)))

    # --- training-mode path (batch stats) ---
    fwd_train = jax.jit(functools.partial(conv_relu_block, use_runstat=False),
                        static_argnames=("l",))
    mu_o, var_o, out_t, l_o, _ = fwd_train(mu, var, x, l=0, weight_oihw=weight,
                                           gamma=gamma, beta=beta)
    jax.block_until_ready(out_t)
    ref_t = reference(x, weight, gamma, beta, use_runstat=False)
    assert out_t.shape == (N, C_OUT, H, W)
    assert int(l_o) == 1
    e_t = rel_err(out_t, ref_t)
    assert e_t < 2e-2, e_t

    # --- inference path (running stats; fully fused conv+BN+ReLU kernel) ---
    fwd_eval = jax.jit(functools.partial(conv_relu_block, use_runstat=True),
                       static_argnames=("l",))
    _, _, out_e, _, _ = fwd_eval(mu, var, x, l=1, weight_oihw=weight,
                                 gamma=gamma, beta=beta)
    jax.block_until_ready(out_e)
    ref_e = reference(x, weight, gamma, beta, mu=mu, var=var,
                      use_runstat=True, l=1)
    e_e = rel_err(out_e, ref_e)
    assert e_e < 2e-2, e_e

    print("KERNEL_OK")
</pallas_src>

<mosaic_0001>
module attributes {stable_mosaic.version = 11 : i64} {
  func.func @conv_stats_kernel(%arg0: i32, %arg1: i32, %arg2: memref<1x16x16x128xbf16, #tpu.memory_space<vmem>>, %arg3: memref<1x8x16x128xbf16, #tpu.memory_space<vmem>>, %arg4: memref<1x8x16x128xbf16, #tpu.memory_space<vmem>>, %arg5: memref<3x384x128xbf16, #tpu.memory_space<vmem>>, %arg6: memref<1x256x128xbf16, #tpu.memory_space<vmem>>, %arg7: memref<1x1x1x128xf32, #tpu.memory_space<vmem>>, %arg8: memref<1x1x1x128xf32, #tpu.memory_space<vmem>>, %arg9: memref<18x18x128xbf16, #tpu.memory_space<vmem>>, %arg10: memref<256x128xf32, #tpu.memory_space<vmem>>) attributes {dimension_semantics = [#tpu.dimension_semantics<parallel>, #tpu.dimension_semantics<parallel>], iteration_bounds = array<i64: 2, 1>, scalar_prefetch = 0 : i64, scratch_operands = 2 : i64, tpu.core_type = #tpu.core_type<tc>, window_params = [{transform_indices = @transform_0, window_bounds = array<i64: 1, 16, 16, 128>}, {transform_indices = @transform_1, window_bounds = array<i64: 1, 8, 16, 128>}, {transform_indices = @transform_2, window_bounds = array<i64: 1, 8, 16, 128>}, {pipeline_mode = #tpu.pipeline_mode<synchronous>, transform_indices = @transform_3, window_bounds = array<i64: 3, 384, 128>}, {transform_indices = @transform_4, window_bounds = array<i64: 1, 256, 128>}, {transform_indices = @transform_5, window_bounds = array<i64: 1, 1, 1, 128>}, {transform_indices = @transform_6, window_bounds = array<i64: 1, 1, 1, 128>}]} {
    %cst = arith.constant 0.000000e+00 : bf16
    %0 = vector.broadcast %cst : bf16 to vector<18x18x128xbf16>
    %c0 = arith.constant 0 : index
    %c0_0 = arith.constant 0 : index
    %c0_1 = arith.constant 0 : index
    %1 = vector.load %arg9[%c0, %c0_0, %c0_1] : memref<18x18x128xbf16, #tpu.memory_space<vmem>>, vector<18x18x128xbf16>
    tpu.vector_store %arg9[%c0, %c0_0, %c0_1], %0 {strides = array<i32>} : memref<18x18x128xbf16, #tpu.memory_space<vmem>>, vector<18x18x128xbf16>,
    %c0_2 = arith.constant 0 : index
    %c0_3 = arith.constant 0 : index
    %c0_4 = arith.constant 0 : index
    %c0_5 = arith.constant 0 : index
    %2 = vector.load %arg2[%c0_2, %c0_3, %c0_4, %c0_5] : memref<1x16x16x128xbf16, #tpu.memory_space<vmem>>, vector<1x16x16x128xbf16>
    %3 = vector.shape_cast %2 : vector<1x16x16x128xbf16> to vector<16x16x128xbf16>
    %c1 = arith.constant 1 : index
    %c1_6 = arith.constant 1 : index
    %c0_7 = arith.constant 0 : index
    %4 = vector.load %arg9[%c1, %c1_6, %c0_7] : memref<18x18x128xbf16, #tpu.memory_space<vmem>>, vector<16x16x128xbf16>
    tpu.vector_store %arg9[%c1, %c1_6, %c0_7], %3 {strides = array<i32>} : memref<18x18x128xbf16, #tpu.memory_space<vmem>>, vector<16x16x128xbf16>,
    %c0_i32 = arith.constant 0 : i32
    %5 = arith.cmpi sgt, %arg1, %c0_i32 : i32
    %6 = arith.extui %5 : i1 to i32
    %c0_i32_8 = arith.constant 0 : i32
    %7 = arith.cmpi ne, %6, %c0_i32_8 : i32
    scf.if %7 {
      %c0_56 = arith.constant 0 : index
      %c7 = arith.constant 7 : index
      %c0_57 = arith.constant 0 : index
      %c0_58 = arith.constant 0 : index
      %48 = vector.load %arg3[%c0_56, %c7, %c0_57, %c0_58] : memref<1x8x16x128xbf16, #tpu.memory_space<vmem>>, vector<1x1x16x128xbf16>
      %49 = vector.shape_cast %48 : vector<1x1x16x128xbf16> to vector<1x16x128xbf16>
      %c0_59 = arith.constant 0 : index
      %c1_60 = arith.constant 1 : index
      %c0_61 = arith.constant 0 : index
      %50 = vector.load %arg9[%c0_59, %c1_60, %c0_61] : memref<18x18x128xbf16, #tpu.memory_space<vmem>>, vector<1x16x128xbf16>
      tpu.vector_store %arg9[%c0_59, %c1_60, %c0_61], %49 {strides = array<i32>} : memref<18x18x128xbf16, #tpu.memory_space<vmem>>, vector<1x16x128xbf16>,
    } else {
    }
    %c0_i32_9 = arith.constant 0 : i32
    %8 = arith.cmpi slt, %arg1, %c0_i32_9 : i32
    %9 = arith.extui %8 : i1 to i32
    %c0_i32_10 = arith.constant 0 : i32
    %10 = arith.cmpi ne, %9, %c0_i32_10 : i32
    scf.if %10 {
      %c0_56 = arith.constant 0 : index
      %c0_57 = arith.constant 0 : index
      %c0_58 = arith.constant 0 : index
      %c0_59 = arith.constant 0 : index
      %48 = vector.load %arg4[%c0_56, %c0_57, %c0_58, %c0_59] : memref<1x8x16x128xbf16, #tpu.memory_space<vmem>>, vector<1x1x16x128xbf16>
      %49 = vector.shape_cast %48 : vector<1x1x16x128xbf16> to vector<1x16x128xbf16>
      %c17 = arith.constant 17 : index
      %c1_60 = arith.constant 1 : index
      %c0_61 = arith.constant 0 : index
      %50 = vector.load %arg9[%c17, %c1_60, %c0_61] : memref<18x18x128xbf16, #tpu.memory_space<vmem>>, vector<1x16x128xbf16>
      tpu.vector_store %arg9[%c17, %c1_60, %c0_61], %49 {strides = array<i32>} : memref<18x18x128xbf16, #tpu.memory_space<vmem>>, vector<1x16x128xbf16>,
    } else {
    }
    %c0_11 = arith.constant 0 : index
    %c0_12 = arith.constant 0 : index
    %c0_13 = arith.constant 0 : index
    %11 = vector.load %arg9[%c0_11, %c0_12, %c0_13] : memref<18x18x128xbf16, #tpu.memory_space<vmem>>, vector<18x16x128xbf16>
    %c0_14 = arith.constant 0 : index
    %c1_15 = arith.constant 1 : index
    %c0_16 = arith.constant 0 : index
    %12 = vector.load %arg9[%c0_14, %c1_15, %c0_16] : memref<18x18x128xbf16, #tpu.memory_space<vmem>>, vector<18x16x128xbf16>
    %c0_17 = arith.constant 0 : index
    %c2 = arith.constant 2 : index
    %c0_18 = arith.constant 0 : index
    %13 = vector.load %arg9[%c0_17, %c2, %c0_18] : memref<18x18x128xbf16, #tpu.memory_space<vmem>>, vector<18x16x128xbf16>
    %14 = tpu.concatenate %11, %12, %13 in 2 : vector<18x16x128xbf16>, vector<18x16x128xbf16>, vector<18x16x128xbf16> -> vector<18x16x384xbf16>
    %15 = vector.extract_strided_slice %14 {offsets = [0, 0, 0], sizes = [16, 16, 384], strides = [1, 1, 1]} : vector<18x16x384xbf16> to vector<16x16x384xbf16>
    %16 = vector.shape_cast %15 : vector<16x16x384xbf16> to vector<256x384xbf16>
    %c0_19 = arith.constant 0 : index
    %c0_20 = arith.constant 0 : index
    %c0_21 = arith.constant 0 : index
    %17 = vector.load %arg5[%c0_19, %c0_20, %c0_21] : memref<3x384x128xbf16, #tpu.memory_space<vmem>>, vector<1x384x128xbf16>
    %18 = vector.shape_cast %17 : vector<1x384x128xbf16> to vector<384x128xbf16>
    %cst_22 = arith.constant dense<0.000000e+00> : vector<256x128xf32>
    %19 = tpu.matmul %16, %18, %cst_22 {dimension_numbers = #tpu.dot_dimension_numbers<[1], [0], [0], [1], [0, 0, 1, 1], [], []>} : vector<256x384xbf16>, vector<384x128xbf16>, vector<256x128xf32> -> vector<256x128xf32>
    %c0_23 = arith.constant 0 : index
    %c0_24 = arith.constant 0 : index
    %20 = vector.load %arg10[%c0_23, %c0_24] : memref<256x128xf32, #tpu.memory_space<vmem>>, vector<256x128xf32>
    tpu.vector_store %arg10[%c0_23, %c0_24], %19 {strides = array<i32>} : memref<256x128xf32, #tpu.memory_space<vmem>>, vector<256x128xf32>,
    %21 = vector.extract_strided_slice %14 {offsets = [1, 0, 0], sizes = [16, 16, 384], strides = [1, 1, 1]} : vector<18x16x384xbf16> to vector<16x16x384xbf16>
    %22 = vector.shape_cast %21 : vector<16x16x384xbf16> to vector<256x384xbf16>
    %c1_25 = arith.constant 1 : index
    %c0_26 = arith.constant 0 : index
    %c0_27 = arith.constant 0 : index
    %23 = vector.load %arg5[%c1_25, %c0_26, %c0_27] : memref<3x384x128xbf16, #tpu.memory_space<vmem>>, vector<1x384x128xbf16>
    %24 = vector.shape_cast %23 : vector<1x384x128xbf16> to vector<384x128xbf16>
    %cst_28 = arith.constant dense<0.000000e+00> : vector<256x128xf32>
    %25 = tpu.matmul %22, %24, %cst_28 {dimension_numbers = #tpu.dot_dimension_numbers<[1], [0], [0], [1], [0, 0, 1, 1], [], []>} : vector<256x384xbf16>, vector<384x128xbf16>, vector<256x128xf32> -> vector<256x128xf32>
    %c0_29 = arith.constant 0 : index
    %c0_30 = arith.constant 0 : index
    %26 = vector.load %arg10[%c0_29, %c0_30] : memref<256x128xf32, #tpu.memory_space<vmem>>, vector<256x128xf32>
    %27 = arith.addf %26, %25 : vector<256x128xf32>
    %c0_31 = arith.constant 0 : index
    %c0_32 = arith.constant 0 : index
    %28 = vector.load %arg10[%c0_31, %c0_32] : memref<256x128xf32, #tpu.memory_space<vmem>>, vector<256x128xf32>
    tpu.vector_store %arg10[%c0_31, %c0_32], %27 {strides = array<i32>} : memref<256x128xf32, #tpu.memory_space<vmem>>, vector<256x128xf32>,
    %29 = vector.extract_strided_slice %14 {offsets = [2, 0, 0], sizes = [16, 16, 384], strides = [1, 1, 1]} : vector<18x16x384xbf16> to vector<16x16x384xbf16>
    %30 = vector.shape_cast %29 : vector<16x16x384xbf16> to vector<256x384xbf16>
    %c2_33 = arith.constant 2 : index
    %c0_34 = arith.constant 0 : index
    %c0_35 = arith.constant 0 : index
    %31 = vector.load %arg5[%c2_33, %c0_34, %c0_35] : memref<3x384x128xbf16, #tpu.memory_space<vmem>>, vector<1x384x128xbf16>
    %32 = vector.shape_cast %31 : vector<1x384x128xbf16> to vector<384x128xbf16>
    %cst_36 = arith.constant dense<0.000000e+00> : vector<256x128xf32>
    %33 = tpu.matmul %30, %32, %cst_36 {dimension_numbers = #tpu.dot_dimension_numbers<[1], [0], [0], [1], [0, 0, 1, 1], [], []>} : vector<256x384xbf16>, vector<384x128xbf16>, vector<256x128xf32> -> vector<256x128xf32>
    %c0_37 = arith.constant 0 : index
    %c0_38 = arith.constant 0 : index
    %34 = vector.load %arg10[%c0_37, %c0_38] : memref<256x128xf32, #tpu.memory_space<vmem>>, vector<256x128xf32>
    %35 = arith.addf %34, %33 : vector<256x128xf32>
    %c0_39 = arith.constant 0 : index
    %c0_40 = arith.constant 0 : index
    %36 = vector.load %arg10[%c0_39, %c0_40] : memref<256x128xf32, #tpu.memory_space<vmem>>, vector<256x128xf32>
    tpu.vector_store %arg10[%c0_39, %c0_40], %35 {strides = array<i32>} : memref<256x128xf32, #tpu.memory_space<vmem>>, vector<256x128xf32>,
    %c0_41 = arith.constant 0 : index
    %c0_42 = arith.constant 0 : index
    %37 = vector.load %arg10[%c0_41, %c0_42] : memref<256x128xf32, #tpu.memory_space<vmem>>, vector<256x128xf32>
    %38 = vector.shape_cast %37 : vector<256x128xf32> to vector<1x256x128xf32>
    %39 = arith.truncf %38 : vector<1x256x128xf32> to vector<1x256x128xbf16>
    %c0_43 = arith.constant 0 : index
    %c0_44 = arith.constant 0 : index
    %c0_45 = arith.constant 0 : index
    %40 = vector.load %arg6[%c0_43, %c0_44, %c0_45] : memref<1x256x128xbf16, #tpu.memory_space<vmem>>, vector<1x256x128xbf16>
    tpu.vector_store %arg6[%c0_43, %c0_44, %c0_45], %39 {strides = array<i32>} : memref<1x256x128xbf16, #tpu.memory_space<vmem>>, vector<1x256x128xbf16>,
    %cst_46 = arith.constant dense<0.000000e+00> : vector<128xf32>
    %41 = vector.multi_reduction <add>, %37, %cst_46 [0] : vector<256x128xf32> to vector<128xf32>
    %42 = vector.shape_cast %41 : vector<128xf32> to vector<1x1x1x128xf32>
    %c0_47 = arith.constant 0 : index
    %c0_48 = arith.constant 0 : index
    %c0_49 = arith.constant 0 : index
    %c0_50 = arith.constant 0 : index
    %43 = vector.load %arg7[%c0_47, %c0_48, %c0_49, %c0_50] : memref<1x1x1x128xf32, #tpu.memory_space<vmem>>, vector<1x1x1x128xf32>
    tpu.vector_store %arg7[%c0_47, %c0_48, %c0_49, %c0_50], %42 {strides = array<i32>} : memref<1x1x1x128xf32, #tpu.memory_space<vmem>>, vector<1x1x1x128xf32>,
    %44 = arith.mulf %37, %37 : vector<256x128xf32>
    %cst_51 = arith.constant dense<0.000000e+00> : vector<128xf32>
    %45 = vector.multi_reduction <add>, %44, %cst_51 [0] : vector<256x128xf32> to vector<128xf32>
    %46 = vector.shape_cast %45 : vector<128xf32> to vector<1x1x1x128xf32>
    %c0_52 = arith.constant 0 : index
    %c0_53 = arith.constant 0 : index
    %c0_54 = arith.constant 0 : index
    %c0_55 = arith.constant 0 : index
    %47 = vector.load %arg8[%c0_52, %c0_53, %c0_54, %c0_55] : memref<1x1x1x128xf32, #tpu.memory_space<vmem>>, vector<1x1x1x128xf32>
    tpu.vector_store %arg8[%c0_52, %c0_53, %c0_54, %c0_55], %46 {strides = array<i32>} : memref<1x1x1x128xf32, #tpu.memory_space<vmem>>, vector<1x1x1x128xf32>,
    return
  }
  func.func @transform_0(%arg0: i32, %arg1: i32) -> (i32, i32, i32, i32) {
    %c0_i32 = arith.constant 0 : i32
    %c0_i32_0 = arith.constant 0 : i32
    %c0_i32_1 = arith.constant 0 : i32
    return %arg0, %arg1, %c0_i32, %c0_i32_0 : i32, i32, i32, i32
  }
  func.func @transform_1(%arg0: i32, %arg1: i32) -> (i32, i32, i32, i32) {
    %c2_i32 = arith.constant 2 : i32
    %0 = arith.muli %arg1, %c2_i32 : i32
    %c1_i32 = arith.constant 1 : i32
    %1 = arith.subi %0, %c1_i32 : i32
    %c0_i32 = arith.constant 0 : i32
    %2 = arith.maxsi %1, %c0_i32 : i32
    %c0_i32_0 = arith.constant 0 : i32
    %c0_i32_1 = arith.constant 0 : i32
    %c0_i32_2 = arith.constant 0 : i32
    return %arg0, %2, %c0_i32_0, %c0_i32_1 : i32, i32, i32, i32
  }
  func.func @transform_2(%arg0: i32, %arg1: i32) -> (i32, i32, i32, i32) {
    %c1_i32 = arith.constant 1 : i32
    %0 = arith.addi %arg1, %c1_i32 : i32
    %c2_i32 = arith.constant 2 : i32
    %1 = arith.muli %0, %c2_i32 : i32
    %c1_i32_0 = arith.constant 1 : i32
    %2 = arith.minsi %1, %c1_i32_0 : i32
    %c0_i32 = arith.constant 0 : i32
    %c0_i32_1 = arith.constant 0 : i32
    %c0_i32_2 = arith.constant 0 : i32
    return %arg0, %2, %c0_i32, %c0_i32_1 : i32, i32, i32, i32
  }
  func.func @transform_3(%arg0: i32, %arg1: i32) -> (i32, i32, i32) {
    %c0_i32 = arith.constant 0 : i32
    %c0_i32_0 = arith.constant 0 : i32
    %c0_i32_1 = arith.constant 0 : i32
    %c0_i32_2 = arith.constant 0 : i32
    return %c0_i32, %c0_i32_0, %c0_i32_1 : i32, i32, i32
  }
  func.func @transform_4(%arg0: i32, %arg1: i32) -> (i32, i32, i32) {
    %c0_i32 = arith.constant 0 : i32
    %c0_i32_0 = arith.constant 0 : i32
    return %arg0, %arg1, %c0_i32 : i32, i32, i32
  }
  func.func @transform_5(%arg0: i32, %arg1: i32) -> (i32, i32, i32, i32) {
    %c0_i32 = arith.constant 0 : i32
    %c0_i32_0 = arith.constant 0 : i32
    %c0_i32_1 = arith.constant 0 : i32
    return %arg0, %arg1, %c0_i32, %c0_i32_0 : i32, i32, i32, i32
  }
  func.func @transform_6(%arg0: i32, %arg1: i32) -> (i32, i32, i32, i32) {
    %c0_i32 = arith.constant 0 : i32
    %c0_i32_0 = arith.constant 0 : i32
    %c0_i32_1 = arith.constant 0 : i32
    return %arg0, %arg1, %c0_i32, %c0_i32_0 : i32, i32, i32, i32
  }
}

module attributes {stable_mosaic.version = 11 : i64} {
  func.func @bn_relu_kernel(%arg0: i32, %arg1: memref<512x128xbf16, #tpu.memory_space<vmem>>, %arg2: memref<1x128xf32, #tpu.memory_space<vmem>>, %arg3: memref<1x128xf32, #tpu.memory_space<vmem>>, %arg4: memref<512x128xbf16, #tpu.memory_space<vmem>>) attributes {dimension_semantics = [#tpu.dimension_semantics<parallel>], iteration_bounds = array<i64: 1>, scalar_prefetch = 0 : i64, scratch_operands = 0 : i64, tpu.core_type = #tpu.core_type<tc>, window_params = [{transform_indices = @transform_0, window_bounds = array<i64: 512, 128>}, {pipeline_mode = #tpu.pipeline_mode<synchronous>, transform_indices = @transform_1, window_bounds = array<i64: 1, 128>}, {pipeline_mode = #tpu.pipeline_mode<synchronous>, transform_indices = @transform_2, window_bounds = array<i64: 1, 128>}, {transform_indices = @transform_3, window_bounds = array<i64: 512, 128>}]} {
    %c0 = arith.constant 0 : index
    %c0_0 = arith.constant 0 : index
    %0 = vector.load %arg1[%c0, %c0_0] : memref<512x128xbf16, #tpu.memory_space<vmem>>, vector<512x128xbf16>
    %1 = arith.extf %0 : vector<512x128xbf16> to vector<512x128xf32>
    %c0_1 = arith.constant 0 : index
    %c0_2 = arith.constant 0 : index
    %2 = vector.load %arg2[%c0_1, %c0_2] : memref<1x128xf32, #tpu.memory_space<vmem>>, vector<1x128xf32>
    %3 = vector.broadcast %2 : vector<1x128xf32> to vector<512x128xf32>
    %4 = arith.mulf %1, %3 : vector<512x128xf32>
    %c0_3 = arith.constant 0 : index
    %c0_4 = arith.constant 0 : index
    %5 = vector.load %arg3[%c0_3, %c0_4] : memref<1x128xf32, #tpu.memory_space<vmem>>, vector<1x128xf32>
    %6 = vector.broadcast %5 : vector<1x128xf32> to vector<512x128xf32>
    %7 = arith.addf %4, %6 : vector<512x128xf32>
    %cst = arith.constant 0.000000e+00 : f32
    %8 = vector.broadcast %cst : f32 to vector<512x128xf32>
    %9 = arith.maximumf %7, %8 : vector<512x128xf32>
    %10 = arith.truncf %9 : vector<512x128xf32> to vector<512x128xbf16>
    %c0_5 = arith.constant 0 : index
    %c0_6 = arith.constant 0 : index
    %11 = vector.load %arg4[%c0_5, %c0_6] : memref<512x128xbf16, #tpu.memory_space<vmem>>, vector<512x128xbf16>
    tpu.vector_store %arg4[%c0_5, %c0_6], %10 {strides = array<i32>} : memref<512x128xbf16, #tpu.memory_space<vmem>>, vector<512x128xbf16>,
    return
  }
  func.func @transform_0(%arg0: i32) -> (i32, i32) {
    %c0_i32 = arith.constant 0 : i32
    %c0_i32_0 = arith.constant 0 : i32
    return %arg0, %c0_i32 : i32, i32
  }
  func.func @transform_1(%arg0: i32) -> (i32, i32) {
    %c0_i32 = arith.constant 0 : i32
    %c0_i32_0 = arith.constant 0 : i32
    %c0_i32_1 = arith.constant 0 : i32
    return %c0_i32, %c0_i32_0 : i32, i32
  }
  func.func @transform_2(%arg0: i32) -> (i32, i32) {
    %c0_i32 = arith.constant 0 : i32
    %c0_i32_0 = arith.constant 0 : i32
    %c0_i32_1 = arith.constant 0 : i32
    return %c0_i32, %c0_i32_0 : i32, i32
  }
  func.func @transform_3(%arg0: i32) -> (i32, i32) {
    %c0_i32 = arith.constant 0 : i32
    %c0_i32_0 = arith.constant 0 : i32
    return %arg0, %c0_i32 : i32, i32
  }
}

</mosaic_0001>

<bundles_post_ra>
// kernel: conv_relu_block.3
= control target key start
LH: loop header
LB: loop body
LE: loop exit
PB: predicated region body
PF: predicated region fallthrough
CT: control target
= control target key end

     0   :  { %s1502_s0 = inlined_call_operand.vmem [shape: bf16[512,128], index: 0, kind: input, shape index: {}]   ;;  %s1503_s1 = inlined_call_operand.vmem [shape: f32[1,128], index: 1, kind: input, shape index: {}]   ;;  %s1504_s2 = inlined_call_operand.vmem [shape: f32[1,128], index: 2, kind: input, shape index: {}]   ;;  %s1505_s3 = inlined_call_operand.vmem [shape: bf16[512,128], index: 3, kind: output, shape index: {}]  }
   0x1   :  { %v803_v0 = vld [vmem:[%s1502_s0] sm:$0xff]   ;;  %v1090_v4 = vld [vmem:[%s1502_s0 + $0x8] sm:$0xff]   ;;  %v1091_v5 = vld [vmem:[%s1502_s0 + $0x10] sm:$0xff]  }
   0x2   :  { %v1178_v1 = vld [vmem:[%s1503_s1] ss:$0 sm:$0xff]  ;;  %v804_v2 = vunpack.c.l.bf16 %v803_v0  ;;  %v805_v3 = vunpack.c.h.bf16 %v803_v0  ;;  %v1092_v6 = vld [vmem:[%s1502_s0 + $0x18] sm:$0xff]   ;;  %v808_v8 = vunpack.c.l.bf16 %v1090_v4  ;;  %v809_v9 = vunpack.c.h.bf16 %v1090_v4  ;;  %v1094_v33 = vld [vmem:[%s1502_s0 + $0x28] sm:$0xff]  }
   0x3   :  { %v1192_v7 = vld [vmem:[%s1504_s2] ss:$0 sm:$0xff]  ;;  %v812_v10 = vunpack.c.l.bf16 %v1091_v5  ;;  %v813_v11 = vunpack.c.h.bf16 %v1091_v5  ;;  %v816_v14 = vunpack.c.l.bf16 %v1092_v6  ;;  %v817_v15 = vunpack.c.h.bf16 %v1092_v6  ;;  %v1095_v38 = vld [vmem:[%s1502_s0 + $0x30] sm:$0xff]   ;;  %v1096_v43 = vld [vmem:[%s1502_s0 + $0x38] sm:$0xff]  }
   0x4   :  { %v149_v12 = vmul.f32 %v804_v2, %v1178_v1  ;;  %v150_v13 = vmul.f32 %v805_v3, %v1178_v1  ;;  %v151_v16 = vmul.f32 %v808_v8, %v1178_v1  ;;  %v152_v17 = vmul.f32 %v809_v9, %v1178_v1  ;;  %v1093_v28 = vld [vmem:[%s1502_s0 + $0x20] sm:$0xff]  }
   0x5   :  { %v153_v18 = vmul.f32 %v812_v10, %v1178_v1  ;;  %v154_v19 = vmul.f32 %v813_v11, %v1178_v1  ;;  %v155_v22 = vmul.f32 %v816_v14, %v1178_v1  ;;  %v156_v23 = vmul.f32 %v817_v15, %v1178_v1  ;;  %v1097_v0 = vld [vmem:[%s1502_s0 + $0x40] sm:$0xff]   ;;  %v1098_v11 = vld [vmem:[%s1502_s0 + $0x48] sm:$0xff]  }
   0x6   :  { %v220_v20 = vadd.f32 %v1192_v7, %v149_v12  ;;  %v221_v21 = vadd.f32 %v1192_v7, %v150_v13  ;;  %v222_v24 = vadd.f32 %v1192_v7, %v151_v16  ;;  %v223_v25 = vadd.f32 %v1192_v7, %v152_v17  ;;  %v1099_v16 = vld [vmem:[%s1502_s0 + $0x50] sm:$0xff]  }
   0x7   :  { %v224_v26 = vadd.f32 %v1192_v7, %v153_v18  ;;  %v225_v27 = vadd.f32 %v1192_v7, %v154_v19  ;;  %v226_v31 = vadd.f32 %v1192_v7, %v155_v22  ;;  %v227_v32 = vadd.f32 %v1192_v7, %v156_v23 }
   0x8   :  { %v284_v29 = vmax.f32 %v220_v20, 0.0  ;;  %v285_v30 = vmax.f32 %v221_v21, 0.0  ;;  %v286_v34 = vmax.f32 %v222_v24, 0.0  ;;  %v287_v35 = vmax.f32 %v223_v25, 0.0  ;;  %v1100_v25 = vld [vmem:[%s1502_s0 + $0x58] sm:$0xff]  }
   0x9   :  { %v288_v36 = vmax.f32 %v224_v26, 0.0  ;;  %v289_v37 = vmax.f32 %v225_v27, 0.0  ;;  %v290_v40 = vmax.f32 %v226_v31, 0.0  ;;  %v291_v41 = vmax.f32 %v227_v32, 0.0 }
   0xa   :  { %v933_v39 = vpack.c.bf16 %v285_v30, %v284_v29  ;;  %v820_v42 = vunpack.c.l.bf16 %v1093_v28  ;;  %v938_v44 = vpack.c.bf16 %v287_v35, %v286_v34  ;;  %v821_v46 = vunpack.c.h.bf16 %v1093_v28 }
   0xb   :  { %v943_v45 = vpack.c.bf16 %v289_v37, %v288_v36  ;;  %v824_v47 = vunpack.c.l.bf16 %v1094_v33  ;;  %v948_v48 = vpack.c.bf16 %v291_v41, %v290_v40  ;;  %v825_v50 = vunpack.c.h.bf16 %v1094_v33 }
   0xc   :  { %934 = vst [vmem:[%s1505_s3] sm:$0xff] %v933_v39   ;;  %v157_v49 = vmul.f32 %v820_v42, %v1178_v1  ;;  %v828_v51 = vunpack.c.l.bf16 %v1095_v38  ;;  %1121 = vst [vmem:[%s1505_s3 + $0x8] sm:$0xff] %v938_v44   ;;  %v158_v52 = vmul.f32 %v821_v46, %v1178_v1  ;;  %v829_v54 = vunpack.c.h.bf16 %v1095_v38  ;;  %v1101_v38 = vld [vmem:[%s1502_s0 + $0x60] sm:$0xff]  }
   0xd   :  { %1122 = vst [vmem:[%s1505_s3 + $0x10] sm:$0xff] %v943_v45   ;;  %v159_v53 = vmul.f32 %v824_v47, %v1178_v1  ;;  %v832_v55 = vunpack.c.l.bf16 %v1096_v43  ;;  %1123 = vst [vmem:[%s1505_s3 + $0x18] sm:$0xff] %v948_v48   ;;  %v160_v57 = vmul.f32 %v825_v50, %v1178_v1  ;;  %v833_v59 = vunpack.c.h.bf16 %v1096_v43 }
   0xe   :  { %v228_v56 = vadd.f32 %v1192_v7, %v157_v49  ;;  %v161_v58 = vmul.f32 %v828_v51, %v1178_v1  ;;  %v229_v60 = vadd.f32 %v1192_v7, %v158_v52  ;;  %v162_v62 = vmul.f32 %v829_v54, %v1178_v1  ;;  %v1102_v51 = vld [vmem:[%s1502_s0 + $0x68] sm:$0xff]  }
   0xf   :  { %v230_v61 = vadd.f32 %v1192_v7, %v159_v53  ;;  %v163_v63 = vmul.f32 %v832_v55, %v1178_v1  ;;  %v231_v3 = vadd.f32 %v1192_v7, %v160_v57  ;;  %v164_v5 = vmul.f32 %v833_v59, %v1178_v1 }
  0x10   :  { %v292_v2 = vmax.f32 %v228_v56, 0.0  ;;  %v232_v4 = vadd.f32 %v1192_v7, %v161_v58  ;;  %v293_v6 = vmax.f32 %v229_v60, 0.0  ;;  %v233_v9 = vadd.f32 %v1192_v7, %v162_v62  ;;  %v1103_v60 = vld [vmem:[%s1502_s0 + $0x70] sm:$0xff]  }
  0x11   :  { %v294_v8 = vmax.f32 %v230_v61, 0.0  ;;  %v234_v10 = vadd.f32 %v1192_v7, %v163_v63  ;;  %v295_v12 = vmax.f32 %v231_v3, 0.0  ;;  %v235_v14 = vadd.f32 %v1192_v7, %v164_v5 }
  0x12   :  { %v296_v13 = vmax.f32 %v232_v4, 0.0  ;;  %v836_v15 = vunpack.c.l.bf16 %v1097_v0  ;;  %v953_v17 = vpack.c.bf16 %v293_v6, %v292_v2  ;;  %v297_v18 = vmax.f32 %v233_v9, 0.0  ;;  %v1104_v2 = vld [vmem:[%s1502_s0 + $0x78] sm:$0xff]  }
  0x13   :  { %v298_v19 = vmax.f32 %v234_v10, 0.0  ;;  %v837_v20 = vunpack.c.h.bf16 %v1097_v0  ;;  %v958_v21 = vpack.c.bf16 %v295_v12, %v294_v8  ;;  %v299_v22 = vmax.f32 %v235_v14, 0.0  ;;  %v1105_v12 = vld [vmem:[%s1502_s0 + $0x80] sm:$0xff]  }
  0x14   :  { %v165_v23 = vmul.f32 %v836_v15, %v1178_v1  ;;  %v840_v24 = vunpack.c.l.bf16 %v1098_v11  ;;  %1124 = vst [vmem:[%s1505_s3 + $0x20] sm:$0xff] %v953_v17   ;;  %v963_v26 = vpack.c.bf16 %v297_v18, %v296_v13  ;;  %v841_v28 = vunpack.c.h.bf16 %v1098_v11 }
  0x15   :  { %v166_v27 = vmul.f32 %v837_v20, %v1178_v1  ;;  %v844_v29 = vunpack.c.l.bf16 %v1099_v16  ;;  %1125 = vst [vmem:[%s1505_s3 + $0x28] sm:$0xff] %v958_v21   ;;  %v968_v30 = vpack.c.bf16 %v299_v22, %v298_v19  ;;  %v845_v33 = vunpack.c.h.bf16 %v1099_v16 }
  0x16   :  { %v236_v31 = vadd.f32 %v1192_v7, %v165_v23  ;;  %v167_v32 = vmul.f32 %v840_v24, %v1178_v1  ;;  %1126 = vst [vmem:[%s1505_s3 + $0x30] sm:$0xff] %v963_v26   ;;  %v168_v35 = vmul.f32 %v841_v28, %v1178_v1  ;;  %v848_v37 = vunpack.c.l.bf16 %v1100_v25 }
  0x17   :  { %v237_v34 = vadd.f32 %v1192_v7, %v166_v27  ;;  %v169_v36 = vmul.f32 %v844_v29, %v1178_v1  ;;  %1127 = vst [vmem:[%s1505_s3 + $0x38] sm:$0xff] %v968_v30   ;;  %v170_v41 = vmul.f32 %v845_v33, %v1178_v1  ;;  %v849_v42 = vunpack.c.h.bf16 %v1100_v25  ;;  %v1106_v29 = vld [vmem:[%s1502_s0 + $0x88] sm:$0xff]  }
  0x18   :  { %v300_v39 = vmax.f32 %v236_v31, 0.0  ;;  %v238_v40 = vadd.f32 %v1192_v7, %v167_v32  ;;  %v239_v44 = vadd.f32 %v1192_v7, %v168_v35  ;;  %v171_v46 = vmul.f32 %v848_v37, %v1178_v1 }
  0x19   :  { %v301_v43 = vmax.f32 %v237_v34, 0.0  ;;  %v240_v45 = vadd.f32 %v1192_v7, %v169_v36  ;;  %v241_v48 = vadd.f32 %v1192_v7, %v170_v41  ;;  %v172_v49 = vmul.f32 %v849_v42, %v1178_v1  ;;  %v1107_v34 = vld [vmem:[%s1502_s0 + $0x90] sm:$0xff]  }
  0x1a   :  { %v302_v47 = vmax.f32 %v238_v40, 0.0  ;;  %v852_v50 = vunpack.c.l.bf16 %v1101_v38  ;;  %v303_v53 = vmax.f32 %v239_v44, 0.0  ;;  %v242_v55 = vadd.f32 %v1192_v7, %v171_v46 }
  0x1b   :  { %v973_v52 = vpack.c.bf16 %v301_v43, %v300_v39  ;;  %v304_v54 = vmax.f32 %v240_v45, 0.0  ;;  %v305_v56 = vmax.f32 %v241_v48, 0.0  ;;  %v243_v57 = vadd.f32 %v1192_v7, %v172_v49  ;;  %v1108_v43 = vld [vmem:[%s1502_s0 + $0x98] sm:$0xff]  }
  0x1c   :  { %v853_v58 = vunpack.c.h.bf16 %v1101_v38  ;;  %v173_v59 = vmul.f32 %v852_v50, %v1178_v1  ;;  %v978_v61 = vpack.c.bf16 %v303_v53, %v302_v47  ;;  %v306_v62 = vmax.f32 %v242_v55, 0.0 }
  0x1d   :  { %1128 = vst [vmem:[%s1505_s3 + $0x40] sm:$0xff] %v973_v52   ;;  %v856_v63 = vunpack.c.l.bf16 %v1102_v51  ;;  %v857_v0 = vunpack.c.h.bf16 %v1102_v51  ;;  %v983_v3 = vpack.c.bf16 %v305_v56, %v304_v54  ;;  %v307_v4 = vmax.f32 %v243_v57, 0.0  ;;  %v1109_v56 = vld [vmem:[%s1502_s0 + $0xa0] sm:$0xff]  }
  0x1e   :  { %v174_v5 = vmul.f32 %v853_v58, %v1178_v1  ;;  %v244_v6 = vadd.f32 %v1192_v7, %v173_v59  ;;  %1129 = vst [vmem:[%s1505_s3 + $0x48] sm:$0xff] %v978_v61   ;;  %v860_v10 = vunpack.c.l.bf16 %v1103_v60  ;;  %v861_v11 = vunpack.c.h.bf16 %v1103_v60 }
  0x1f   :  { %v175_v8 = vmul.f32 %v856_v63, %v1178_v1  ;;  %v176_v9 = vmul.f32 %v857_v0, %v1178_v1  ;;  %1130 = vst [vmem:[%s1505_s3 + $0x50] sm:$0xff] %v983_v3   ;;  %v988_v13 = vpack.c.bf16 %v307_v4, %v306_v62  ;;  %v864_v16 = vunpack.c.l.bf16 %v1104_v2 }
  0x20   :  { %v245_v14 = vadd.f32 %v1192_v7, %v174_v5  ;;  %v308_v15 = vmax.f32 %v244_v6, 0.0  ;;  %v177_v19 = vmul.f32 %v860_v10, %v1178_v1  ;;  %v178_v20 = vmul.f32 %v861_v11, %v1178_v1 }
  0x21   :  { %v246_v17 = vadd.f32 %v1192_v7, %v175_v8  ;;  %v247_v18 = vadd.f32 %v1192_v7, %v176_v9  ;;  %1131 = vst [vmem:[%s1505_s3 + $0x58] sm:$0xff] %v988_v13   ;;  %v865_v22 = vunpack.c.h.bf16 %v1104_v2  ;;  %v179_v23 = vmul.f32 %v864_v16, %v1178_v1  ;;  %v1110_v2 = vld [vmem:[%s1502_s0 + $0xa8] sm:$0xff]   ;;  %v1111_v16 = vld [vmem:[%s1502_s0 + $0xb0] sm:$0xff]  }
  0x22   :  { %v309_v21 = vmax.f32 %v245_v14, 0.0  ;;  %v868_v24 = vunpack.c.l.bf16 %v1105_v12  ;;  %v248_v27 = vadd.f32 %v1192_v7, %v177_v19  ;;  %v249_v28 = vadd.f32 %v1192_v7, %v178_v20 }
  0x23   :  { %v310_v25 = vmax.f32 %v246_v17, 0.0  ;;  %v311_v26 = vmax.f32 %v247_v18, 0.0  ;;  %v180_v31 = vmul.f32 %v865_v22, %v1178_v1  ;;  %v250_v32 = vadd.f32 %v1192_v7, %v179_v23 }
  0x24   :  { %v993_v30 = vpack.c.bf16 %v309_v21, %v308_v15  ;;  %v869_v33 = vunpack.c.h.bf16 %v1105_v12  ;;  %v312_v36 = vmax.f32 %v248_v27, 0.0  ;;  %v313_v37 = vmax.f32 %v249_v28, 0.0  ;;  %v1112_v21 = vld [vmem:[%s1502_s0 + $0xb8] sm:$0xff]  }
  0x25   :  { %v998_v35 = vpack.c.bf16 %v311_v26, %v310_v25  ;;  %v181_v38 = vmul.f32 %v868_v24, %v1178_v1  ;;  %v251_v39 = vadd.f32 %v1192_v7, %v180_v31  ;;  %v314_v40 = vmax.f32 %v250_v32, 0.0 }
  0x26   :  { %1132 = vst [vmem:[%s1505_s3 + $0x60] sm:$0xff] %v993_v30   ;;  %v182_v41 = vmul.f32 %v869_v33, %v1178_v1  ;;  %v872_v42 = vunpack.c.l.bf16 %v1106_v29  ;;  %v1003_v44 = vpack.c.bf16 %v313_v37, %v312_v36  ;;  %v873_v46 = vunpack.c.h.bf16 %v1106_v29 }
  0x27   :  { %1133 = vst [vmem:[%s1505_s3 + $0x68] sm:$0xff] %v998_v35   ;;  %v252_v45 = vadd.f32 %v1192_v7, %v181_v38  ;;  %v876_v47 = vunpack.c.l.bf16 %v1107_v34  ;;  %v315_v48 = vmax.f32 %v251_v39, 0.0  ;;  %v877_v51 = vunpack.c.h.bf16 %v1107_v34  ;;  %v1113_v34 = vld [vmem:[%s1502_s0 + $0xc0] sm:$0xff]  }
  0x28   :  { %v253_v49 = vadd.f32 %v1192_v7, %v182_v41  ;;  %v183_v50 = vmul.f32 %v872_v42, %v1178_v1  ;;  %1134 = vst [vmem:[%s1505_s3 + $0x70] sm:$0xff] %v1003_v44   ;;  %v184_v53 = vmul.f32 %v873_v46, %v1178_v1  ;;  %v880_v55 = vunpack.c.l.bf16 %v1108_v43 }
  0x29   :  { %v316_v52 = vmax.f32 %v252_v45, 0.0  ;;  %v185_v54 = vmul.f32 %v876_v47, %v1178_v1  ;;  %v1008_v57 = vpack.c.bf16 %v315_v48, %v314_v40  ;;  %v186_v60 = vmul.f32 %v877_v51, %v1178_v1  ;;  %v1114_v47 = vld [vmem:[%s1502_s0 + $0xc8] sm:$0xff]  }
  0x2a   :  { %v317_v58 = vmax.f32 %v253_v49, 0.0  ;;  %v254_v59 = vadd.f32 %v1192_v7, %v183_v50  ;;  %v255_v61 = vadd.f32 %v1192_v7, %v184_v53  ;;  %v881_v63 = vunpack.c.h.bf16 %v1108_v43 }
  0x2b   :  { %v256_v62 = vadd.f32 %v1192_v7, %v185_v54  ;;  %v187_v0 = vmul.f32 %v880_v55, %v1178_v1  ;;  %1135 = vst [vmem:[%s1505_s3 + $0x78] sm:$0xff] %v1008_v57   ;;  %v257_v5 = vadd.f32 %v1192_v7, %v186_v60  ;;  %v884_v6 = vunpack.c.l.bf16 %v1109_v56 }
  0x2c   :  { %v1013_v3 = vpack.c.bf16 %v317_v58, %v316_v52  ;;  %v318_v4 = vmax.f32 %v254_v59, 0.0  ;;  %v319_v8 = vmax.f32 %v255_v61, 0.0  ;;  %v188_v10 = vmul.f32 %v881_v63, %v1178_v1  ;;  %v1115_v52 = vld [vmem:[%s1502_s0 + $0xd0] sm:$0xff]   ;;  %v1116_v61 = vld [vmem:[%s1502_s0 + $0xd8] sm:$0xff]  }
  0x2d   :  { %v320_v9 = vmax.f32 %v256_v62, 0.0  ;;  %v258_v11 = vadd.f32 %v1192_v7, %v187_v0  ;;  %v321_v12 = vmax.f32 %v257_v5, 0.0  ;;  %v885_v13 = vunpack.c.h.bf16 %v1109_v56 }
  0x2e   :  { %1136 = vst [vmem:[%s1505_s3 + $0x80] sm:$0xff] %v1013_v3   ;;  %v189_v14 = vmul.f32 %v884_v6, %v1178_v1  ;;  %v888_v15 = vunpack.c.l.bf16 %v1110_v2  ;;  %v1018_v17 = vpack.c.bf16 %v319_v8, %v318_v4  ;;  %v259_v18 = vadd.f32 %v1192_v7, %v188_v10 }
  0x2f   :  { %v322_v19 = vmax.f32 %v258_v11, 0.0  ;;  %v889_v20 = vunpack.c.h.bf16 %v1110_v2  ;;  %v1023_v22 = vpack.c.bf16 %v321_v12, %v320_v9  ;;  %v190_v23 = vmul.f32 %v885_v13, %v1178_v1  ;;  %v1117_v12 = vld [vmem:[%s1502_s0 + $0xe0] sm:$0xff]  }
  0x30   :  { %v260_v24 = vadd.f32 %v1192_v7, %v189_v14  ;;  %v191_v25 = vmul.f32 %v888_v15, %v1178_v1  ;;  %1137 = vst [vmem:[%s1505_s3 + $0x88] sm:$0xff] %v1018_v17   ;;  %v323_v26 = vmax.f32 %v259_v18, 0.0  ;;  %v892_v28 = vunpack.c.l.bf16 %v1111_v16 }
  0x31   :  { %v192_v27 = vmul.f32 %v889_v20, %v1178_v1  ;;  %v893_v29 = vunpack.c.h.bf16 %v1111_v16  ;;  %1138 = vst [vmem:[%s1505_s3 + $0x90] sm:$0xff] %v1023_v22   ;;  %v261_v30 = vadd.f32 %v1192_v7, %v190_v23  ;;  %v896_v33 = vunpack.c.l.bf16 %v1112_v21 }
  0x32   :  { %v324_v31 = vmax.f32 %v260_v24, 0.0  ;;  %v262_v32 = vadd.f32 %v1192_v7, %v191_v25  ;;  %v1028_v35 = vpack.c.bf16 %v323_v26, %v322_v19  ;;  %v193_v37 = vmul.f32 %v892_v28, %v1178_v1 }
  0x33   :  { %v263_v36 = vadd.f32 %v1192_v7, %v192_v27  ;;  %v194_v38 = vmul.f32 %v893_v29, %v1178_v1  ;;  %v325_v39 = vmax.f32 %v261_v30, 0.0  ;;  %v897_v41 = vunpack.c.h.bf16 %v1112_v21  ;;  %v1118_v21 = vld [vmem:[%s1502_s0 + $0xe8] sm:$0xff]  }
  0x34   :  { %v326_v40 = vmax.f32 %v262_v32, 0.0  ;;  %v195_v42 = vmul.f32 %v896_v33, %v1178_v1  ;;  %1139 = vst [vmem:[%s1505_s3 + $0x98] sm:$0xff] %v1028_v35   ;;  %v264_v44 = vadd.f32 %v1192_v7, %v193_v37  ;;  %v900_v46 = vunpack.c.l.bf16 %v1113_v34 }
  0x35   :  { %v327_v43 = vmax.f32 %v263_v36, 0.0  ;;  %v265_v45 = vadd.f32 %v1192_v7, %v194_v38  ;;  %v1033_v48 = vpack.c.bf16 %v325_v39, %v324_v31  ;;  %v196_v49 = vmul.f32 %v897_v41, %v1178_v1  ;;  %v1120_v39 = vld [vmem:[%s1502_s0 + $0xf8] sm:$0xff]  }
  0x36   :  { %v266_v50 = vadd.f32 %v1192_v7, %v195_v42  ;;  %v901_v51 = vunpack.c.h.bf16 %v1113_v34  ;;  %v328_v54 = vmax.f32 %v264_v44, 0.0  ;;  %v197_v56 = vmul.f32 %v900_v46, %v1178_v1  ;;  %v1119_v34 = vld [vmem:[%s1502_s0 + $0xf0] sm:$0xff]  }
  0x37   :  { %v1038_v53 = vpack.c.bf16 %v327_v43, %v326_v40  ;;  %v329_v55 = vmax.f32 %v265_v45, 0.0  ;;  %1140 = vst [vmem:[%s1505_s3 + $0xa0] sm:$0xff] %v1033_v48   ;;  %v267_v57 = vadd.f32 %v1192_v7, %v196_v49  ;;  %v904_v60 = vunpack.c.l.bf16 %v1114_v47 }
  0x38   :  { %v330_v58 = vmax.f32 %v266_v50, 0.0  ;;  %v198_v59 = vmul.f32 %v901_v51, %v1178_v1  ;;  %v268_v63 = vadd.f32 %v1192_v7, %v197_v56  ;;  %v905_v0 = vunpack.c.h.bf16 %v1114_v47 }
  0x39   :  { %1141 = vst [vmem:[%s1505_s3 + $0xa8] sm:$0xff] %v1038_v53   ;;  %v1043_v62 = vpack.c.bf16 %v329_v55, %v328_v54  ;;  %v908_v2 = vunpack.c.l.bf16 %v1115_v52  ;;  %v331_v3 = vmax.f32 %v267_v57, 0.0  ;;  %v199_v5 = vmul.f32 %v904_v60, %v1178_v1 }
  0x3a   :  { %v269_v4 = vadd.f32 %v1192_v7, %v198_v59  ;;  %v909_v6 = vunpack.c.h.bf16 %v1115_v52  ;;  %v332_v8 = vmax.f32 %v268_v63, 0.0  ;;  %v200_v9 = vmul.f32 %v905_v0, %v1178_v1 }
  0x3b   :  { %1142 = vst [vmem:[%s1505_s3 + $0xb0] sm:$0xff] %v1043_v62   ;;  %v201_v10 = vmul.f32 %v908_v2, %v1178_v1  ;;  %v912_v11 = vunpack.c.l.bf16 %v1116_v61  ;;  %v1048_v13 = vpack.c.bf16 %v331_v3, %v330_v58  ;;  %v270_v15 = vadd.f32 %v1192_v7, %v199_v5 }
  0x3c   :  { %v333_v14 = vmax.f32 %v269_v4, 0.0  ;;  %v202_v16 = vmul.f32 %v909_v6, %v1178_v1  ;;  %v271_v17 = vadd.f32 %v1192_v7, %v200_v9  ;;  %v913_v19 = vunpack.c.h.bf16 %v1116_v61 }
  0x3d   :  { %v272_v18 = vadd.f32 %v1192_v7, %v201_v10  ;;  %v203_v20 = vmul.f32 %v912_v11, %v1178_v1  ;;  %1143 = vst [vmem:[%s1505_s3 + $0xb8] sm:$0xff] %v1048_v13   ;;  %v334_v23 = vmax.f32 %v270_v15, 0.0  ;;  %v916_v25 = vunpack.c.l.bf16 %v1117_v12 }
  0x3e   :  { %v1053_v22 = vpack.c.bf16 %v333_v14, %v332_v8  ;;  %v273_v24 = vadd.f32 %v1192_v7, %v202_v16  ;;  %v335_v26 = vmax.f32 %v271_v17, 0.0  ;;  %v204_v28 = vmul.f32 %v913_v19, %v1178_v1 }
  0x3f   :  { %v336_v27 = vmax.f32 %v272_v18, 0.0  ;;  %v274_v29 = vadd.f32 %v1192_v7, %v203_v20  ;;  %v917_v31 = vunpack.c.h.bf16 %v1117_v12  ;;  %v205_v32 = vmul.f32 %v916_v25, %v1178_v1 }
  0x40   :  { %1144 = vst [vmem:[%s1505_s3 + $0xc0] sm:$0xff] %v1053_v22   ;;  %v337_v30 = vmax.f32 %v273_v24, 0.0  ;;  %v920_v33 = vunpack.c.l.bf16 %v1118_v21  ;;  %v1058_v35 = vpack.c.bf16 %v335_v26, %v334_v23  ;;  %v275_v36 = vadd.f32 %v1192_v7, %v204_v28 }
  0x41   :  { %v338_v37 = vmax.f32 %v274_v29, 0.0  ;;  %v921_v38 = vunpack.c.h.bf16 %v1118_v21  ;;  %v206_v41 = vmul.f32 %v917_v31, %v1178_v1  ;;  %v276_v42 = vadd.f32 %v1192_v7, %v205_v32 }
  0x42   :  { %v1063_v40 = vpack.c.bf16 %v337_v30, %v336_v27  ;;  %v207_v43 = vmul.f32 %v920_v33, %v1178_v1  ;;  %1145 = vst [vmem:[%s1505_s3 + $0xc8] sm:$0xff] %v1058_v35   ;;  %v339_v44 = vmax.f32 %v275_v36, 0.0  ;;  %v924_v46 = vunpack.c.l.bf16 %v1119_v34 }
  0x43   :  { %v208_v45 = vmul.f32 %v921_v38, %v1178_v1  ;;  %v925_v47 = vunpack.c.h.bf16 %v1119_v34  ;;  %v277_v48 = vadd.f32 %v1192_v7, %v206_v41  ;;  %v340_v49 = vmax.f32 %v276_v42, 0.0 }
  0x44   :  { %1146 = vst [vmem:[%s1505_s3 + $0xd0] sm:$0xff] %v1063_v40   ;;  %v278_v50 = vadd.f32 %v1192_v7, %v207_v43  ;;  %v928_v51 = vunpack.c.l.bf16 %v1120_v39  ;;  %v1068_v52 = vpack.c.bf16 %v339_v44, %v338_v37  ;;  %v209_v54 = vmul.f32 %v924_v46, %v1178_v1 }
  0x45   :  { %v279_v53 = vadd.f32 %v1192_v7, %v208_v45  ;;  %v210_v55 = vmul.f32 %v925_v47, %v1178_v1  ;;  %v341_v56 = vmax.f32 %v277_v48, 0.0  ;;  %v929_v58 = vunpack.c.h.bf16 %v1120_v39 }
  0x46   :  { %v342_v57 = vmax.f32 %v278_v50, 0.0  ;;  %v211_v59 = vmul.f32 %v928_v51, %v1178_v1  ;;  %1147 = vst [vmem:[%s1505_s3 + $0xd8] sm:$0xff] %v1068_v52   ;;  %v280_v61 = vadd.f32 %v1192_v7, %v209_v54 }
  0x47   :  { %v343_v60 = vmax.f32 %v279_v53, 0.0  ;;  %v281_v62 = vadd.f32 %v1192_v7, %v210_v55  ;;  %v1073_v63 = vpack.c.bf16 %v341_v56, %v340_v49  ;;  %v212_v0 = vmul.f32 %v929_v58, %v1178_v1 }
  0x48   :  { %v282_v2 = vadd.f32 %v1192_v7, %v211_v59  ;;  %v344_v4 = vmax.f32 %v280_v61, 0.0 }
  0x49   :  { %v1078_v3 = vpack.c.bf16 %v343_v60, %v342_v57  ;;  %v345_v5 = vmax.f32 %v281_v62, 0.0  ;;  %1148 = vst [vmem:[%s1505_s3 + $0xe0] sm:$0xff] %v1073_v63   ;;  %v283_v6 = vadd.f32 %v1192_v7, %v212_v0 }
  0x4a   :  { %v346_v8 = vmax.f32 %v282_v2, 0.0 }
  0x4b   :  { %1149 = vst [vmem:[%s1505_s3 + $0xe8] sm:$0xff] %v1078_v3   ;;  %v1083_v9 = vpack.c.bf16 %v345_v5, %v344_v4  ;;  %v347_v10 = vmax.f32 %v283_v6, 0.0 }
  0x4d   :  { %1150 = vst [vmem:[%s1505_s3 + $0xf0] sm:$0xff] %v1083_v9   ;;  %v1088_v1 = vpack.c.bf16 %v347_v10, %v346_v8 }
  0x4f   :  { %1151 = vst [vmem:[%s1505_s3 + $0xf8] sm:$0xff] %v1088_v1  }

// kernel: conv_relu_block.2
= control target key start
LH: loop header
LB: loop body
LE: loop exit
PB: predicated region body
PF: predicated region fallthrough
CT: control target
= control target key end

     0   :  { %s5109_s21 = smov 0   ;;  %s5111_s22 = smov 0   ;;  %s6393_s0 = inlined_call_operand.vmem [shape: bf16[2,16,16,128], index: 0, kind: input, shape index: {}, may-alias: {0,1,2}]   ;;  %s6394_s1 = inlined_call_operand.vmem [shape: bf16[2,16,16,128], index: 1, kind: input, shape index: {}, may-alias: {0,1,2}]   ;;  %s6395_s2 = inlined_call_operand.vmem [shape: bf16[2,16,16,128], index: 2, kind: input, shape index: {}, may-alias: {0,1,2}]   ;;  %s6396_s3 = inlined_call_operand.vmem [shape: bf16[3,384,128], index: 3, kind: input, shape index: {}]   ;;  %s6397_s4 = inlined_call_operand.vmem [shape: bf16[2,256,128], index: 4, kind: output, shape index: {0}]   ;;  %s6398_s5 = inlined_call_operand.vmem [shape: f32[2,1,1,128], index: 5, kind: output, shape index: {1}]   ;;  %s6399_s6 = inlined_call_operand.vmem [shape: f32[2,1,1,128], index: 6, kind: output, shape index: {2}]  }
   0x1   :  { %s5113_s1 = smov 0  }
   0x2 LB: > { %s29_s2 = sadd.s32 1, %s5067_s22  ;;  %p3927_p0 = scmp.ge.s32.totalorder %s5071_s1, 1  ;;  %s5071_s1 = sphi %s5113_s1, %s17_s1   ;;  %s5067_s22 = sphi %s5111_s22, %s6465_s22   ;;  %s5063_s21 = sphi %s5109_s21, %s6464_s21  }
   0x3   : > { %p31_p1 = scmp.ge.s32.totalorder %s29_s2, 2  ;;  %p311_p2 = scmp.lt.s32.totalorder %s5071_s1, 3 }
   0x5   : > { %s6467_s2 = smov (%p31_p1, %s29_s2), 0  ;;  %p312_p3 = pnand %p3927_p0, %p311_p2 }
   0x7   : > { %315 = sbr.rel (%p312_p3) target bundleno = 585 (0x249), region = 36 }
   0xc   : > { %v4919_v0 = vld [vmem:[%s6396_s3 + $0x78] sm:$0xff]   ;;  %v5073_v2 = vmov 0   ;;  %v4921_v3 = vld [vmem:[%s6396_s3 + $0x70] sm:$0xff]   ;;  %v4923_v5 = vld [vmem:[%s6396_s3 + $0x68] sm:$0xff]   ;;  %p391_p4 = scmp.lt.s32.totalorder %s5063_s21, 1  ;;  %vm872_vm0 = vcmask 1043456  }
   0xd   : > { %v4920_v1 = vld [vmem:[%s6396_s3 + $0x38] sm:$0xff]   ;;  %462 = vst [vmem:[#allocation2] sm:$0xf] %v5073_v2  ;;  %463 = vst [vmem:[#allocation2 + $0x4] sm:$0xf] %v5073_v2  ;;  %4326 = vmatprep.subr.bf16.mxu0 %v4919_v0  ;;  %4878 = vmatprep.subr.bf16.mxu1 %v4919_v0  ;;  %v4922_v4 = vld [vmem:[%s6396_s3 + $0x30] sm:$0xff]  }
   0xe   : > { %464 = vst [vmem:[#allocation2 + $0x8] sm:$0x1] %v5073_v2  ;;  %465 = vst [vmem:[#allocation2 + $0xc] sm:$0xf] %v5073_v2  ;;  %4327 = vmatpush3.bf16.msra.mxu0 %v4920_v1  ;;  %4886 = vmatpush3.bf16.msra.mxu1 %v4920_v1  ;;  %v4924_v6 = vld [vmem:[%s6396_s3 + $0x28] sm:$0xff]   ;;  %v4925_v7 = vld [vmem:[%s6396_s3 + $0x60] sm:$0xff]  }
   0xf   : > { %466 = vst [vmem:[#allocation2 + $0x10] sm:$0xf] %v5073_v2  ;;  %467 = vst [vmem:[#allocation2 + $0x14] sm:$0x1] %v5073_v2  ;;  %4328 = vmatprep.subr.bf16.mxu0 %v4921_v3  ;;  %4879 = vmatprep.subr.bf16.mxu1 %v4921_v3  ;;  %s6469_s21 = smov (!%p391_p4, %s5063_s21), 1  ;;  %v4926_v8 = vld [vmem:[%s6396_s3 + $0x20] sm:$0xff]  }
  0x10   : > { %468 = vst [vmem:[#allocation2 + $0x18] sm:$0xf] %v5073_v2  ;;  %469 = vst [vmem:[#allocation2 + $0x1c] sm:$0xf] %v5073_v2  ;;  %v4927_v9 = vld [vmem:[%s6396_s3 + $0x58] sm:$0xff]   ;;  %s4194_s17 = sshll.u32 %s6469_s21, 7  ;;  %s454_s30 = scalar_lea.vmem %s6398_s5, %s6469_s21 }
  0x11   : > { %470 = vst [vmem:[#allocation2 + $0x20] sm:$0x1] %v5073_v2  ;;  %471 = vst [vmem:[#allocation2 + $0x24] sm:$0xf] %v5073_v2  ;;  %v4928_v10 = vld [vmem:[%s6396_s3 + $0x18] sm:$0xff]   ;;  %v4929_v11 = vld [vmem:[%s6396_s3 + $0x50] sm:$0xff]   ;;  %s5172_s26 = scalar_lea.vmem %s6393_s0, %s4194_s17  ;;  %s460_s9 = scalar_lea.vmem %s6399_s6, %s6469_s21 }
  0x12   : > { %472 = vst [vmem:[#allocation2 + $0x28] sm:$0xf] %v5073_v2  ;;  %473 = vst [vmem:[#allocation2 + $0x2c] sm:$0x1] %v5073_v2  ;;  %4329 = vmatpush3.bf16.msra.mxu0 %v4922_v4  ;;  %4887 = vmatpush3.bf16.msra.mxu1 %v4922_v4  ;;  %vm1291_vm1 = vsmask.f32 7424 }
  0x13   : > { %474 = vst [vmem:[#allocation2 + $0x30] sm:$0xf] %v5073_v2  ;;  %475 = vst [vmem:[#allocation2 + $0x34] sm:$0xf] %v5073_v2  ;;  %4330 = vmatprep.subr.bf16.mxu0 %v4923_v5  ;;  %4880 = vmatprep.subr.bf16.mxu1 %v4923_v5  ;;  %vm879_vm2 = vcmask 1040384   ;;  %v4930_v18 = vld [vmem:[%s6396_s3 + $0x10] sm:$0xff]  }
  0x14   : > { %476 = vst [vmem:[#allocation2 + $0x38] sm:$0x1] %v5073_v2  ;;  %477 = vst [vmem:[#allocation2 + $0x3c] sm:$0xf] %v5073_v2  ;;  %v1057_v12 = vld [vmem:[#allocation2] sm:$0xf] }
  0x15   : > { %478 = vst [vmem:[#allocation2 + $0x40] sm:$0xf] %v5073_v2  ;;  %479 = vst [vmem:[#allocation2 + $0x44] sm:$0x1] %v5073_v2  ;;  %v5174_v13 = vld [vmem:[#allocation2 + $0x4] sm:$0xf] }
  0x16   : > { %480 = vst [vmem:[#allocation2 + $0x48] sm:$0xf] %v5073_v2  ;;  %481 = vst [vmem:[#allocation2 + $0x4c] sm:$0xf] %v5073_v2  ;;  %4331 = vmatpush3.bf16.msra.mxu0 %v4924_v6  ;;  %4888 = vmatpush3.bf16.msra.mxu1 %v4924_v6  ;;  %v5177_v14 = vcombine.low %v1057_v12, %v5174_v13  ;;  %v538_v16 = vld [vmem:[%s5172_s26 + $0x58] sm:$0xf] }
  0x17   : > { %482 = vst [vmem:[#allocation2 + $0x50] sm:$0x1] %v5073_v2  ;;  %483 = vst [vmem:[#allocation2 + $0x54] sm:$0xf] %v5073_v2  ;;  %4332 = vmatprep.subr.bf16.mxu0 %v4925_v7  ;;  %4881 = vmatprep.subr.bf16.mxu1 %v4925_v7  ;;  %v539_v17 = vld [vmem:[%s5172_s26 + $0x5c] sm:$0xf] }
  0x18   : > { %484 = vst [vmem:[#allocation2 + $0x58] sm:$0xf] %v5073_v2  ;;  %485 = vst [vmem:[#allocation2 + $0x5c] sm:$0x1] %v5073_v2  ;;  %vm548_vm3 = vsmask.f32 256 }
  0x19   : > { %486 = vst [vmem:[#allocation2 + $0x60] sm:$0xf] %v5073_v2  ;;  %487 = vst [vmem:[#allocation2 + $0x64] sm:$0xf] %v5073_v2  ;;  %v1293_v19 = vshrl.u32 %v5177_v14, 16  ;;  %v1295_v20 = vshll.u32 %v5177_v14, 16 }
  0x1a   : > { %488 = vst [vmem:[#allocation2 + $0x68] sm:$0x1] %v5073_v2  ;;  %489 = vst [vmem:[#allocation2 + $0x6c] sm:$0xf] %v5073_v2  ;;  %4333 = vmatpush3.bf16.msra.mxu0 %v4926_v8  ;;  %4889 = vmatpush3.bf16.msra.mxu1 %v4926_v8  ;;  %vm549_vm4 = vsmask.f32 4368 }
  0x1b   : > { %490 = vst [vmem:[#allocation2 + $0x70] sm:$0xf] %v5073_v2  ;;  %491 = vst [vmem:[#allocation2 + $0x74] sm:$0x1] %v5073_v2  ;;  %4334 = vmatprep.subr.bf16.mxu0 %v4927_v9  ;;  %4882 = vmatprep.subr.bf16.mxu1 %v4927_v9  ;;  %v4931_v22 = vld [vmem:[%s6396_s3 + $0x48] sm:$0xff]   ;;  %v739_v23 = vshrl.u32 %v538_v16, 16 }
  0x1c   : > { %492 = vst [vmem:[#allocation2 + $0x78] sm:$0xf] %v5073_v2  ;;  %493 = vst [vmem:[#allocation2 + $0x7c] sm:$0xf] %v5073_v2  ;;  %v742_v24 = vshll.u32 %v538_v16, 16  ;;  %v747_v25 = vshrl.u32 %v539_v17, 16 }
  0x1d   : > { %494 = vst [vmem:[#allocation2 + $0x80] sm:$0x1] %v5073_v2  ;;  %495 = vst [vmem:[#allocation2 + $0x84] sm:$0xf] %v5073_v2  ;;  %v750_v26 = vshll.u32 %v539_v17, 16  ;;  %v4932_v28 = vld [vmem:[%s6396_s3 + $0x8] sm:$0xff]  }
  0x1e   : > { %496 = vst [vmem:[#allocation2 + $0x88] sm:$0xf] %v5073_v2  ;;  %497 = vst [vmem:[#allocation2 + $0x8c] sm:$0x1] %v5073_v2  ;;  %4335 = vmatpush3.bf16.msra.mxu0 %v4928_v10  ;;  %4890 = vmatpush3.bf16.msra.mxu1 %v4928_v10  ;;  %v1297_v29 = vrot.slane %v1295_v20, 1  ;;  %v741_v34 = vrot.slane %v739_v23, 7 }
  0x1f   : > { %498 = vst [vmem:[#allocation2 + $0x90] sm:$0xf] %v5073_v2  ;;  %499 = vst [vmem:[#allocation2 + $0x94] sm:$0xf] %v5073_v2  ;;  %4336 = vmatprep.subr.bf16.mxu0 %v4929_v11  ;;  %4883 = vmatprep.subr.bf16.mxu1 %v4929_v11  ;;  %vm873_vm7 = vsmask.f32 7938 }
  0x20   : > { %500 = vst [vmem:[#allocation2 + $0x98] sm:$0x1] %v5073_v2  ;;  %501 = vst [vmem:[#allocation2 + $0x9c] sm:$0xf] %v5073_v2  ;;  %v749_v35 = vrot.slane %v747_v25, 7  ;;  %v1298_v37 = vor.u32 %v1297_v29, %v1293_v19  ;;  %v4933_v38 = vld [vmem:[%s6396_s3 + $0x40] sm:$0xff]   ;;  %v744_v39 = vor.u32 %v742_v24, %v741_v34 }
  0x21   : > { %502 = vst [vmem:[#allocation2 + $0xa0] sm:$0xf] %v5073_v2  ;;  %503 = vst [vmem:[#allocation2 + $0xa4] sm:$0x1] %v5073_v2  ;;  %v745_v40 = vrot.slane %v741_v34, 4  ;;  %v4934_v43 = vld [vmem:[%s6396_s3] sm:$0xff]  }
  0x22   : > { %504 = vst [vmem:[#allocation2 + $0xa8] sm:$0xf] %v5073_v2  ;;  %505 = vst [vmem:[#allocation2 + $0xac] sm:$0xf] %v5073_v2  ;;  %4337 = vmatpush3.bf16.msra.mxu0 %v4930_v18  ;;  %4891 = vmatpush3.bf16.msra.mxu1 %v4930_v18  ;;  %v752_v41 = vor.u32 %v750_v26, %v749_v35  ;;  %v754_v42 = vrot.slane %v749_v35, 4  ;;  %v5229_v50 = vld [vmem:[%s6396_s3 + $0xb8] sm:$0xff]  }
  0x23   : > { %506 = vst [vmem:[#allocation2 + $0xb0] sm:$0x1] %v5073_v2  ;;  %507 = vst [vmem:[#allocation2 + $0xb4] sm:$0xf] %v5073_v2  ;;  %4338 = vmatprep.subr.bf16.mxu0 %v4931_v22  ;;  %4884 = vmatprep.subr.bf16.mxu1 %v4931_v22  ;;  %v516_v45 = vld [vmem:[%s5172_s26] sm:$0xf] }
  0x24   : > { %508 = vst [vmem:[#allocation2 + $0xb8] sm:$0xf] %v5073_v2  ;;  %509 = vst [vmem:[#allocation2 + $0xbc] sm:$0x1] %v5073_v2  ;;  %v517_v46 = vld [vmem:[%s5172_s26 + $0x4] sm:$0xf] }
  0x25   : > { %510 = vst [vmem:[#allocation2 + $0xc0] sm:$0xf] %v5073_v2  ;;  %511 = vst [vmem:[#allocation2 + $0xc4] sm:$0xf] %v5073_v2  ;;  %v4940_v51 = vld [vmem:[%s6396_s3 + $0x178] sm:$0xff]   ;;  %v552_v52 = vshrl.u32 %v516_v45, 16 }
  0x26   : > { %512 = vst [vmem:[#allocation2 + $0xc8] sm:$0x1] %v5073_v2  ;;  %513 = vst [vmem:[#allocation2 + $0xcc] sm:$0xf] %v5073_v2  ;;  %v954_v32 = vld [vmem:[#allocation2 + $0x90] sm:$0xf]  ;;  %4339 = vmatpush3.bf16.msra.mxu0 %v4932_v28  ;;  %4892 = vmatpush3.bf16.msra.mxu1 %v4932_v28 }
  0x27   : > { %514 = vst [vmem:[#allocation2 + $0xd0] sm:$0xf] %v5073_v2  ;;  %515 = vst [vmem:[#allocation2 + $0xd4] sm:$0x1] %v5073_v2  ;;  %v958_v33 = vld [vmem:[#allocation2 + $0x98] sm:$0x1]  ;;  %4340 = vmatprep.subr.bf16.mxu0 %v4933_v38  ;;  %4885 = vmatprep.subr.bf16.mxu1 %v4933_v38 }
  0x28   : > { %v5179_v15 = vld [vmem:[#allocation2 + $0x8] ss:$0 sps:$4 sm:$0x11]   ;;  %vm5194_vm5 = vmand %vm879_vm2, %vm548_vm3  ;;  %v540_v53 = vld [vmem:[%s5172_s26 + $0x60] sm:$0xf]  ;;  %v555_v54 = vshll.u32 %v516_v45, 16 }
  0x29   : > { %v1300_v21 = vshll.u32 %v5179_v15, 16  ;;  %vm5202_vm6 = vmor %vm548_vm3, %vm549_vm4  ;;  %v959_v49 = vsel %vm5194_vm5, %v754_v42, %v958_v33  ;;  %v560_v55 = vshrl.u32 %v517_v46, 16  ;;  %v563_v56 = vshll.u32 %v517_v46, 16  ;;  %v875_v57 = vld [vmem:[#allocation2 + $0xc] sm:$0xf]  ;;  %v4948_v18 = vld [vmem:[%s6396_s3 + $0x170] sm:$0xff]  }
  0x2a   : > { %vm5207_vm8 = vmand %vm872_vm0, %vm873_vm7  ;;  %v753_v47 = vsel %vm5202_vm6, %v745_v40, %v752_v41  ;;  %960 = vst [vmem:[#allocation2 + $0x98] sm:$0x1] %v959_v49  ;;  %v541_v58 = vld [vmem:[%s5172_s26 + $0x64] sm:$0xf]  ;;  %v756_v59 = vshrl.u32 %v540_v53, 16  ;;  %v554_v60 = vrot.slane %v552_v52, 7  ;;  %4341 = vmatpush3.bf16.msra.mxu0 %v4934_v43  ;;  %4893 = vmatpush3.bf16.msra.mxu1 %v4934_v43 }
  0x2b   : > { %v1302_v30 = vrot.slane %v1300_v21, 1  ;;  %v955_v48 = vsel %vm5207_vm8, %v744_v39, %v954_v32  ;;  %957 = vst [vmem:[#allocation2 + $0x94] sm:$0xf] %v753_v47  ;;  %v881_v61 = vld [vmem:[#allocation2 + $0x14] sm:$0x1]  ;;  %v759_v62 = vshll.u32 %v540_v53, 16  ;;  %4734 = vmatprep.subr.bf16.mxu1 %v5229_v50  ;;  %4782 = vmatprep.subr.bf16.mxu0 %v4940_v51 }
  0x2c   : > { %956 = vst [vmem:[#allocation2 + $0x90] sm:$0xf] %v955_v48  ;;  %v764_v63 = vshrl.u32 %v541_v58, 16  ;;  %v767_v0 = vshll.u32 %v541_v58, 16  ;;  %v961_v1 = vld [vmem:[#allocation2 + $0x9c] sm:$0xf]  ;;  %v557_v5 = vor.u32 %v555_v54, %v554_v60 }
  0x2d   : > { %v1303_v44 = vsel %vm1291_vm1, %v1298_v37, %v1302_v30  ;;  %v562_v2 = vrot.slane %v560_v55, 7  ;;  %v758_v3 = vrot.slane %v756_v59, 7  ;;  %v965_v4 = vld [vmem:[#allocation2 + $0xa4] sm:$0x1]  ;;  %v558_v6 = vrot.slane %v554_v60, 4  ;;  %v4960_v54 = vld [vmem:[%s6396_s3 + $0x168] sm:$0xff]  }
  0x2e   : > { %1877 = vmatprep.mubr.bf16.mxu0 %v1303_v44  ;;  %v766_v7 = vrot.slane %v764_v63, 7  ;;  %v876_v12 = vsel %vm5207_vm8, %v557_v5, %v875_v57  ;;  %v518_v19 = vld [vmem:[%s5172_s26 + $0x8] sm:$0xf]  ;;  %v519_v23 = vld [vmem:[%s5172_s26 + $0xc] sm:$0xf]  ;;  %vm1580_vm9 = vcmask 1046528  }
  0x2f   : > { %v565_v8 = vor.u32 %v563_v56, %v562_v2  ;;  %v567_v9 = vrot.slane %v562_v2, 4  ;;  %v761_v10 = vor.u32 %v759_v62, %v758_v3  ;;  %v762_v11 = vrot.slane %v758_v3, 4  ;;  %877 = vst [vmem:[#allocation2 + $0xc] sm:$0xf] %v876_v12  ;;  %1878 = vmatmul.mubr.bf16.vlgmr.msra.gmra.mxu0 %v5177_v14  ;;  %v884_v37 = vld [vmem:[#allocation2 + $0x18] sm:$0xf] }
  0x30   : > { %v769_v16 = vor.u32 %v767_v0, %v766_v7  ;;  %v771_v17 = vrot.slane %v766_v7, 4  ;;  %v569_v24 = vshrl.u32 %v518_v19, 16  ;;  %4783 = vmatpush3.bf16.msra.mxu0 %v4940_v51  ;;  %v572_v34 = vshll.u32 %v518_v19, 16  ;;  %v542_v38 = vld [vmem:[%s5172_s26 + $0x68] sm:$0xf]  ;;  %v4941_v0 = vld [vmem:[%s6396_s3 + $0xb0] sm:$0xff]  }
  0x31   : > { %v566_v20 = vsel %vm5202_vm6, %v558_v6, %v565_v8  ;;  %v882_v21 = vsel %vm5194_vm5, %v567_v9, %v881_v61  ;;  %v962_v22 = vsel %vm5207_vm8, %v761_v10, %v961_v1  ;;  %v4938_v32 = vld [vmem:[#allocation2 + $0x98] ss:$0 sps:$4 sm:$0x11]   ;;  %v577_v14 = vshrl.u32 %v519_v23, 16  ;;  %4784 = vmatprep.subr.bf16.mxu0 %v4948_v18  ;;  %v543_v43 = vld [vmem:[%s5172_s26 + $0x6c] sm:$0xf] }
  0x32   : > { %v1082_v26 = vld [vmem:[#allocation2 + $0x94] sm:$0xf]  ;;  %878 = vst [vmem:[#allocation2 + $0x10] sm:$0xf] %v566_v20  ;;  %883 = vst [vmem:[#allocation2 + $0x14] sm:$0x1] %v882_v21  ;;  %v770_v28 = vsel %vm5202_vm6, %v762_v11, %v769_v16  ;;  %v966_v29 = vsel %vm5194_vm5, %v771_v17, %v965_v4 }
  0x33   : > { %v1081_v25 = vld [vmem:[#allocation2 + $0x90] sm:$0xf]  ;;  %963 = vst [vmem:[#allocation2 + $0x9c] sm:$0xf] %v962_v22  ;;  %964 = vst [vmem:[#allocation2 + $0xa0] sm:$0xf] %v770_v28 }
  0x34   : > { %v5255_v30 = vcombine.low %v1081_v25, %v1082_v26  ;;  %967 = vst [vmem:[#allocation2 + $0xa4] sm:$0x1] %v966_v29  ;;  %v571_v33 = vrot.slane %v569_v24, 7  ;;  %v580_v35 = vshll.u32 %v519_v23, 16  ;;  %v1444_v41 = vshll.u32 %v4938_v32, 16  ;;  %4785 = vmatpush3.bf16.msra.mxu0 %v4948_v18  ;;  %v4968_v28 = vld [vmem:[%s6396_s3 + $0x160] sm:$0xff]  }
  0x35   : > { %v579_v45 = vrot.slane %v577_v14, 7  ;;  %v773_v46 = vshrl.u32 %v542_v38, 16  ;;  %v776_v47 = vshll.u32 %v542_v38, 16  ;;  %v888_v52 = vld [vmem:[#allocation2 + $0x20] sm:$0x1]  ;;  %v781_v53 = vshrl.u32 %v543_v43, 16  ;;  %4786 = vmatprep.subr.bf16.mxu0 %v4960_v54 }
  0x36   : > { %v1437_v39 = vshrl.u32 %v5255_v30, 16  ;;  %v1439_v40 = vshll.u32 %v5255_v30, 16  ;;  %v574_v42 = vor.u32 %v572_v34, %v571_v33  ;;  %v575_v44 = vrot.slane %v571_v33, 4  ;;  %v1059_v55 = vld [vmem:[#allocation2 + $0xc] sm:$0xf]  ;;  %v5020_v27 = vld [vmem:[%s6396_s3 + $0x230] sm:$0xff]  }
  0x37   : > { %v1446_v49 = vrot.slane %v1444_v41, 1  ;;  %v582_v56 = vor.u32 %v580_v35, %v579_v45  ;;  %v584_v57 = vrot.slane %v579_v45, 4  ;;  %v775_v58 = vrot.slane %v773_v46, 7  ;;  %v968_v60 = vld [vmem:[#allocation2 + $0xa8] sm:$0xf] }
  0x38   : > { %v1441_v48 = vrot.slane %v1439_v40, 1  ;;  %v885_v51 = vsel %vm5207_vm8, %v574_v42, %v884_v37  ;;  %v784_v59 = vshll.u32 %v543_v43, 16  ;;  %v972_v11 = vld [vmem:[#allocation2 + $0xb0] sm:$0x1]  ;;  %4787 = vmatpush3.bf16.msra.mxu0 %v4960_v54  ;;  %v783_v18 = vrot.slane %v781_v53, 7  ;;  %v4946_v33 = vld [vmem:[%s6396_s3 + $0xa8] sm:$0xff]  }
  0x39   : > { %886 = vst [vmem:[#allocation2 + $0x18] sm:$0xf] %v885_v51  ;;  %v5266_v62 = vld [vmem:[#allocation2 + $0x10] sm:$0xf]  ;;  %v583_v4 = vsel %vm5202_vm6, %v575_v44, %v582_v56  ;;  %v889_v5 = vsel %vm5194_vm5, %v584_v57, %v888_v52  ;;  %v778_v6 = vor.u32 %v776_v47, %v775_v58  ;;  %v779_v10 = vrot.slane %v775_v58, 4  ;;  %4788 = vmatprep.subr.bf16.mxu0 %v4968_v28  ;;  %v4947_v47 = vld [vmem:[%s6396_s3 + $0xa0] sm:$0xff]  }
  0x3a   : > { %v1442_v61 = vor.u32 %v1441_v48, %v1437_v39  ;;  %v1083_v63 = vld [vmem:[#allocation2 + $0x9c] sm:$0xf]  ;;  %v5272_v1 = vcombine.low %v1059_v55, %v5266_v62  ;;  %v5274_v2 = vld [vmem:[#allocation2 + $0x14] ss:$0 sps:$4 sm:$0x11]   ;;  %v786_v25 = vor.u32 %v784_v59, %v783_v18  ;;  %v788_v26 = vrot.slane %v783_v18, 4 }
  0x3b   : > { %v1084_v3 = vld [vmem:[#allocation2 + $0xa0] sm:$0xf]  ;;  %v4945_v9 = vld [vmem:[#allocation2 + $0xa4] ss:$0 sps:$4 sm:$0x11]   ;;  %v1312_v17 = vshll.u32 %v5274_v2, 16  ;;  %v969_v22 = vsel %vm5207_vm8, %v778_v6, %v968_v60 }
  0x3c   : > { %v5281_v7 = vsel %vm1291_vm1, %v1442_v61, %v1446_v49  ;;  %v5283_v8 = vcombine.low %v1083_v63, %v1084_v3  ;;  %887 = vst [vmem:[#allocation2 + $0x1c] sm:$0xf] %v583_v4  ;;  %890 = vst [vmem:[#allocation2 + $0x20] sm:$0x1] %v889_v5  ;;  %v1305_v12 = vshrl.u32 %v5272_v1, 16  ;;  %v1307_v16 = vshll.u32 %v5272_v1, 16  ;;  %4789 = vmatpush3.bf16.msra.mxu0 %v4968_v28 }
  0x3d   : > { %1973 = vmatprep.mubr.bf16.mxu1 %v5281_v7  ;;  %v1456_v21 = vshll.u32 %v4945_v9, 16  ;;  %v1314_v24 = vrot.slane %v1312_v17, 1  ;;  %970 = vst [vmem:[#allocation2 + $0xa8] sm:$0xf] %v969_v22  ;;  %v973_v35 = vsel %vm5194_vm5, %v788_v26, %v972_v11  ;;  %v520_v37 = vld [vmem:[%s5172_s26 + $0x10] sm:$0xf] }
  0x3e   : > { %6416 = vst [vmem:[#allocation4_spill] sm:$0xff] %v5283_v8  ;;  %1974 = vmatmul.mubr.bf16.vlgmr.msra.gmra.mxu1 %v5255_v30  ;;  %v1449_v19 = vshrl.u32 %v5283_v8, 16  ;;  %v1451_v20 = vshll.u32 %v5283_v8, 16  ;;  %v1309_v23 = vrot.slane %v1307_v16, 1  ;;  %v521_v38 = vld [vmem:[%s5172_s26 + $0x14] sm:$0xf] }
  0x3f   : > { %4735 = vmatpush3.bf16.msra.mxu1 %v5229_v50  ;;  %v1458_v32 = vrot.slane %v1456_v21, 1  ;;  %v787_v50 = vsel %vm5202_vm6, %v779_v10, %v786_v25  ;;  %974 = vst [vmem:[#allocation2 + $0xb0] sm:$0x1] %v973_v35  ;;  %v586_v40 = vshrl.u32 %v520_v37, 16  ;;  %v589_v41 = vshll.u32 %v520_v37, 16  ;;  %v4953_v63 = vld [vmem:[%s6396_s3 + $0x98] sm:$0xff]  }
  0x40   : > { %4736 = vmatprep.subr.bf16.mxu1 %v4941_v0  ;;  %v1453_v29 = vrot.slane %v1451_v20, 1  ;;  %v1310_v34 = vor.u32 %v1309_v23, %v1305_v12  ;;  %v1061_v14 = vld [vmem:[#allocation2 + $0x18] sm:$0xf]  ;;  %971 = vst [vmem:[#allocation2 + $0xac] sm:$0xf] %v787_v50  ;;  %v594_v42 = vshrl.u32 %v521_v38, 16 }
  0x41   : > { %v597_v45 = vshll.u32 %v521_v38, 16  ;;  %v588_v51 = vrot.slane %v586_v40, 7  ;;  %v891_v53 = vld [vmem:[#allocation2 + $0x24] sm:$0xf]  ;;  %v895_v54 = vld [vmem:[#allocation2 + $0x2c] sm:$0x1] }
  0x42   : > { %v1454_v39 = vor.u32 %v1453_v29, %v1449_v19  ;;  %v5308_v43 = vsel %vm1291_vm1, %v1310_v34, %v1314_v24  ;;  %v596_v52 = vrot.slane %v594_v42, 7  ;;  %v544_v55 = vld [vmem:[%s5172_s26 + $0x70] sm:$0xf]  ;;  %v545_v60 = vld [vmem:[%s5172_s26 + $0x74] sm:$0xf]  ;;  %v4981_v16 = vld [vmem:[%s6396_s3 + $0x158] sm:$0xff]  }
  0x43   : > { %4737 = vmatpush3.bf16.msra.mxu1 %v4941_v0  ;;  %v5310_v44 = vld [vmem:[#allocation2 + $0x1c] sm:$0xf]  ;;  %1885 = vmatprep.mubr.bf16.mxu0 %v5308_v43  ;;  %v5322_v49 = vld [vmem:[#allocation2 + $0x20] ss:$0 sps:$4 sm:$0x11]   ;;  %v591_v59 = vor.u32 %v589_v41, %v588_v51  ;;  %v592_v0 = vrot.slane %v588_v51, 4 }
  0x44   : > { %v5314_v46 = vsel %vm1291_vm1, %v1454_v39, %v1458_v32  ;;  %4738 = vmatprep.subr.bf16.mxu1 %v4946_v33  ;;  %v5320_v48 = vcombine.low %v1061_v14, %v5310_v44  ;;  %1886 = vmatmul.mubr.bf16.gmra.mxu0 %v5272_v1  ;;  %v1324_v58 = vshll.u32 %v5322_v49, 16  ;;  %v1085_v61 = vld [vmem:[#allocation2 + $0xa8] sm:$0xf]  ;;  %v599_v3 = vor.u32 %v597_v45, %v596_v52  ;;  %v975_v12 = vld [vmem:[#allocation2 + $0xb4] sm:$0xf] }
  0x45   : > { %1981 = vmatprep.mubr.bf16.mxu1 %v5314_v46  ;;  %v601_v4 = vrot.slane %v596_v52, 4  ;;  %v790_v5 = vshrl.u32 %v544_v55, 16  ;;  %v892_v10 = vsel %vm5207_vm8, %v591_v59, %v891_v53  ;;  %v793_v11 = vshll.u32 %v544_v55, 16  ;;  %v979_v26 = vld [vmem:[#allocation2 + $0xbc] sm:$0x1]  ;;  %4790 = vmatprep.subr.bf16.mxu0 %v4981_v16  ;;  %v4954_v35 = vld [vmem:[%s6396_s3 + $0x90] sm:$0xff]  }
  0x46   : > { %1982 = vmatmul.mubr.bf16.gmra.mxu1 %v5283_v8  ;;  %v1317_v56 = vshrl.u32 %v5320_v48, 16  ;;  %v1319_v57 = vshll.u32 %v5320_v48, 16  ;;  %v1326_v9 = vrot.slane %v1324_v58, 1  ;;  %v600_v18 = vsel %vm5202_vm6, %v592_v0, %v599_v3  ;;  %893 = vst [vmem:[#allocation2 + $0x24] sm:$0xf] %v892_v10  ;;  %4791 = vmatpush3.bf16.msra.mxu0 %v4981_v16  ;;  %v4959_v59 = vld [vmem:[%s6396_s3 + $0x88] sm:$0xff]  }
  0x47   : > { %4739 = vmatpush3.bf16.msra.mxu1 %v4946_v33  ;;  %v5340_v17 = vld [vmem:[#allocation2 + $0xac] sm:$0xf]  ;;  %v896_v19 = vsel %vm5194_vm5, %v601_v4, %v895_v54  ;;  %v792_v20 = vrot.slane %v790_v5, 7  ;;  %v798_v21 = vshrl.u32 %v545_v60, 16  ;;  %894 = vst [vmem:[#allocation2 + $0x28] sm:$0xf] %v600_v18 }
  0x48   : > { %4740 = vmatprep.subr.bf16.mxu1 %v4947_v47  ;;  %v1321_v6 = vrot.slane %v1319_v57, 1  ;;  %v5347_v23 = vcombine.low %v1085_v61, %v5340_v17  ;;  %v5349_v24 = vld [vmem:[#allocation2 + $0xb0] ss:$0 sps:$4 sm:$0x11]   ;;  %897 = vst [vmem:[#allocation2 + $0x2c] sm:$0x1] %v896_v19 }
  0x49   : > { %v801_v25 = vshll.u32 %v545_v60, 16  ;;  %v795_v28 = vor.u32 %v793_v11, %v792_v20  ;;  %v796_v29 = vrot.slane %v792_v20, 4  ;;  %v800_v32 = vrot.slane %v798_v21, 7  ;;  %v522_v40 = vld [vmem:[%s5172_s26 + $0x18] sm:$0xf]  ;;  %v4961_v10 = vld [vmem:[%s6396_s3 + $0x80] sm:$0xff]  }
  0x4a   : > { %v1322_v22 = vor.u32 %v1321_v6, %v1317_v56  ;;  %6417 = vst [vmem:[#allocation5_spill] sm:$0xff] %v5347_v23  ;;  %v1461_v34 = vshrl.u32 %v5347_v23, 16  ;;  %v1463_v14 = vshll.u32 %v5347_v23, 16  ;;  %v1468_v50 = vshll.u32 %v5349_v24, 16  ;;  %v523_v45 = vld [vmem:[%s5172_s26 + $0x1c] sm:$0xf] }
  0x4b   : > { %4741 = vmatpush3.bf16.msra.mxu1 %v4947_v47  ;;  %v803_v37 = vor.u32 %v801_v25, %v800_v32  ;;  %v805_v38 = vrot.slane %v800_v32, 4  ;;  %v976_v39 = vsel %vm5207_vm8, %v795_v28, %v975_v12  ;;  %v603_v47 = vshrl.u32 %v522_v40, 16  ;;  %v898_v56 = vld [vmem:[#allocation2 + $0x30] sm:$0xf]  ;;  %v1111_v61 = vld [vmem:[#allocation2] sm:$0xe] }
  0x4c   : > { %v5352_v33 = vsel %vm1291_vm1, %v1322_v22, %v1326_v9  ;;  %4742 = vmatprep.subr.bf16.mxu1 %v4953_v63  ;;  %v1465_v41 = vrot.slane %v1463_v14, 1  ;;  %v1470_v42 = vrot.slane %v1468_v50, 1  ;;  %977 = vst [vmem:[#allocation2 + $0xb4] sm:$0xf] %v976_v39  ;;  %v606_v51 = vshll.u32 %v522_v40, 16  ;;  %v4988_v28 = vld [vmem:[%s6396_s3 + $0x150] sm:$0xff]  }
  0x4d   : > { %1893 = vmatprep.mubr.bf16.mxu0 %v5352_v33  ;;  %v804_v52 = vsel %vm5202_vm6, %v796_v29, %v803_v37  ;;  %v980_v53 = vsel %vm5194_vm5, %v805_v38, %v979_v26  ;;  %v611_v54 = vshrl.u32 %v523_v45, 16  ;;  %v614_v55 = vshll.u32 %v523_v45, 16  ;;  %v1063_v58 = vld [vmem:[#allocation2 + $0x24] sm:$0xf]  ;;  %v902_v16 = vld [vmem:[#allocation2 + $0x38] sm:$0x1]  ;;  %4792 = vmatprep.subr.bf16.mxu0 %v4988_v28 }
  0x4e   : > { %1894 = vmatmul.mubr.bf16.gmra.mxu0 %v5320_v48  ;;  %v1466_v57 = vor.u32 %v1465_v41, %v1461_v34  ;;  %978 = vst [vmem:[#allocation2 + $0xb8] sm:$0xf] %v804_v52  ;;  %981 = vst [vmem:[#allocation2 + $0xbc] sm:$0x1] %v980_v53  ;;  %v605_v60 = vrot.slane %v603_v47, 7  ;;  %v3974_v3 = vcombine.low %v1111_v61, %v5174_v13  ;;  %v1582_v4 = vrot.slane %v5179_v15, 1 }
  0x4f   : > { %4743 = vmatpush3.bf16.msra.mxu1 %v4953_v63  ;;  %v5373_v63 = vld [vmem:[#allocation2 + $0x28] sm:$0xf]  ;;  %v613_v0 = vrot.slane %v611_v54, 7  ;;  %v5383_v9 = vld [vmem:[#allocation2 + $0x2c] ss:$0 sps:$4 sm:$0x11]   ;;  %4793 = vmatpush3.bf16.msra.mxu0 %v4988_v28 }
  0x50   : > { %4744 = vmatprep.subr.bf16.mxu1 %v4954_v35  ;;  %v5378_v5 = vsel %vm1291_vm1, %v1466_v57, %v1470_v42  ;;  %v5381_v6 = vcombine.low %v1063_v58, %v5373_v63  ;;  %v608_v11 = vor.u32 %v606_v51, %v605_v60  ;;  %v609_v12 = vrot.slane %v605_v60, 4  ;;  %v1112_v26 = vld [vmem:[#allocation2 + $0xc] sm:$0xe]  ;;  %v4966_v38 = vld [vmem:[%s6396_s3 + $0x138] sm:$0xff]   ;;  %v524_v40 = vld [vmem:[%s5172_s26 + $0x20] sm:$0xf] }
  0x51   : > { %6418 = vst [vmem:[#allocation6_spill] sm:$0xff] %v5378_v5  ;;  %1989 = vmatprep.mubr.bf16.mxu1 %v5378_v5  ;;  %v616_v13 = vor.u32 %v614_v55, %v613_v0  ;;  %v618_v18 = vrot.slane %v613_v0, 4  ;;  %v1585_v19 = vrot.slane %v5274_v2, 1  ;;  %v1336_v22 = vshll.u32 %v5383_v9, 16  ;;  %v525_v47 = vld [vmem:[%s5172_s26 + $0x24] sm:$0xf] }
  0x52   : > { %1990 = vmatmul.mubr.bf16.gmra.mxu1 %v5347_v23  ;;  %v1329_v20 = vshrl.u32 %v5381_v6, 16  ;;  %v1331_v21 = vshll.u32 %v5381_v6, 16  ;;  %v899_v25 = vsel %vm5207_vm8, %v608_v11, %v898_v56  ;;  %v1581_v14 = vrot.slane %v3974_v3, 1  ;;  %v905_v60 = vld [vmem:[#allocation2 + $0x3c] sm:$0xf]  ;;  %v5021_v31 = vld [vmem:[%s6396_s3 + $0x1e8] sm:$0xff]  }
  0x53   : > { %4745 = vmatpush3.bf16.msra.mxu1 %v4954_v35  ;;  %v1087_v29 = vld [vmem:[#allocation2 + $0xb4] sm:$0xf]  ;;  %v617_v32 = vsel %vm5202_vm6, %v609_v12, %v616_v13  ;;  %900 = vst [vmem:[#allocation2 + $0x30] sm:$0xf] %v899_v25  ;;  %v903_v34 = vsel %vm5194_vm5, %v618_v18, %v902_v16  ;;  %v1588_v50 = vrot.slane %v5322_v49, 1  ;;  %v1338_v37 = vrot.slane %v1336_v22, 1 }
  0x54   : > { %4746 = vmatprep.subr.bf16.mxu1 %v4959_v59  ;;  %v1333_v35 = vrot.slane %v1331_v21, 1  ;;  %901 = vst [vmem:[#allocation2 + $0x34] sm:$0xf] %v617_v32  ;;  %904 = vst [vmem:[#allocation2 + $0x38] sm:$0x1] %v903_v34  ;;  %v620_v51 = vshrl.u32 %v524_v40, 16  ;;  %v3975_v52 = vcombine.low %v1112_v26, %v5266_v62  ;;  %v1583_v28 = vsel %vm1580_vm9, %v1581_v14, %v1582_v4 }
  0x55   : > { %v5407_v39 = vld [vmem:[#allocation2 + $0xb8] sm:$0xf]  ;;  %v5413_v45 = vld [vmem:[#allocation2 + $0xbc] ss:$0 sps:$4 sm:$0x11]   ;;  %v623_v53 = vshll.u32 %v524_v40, 16 }
  0x56   : > { %v1334_v41 = vor.u32 %v1333_v35, %v1329_v20  ;;  %v5411_v42 = vcombine.low %v1087_v29, %v5407_v39  ;;  %v628_v54 = vshrl.u32 %v525_v47, 16  ;;  %v631_v55 = vshll.u32 %v525_v47, 16  ;;  %v909_v3 = vld [vmem:[#allocation2 + $0x44] sm:$0x1]  ;;  %v1113_v62 = vld [vmem:[#allocation2 + $0x18] sm:$0xe] }
  0x57   : > { %4747 = vmatpush3.bf16.msra.mxu1 %v4959_v59  ;;  %v1480_v59 = vshll.u32 %v5413_v45, 16  ;;  %v622_v61 = vrot.slane %v620_v51, 7  ;;  %v1584_v29 = vrot.slane %v3975_v52, 1  ;;  %v1114_v32 = vld [vmem:[#allocation2 + $0x24] sm:$0xe]  ;;  %v1591_v51 = vrot.slane %v5383_v9, 1 }
  0x58   : > { %6419 = vst [vmem:[#allocation7_spill] sm:$0xff] %v5411_v42  ;;  %4748 = vmatprep.subr.bf16.mxu1 %v4961_v10  ;;  %v5418_v56 = vsel %vm1291_vm1, %v1334_v41, %v1338_v37  ;;  %v1473_v57 = vshrl.u32 %v5411_v42, 16  ;;  %v1475_v58 = vshll.u32 %v5411_v42, 16  ;;  %v630_v0 = vrot.slane %v628_v54, 7  ;;  %v526_v41 = vld [vmem:[%s5172_s26 + $0x28] sm:$0xf] }
  0x59   : > { %1901 = vmatprep.mubr.bf16.mxu0 %v5418_v56  ;;  %v1482_v12 = vrot.slane %v1480_v59, 1  ;;  %v625_v18 = vor.u32 %v623_v53, %v622_v61  ;;  %v626_v20 = vrot.slane %v622_v61, 4  ;;  %v3977_v47 = vcombine.low %v1114_v32, %v5373_v63  ;;  %v912_v59 = vld [vmem:[#allocation2 + $0x48] sm:$0xf]  ;;  %v528_v32 = vld [vmem:[%s5172_s26 + $0x30] sm:$0xf] }
  0x5a   : > { %v1477_v11 = vrot.slane %v1475_v58, 1  ;;  %1902 = vmatmul.mubr.bf16.gmra.mxu0 %v5381_v6  ;;  %v1065_v16 = vld [vmem:[#allocation2 + $0x30] sm:$0xf]  ;;  %v633_v21 = vor.u32 %v631_v55, %v630_v0  ;;  %v635_v22 = vrot.slane %v630_v0, 4  ;;  %v637_v52 = vshrl.u32 %v526_v41, 16  ;;  %v5022_v36 = vld [vmem:[%s6396_s3 + $0x1a8] sm:$0xff]  }
  0x5b   : > { %4749 = vmatpush3.bf16.msra.mxu1 %v4961_v10  ;;  %v5425_v13 = vld [vmem:[#allocation2 + $0x34] sm:$0xf]  ;;  %v5430_v10 = vld [vmem:[#allocation2 + $0x38] ss:$0 sps:$4 sm:$0x11]   ;;  %v906_v35 = vsel %vm5207_vm8, %v625_v18, %v905_v60  ;;  %v640_v53 = vshll.u32 %v526_v41, 16 }
  0x5c   : > { %4462 = vmatprep.subr.bf16.mxu1 %v4966_v38  ;;  %v1478_v25 = vor.u32 %v1477_v11, %v1473_v57  ;;  %v5428_v26 = vcombine.low %v1065_v16, %v5425_v13  ;;  %v634_v34 = vsel %vm5202_vm6, %v626_v20, %v633_v21  ;;  %v910_v37 = vsel %vm5194_vm5, %v635_v22, %v909_v3  ;;  %v916_v0 = vld [vmem:[#allocation2 + $0x50] sm:$0x1]  ;;  %v1115_v3 = vld [vmem:[#allocation2 + $0x30] sm:$0xe]  ;;  %v5005_v11 = vld [vmem:[%s6396_s3 + $0x148] sm:$0xff]  }
  0x5d   : > { %v3976_v38 = vcombine.low %v1113_v62, %v5310_v44  ;;  %v1348_v14 = vshll.u32 %v5430_v10, 16  ;;  %907 = vst [vmem:[#allocation2 + $0x3c] sm:$0xf] %v906_v35  ;;  %908 = vst [vmem:[#allocation2 + $0x40] sm:$0xf] %v634_v34  ;;  %v639_v61 = vrot.slane %v637_v52, 7  ;;  %4794 = vmatprep.subr.bf16.mxu0 %v5005_v11  ;;  %v5469_v34 = vsel %vm1580_vm9, %v1584_v29, %v1585_v19 }
  0x5e   : > { %v5443_v40 = vsel %vm1291_vm1, %v1478_v25, %v1482_v12  ;;  %v1341_v15 = vshrl.u32 %v5428_v26, 16  ;;  %v1343_v4 = vshll.u32 %v5428_v26, 16  ;;  %911 = vst [vmem:[#allocation2 + $0x44] sm:$0x1] %v910_v37  ;;  %v527_v44 = vld [vmem:[%s5172_s26 + $0x2c] sm:$0xf]  ;;  %4795 = vmatpush3.bf16.msra.mxu0 %v5005_v11 }
  0x5f   : > { %6420 = vst [vmem:[#allocation8_spill] sm:$0xff] %v5443_v40  ;;  %1997 = vmatprep.mubr.bf16.mxu1 %v5443_v40  ;;  %v1350_v55 = vrot.slane %v1348_v14, 1  ;;  %v645_v57 = vshrl.u32 %v527_v44, 16  ;;  %v648_v58 = vshll.u32 %v527_v44, 16  ;;  %v1587_v60 = vrot.slane %v3976_v38, 1  ;;  %v4967_v21 = vld [vmem:[%s6396_s3 + $0xf8] sm:$0xff]  }
  0x60   : > { %1998 = vmatmul.mubr.bf16.gmra.mxu1 %v5411_v42  ;;  %v1345_v54 = vrot.slane %v1343_v4, 1  ;;  %v1590_v12 = vrot.slane %v3977_v47, 1  ;;  %v642_v16 = vor.u32 %v640_v53, %v639_v61  ;;  %v643_v18 = vrot.slane %v639_v61, 4  ;;  %v4973_v29 = vld [vmem:[%s6396_s3 + $0x130] sm:$0xff]  }
  0x61   : > { %4750 = vmatprep.mubr.bf16.mxu1 %v1583_v28  ;;  %v647_v63 = vrot.slane %v645_v57, 7  ;;  %v3978_v28 = vcombine.low %v1115_v3, %v5425_v13  ;;  %v5476_v38 = vsel %vm1580_vm9, %v1587_v60, %v1588_v50  ;;  %v4974_v4 = vld [vmem:[%s6396_s3 + $0xf0] sm:$0xff]   ;;  %v654_v47 = vshrl.u32 %v528_v32, 16 }
  0x62   : > { %v1346_v62 = vor.u32 %v1345_v54, %v1341_v15  ;;  %v913_v13 = vsel %vm5207_vm8, %v642_v16, %v912_v59  ;;  %v1594_v15 = vrot.slane %v5430_v10, 1  ;;  %v529_v41 = vld [vmem:[%s5172_s26 + $0x34] sm:$0xf]  ;;  %v657_v44 = vshll.u32 %v528_v32, 16  ;;  %v4979_v10 = vld [vmem:[%s6396_s3 + $0x128] sm:$0xff]  }
  0x63   : > { %v650_v22 = vor.u32 %v648_v58, %v647_v63  ;;  %v652_v25 = vrot.slane %v647_v63, 4  ;;  %914 = vst [vmem:[#allocation2 + $0x48] sm:$0xf] %v913_v13  ;;  %v919_v57 = vld [vmem:[#allocation2 + $0x54] sm:$0xf]  ;;  %v656_v59 = vrot.slane %v654_v47, 7 }
  0x64   : > { %v5458_v20 = vsel %vm1291_vm1, %v1346_v62, %v1350_v55  ;;  %v1067_v35 = vld [vmem:[#allocation2 + $0x3c] sm:$0xf]  ;;  %v5471_v37 = vld [vmem:[#allocation2 + $0x40] sm:$0xf]  ;;  %v1593_v55 = vrot.slane %v3978_v28, 1  ;;  %v662_v60 = vshrl.u32 %v529_v41, 16 }
  0x65   : > { %1909 = vmatprep.mubr.bf16.mxu0 %v5458_v20  ;;  %v5482_v2 = vcombine.low %v1067_v35, %v5471_v37  ;;  %v5484_v19 = vld [vmem:[#allocation2 + $0x44] ss:$0 sps:$4 sm:$0x11]   ;;  %v651_v49 = vsel %vm5202_vm6, %v643_v18, %v650_v22  ;;  %v917_v50 = vsel %vm5194_vm5, %v652_v25, %v916_v0  ;;  %v1116_v14 = vld [vmem:[#allocation2 + $0x3c] sm:$0xe]  ;;  %v665_v61 = vshll.u32 %v529_v41, 16 }
  0x66   : > { %1910 = vmatmul.mubr.bf16.gmra.mxu0 %v5428_v26  ;;  %915 = vst [vmem:[#allocation2 + $0x4c] sm:$0xf] %v651_v49  ;;  %918 = vst [vmem:[#allocation2 + $0x50] sm:$0x1] %v917_v50  ;;  %v1360_v54 = vshll.u32 %v5484_v19, 16  ;;  %v1597_v58 = vrot.slane %v5484_v19, 1  ;;  %v659_v11 = vor.u32 %v657_v44, %v656_v59  ;;  %v5513_v22 = vsel %vm1580_vm9, %v1590_v12, %v1591_v51 }
  0x67   : > { %v1353_v52 = vshrl.u32 %v5482_v2, 16  ;;  %v1355_v53 = vshll.u32 %v5482_v2, 16  ;;  %v923_v62 = vld [vmem:[#allocation2 + $0x5c] sm:$0x1]  ;;  %v4980_v63 = vld [vmem:[%s6396_s3 + $0xe8] sm:$0xff]   ;;  %v660_v16 = vrot.slane %v656_v59, 4  ;;  %v3979_v25 = vcombine.low %v1116_v14, %v5471_v37 }
  0x68   : > { %4751 = vmatmul.mubr.bf16.vlgmr.msra.gmra.mxu1 %v5469_v34  ;;  %v1362_v3 = vrot.slane %v1360_v54, 1  ;;  %v664_v18 = vrot.slane %v662_v60, 7  ;;  %v4986_v28 = vld [vmem:[%s6396_s3 + $0x120] sm:$0xff]   ;;  %v530_v32 = vld [vmem:[%s5172_s26 + $0x38] sm:$0xf]  ;;  %v920_v50 = vsel %vm5207_vm8, %v659_v11, %v919_v57  ;;  %v5527_v37 = vsel %vm1580_vm9, %v1593_v55, %v1594_v15 }
  0x69   : > { %4463 = vmatpush3.bf16.msra.mxu1 %v4967_v21  ;;  %4754 = vmatprep.mubr.bf16.mxu1 %v5476_v38  ;;  %v1357_v0 = vrot.slane %v1355_v53, 1  ;;  %v531_v35 = vld [vmem:[%s5172_s26 + $0x3c] sm:$0xf]  ;;  %v671_v9 = vshrl.u32 %v530_v32, 16  ;;  %921 = vst [vmem:[#allocation2 + $0x54] sm:$0xf] %v920_v50 }
  0x6a   : > { %4464 = vmatprep.subr.bf16.mxu1 %v4973_v29  ;;  %v1069_v13 = vld [vmem:[#allocation2 + $0x48] sm:$0xf]  ;;  %v667_v29 = vor.u32 %v665_v61, %v664_v18  ;;  %v669_v49 = vrot.slane %v664_v18, 4  ;;  %v674_v14 = vshll.u32 %v530_v32, 16  ;;  %v679_v47 = vshrl.u32 %v531_v35, 16  ;;  %v4987_v15 = vld [vmem:[%s6396_s3 + $0xe0] sm:$0xff]  }
  0x6b   : > { %v1358_v21 = vor.u32 %v1357_v0, %v1353_v52  ;;  %v1117_v41 = vld [vmem:[#allocation2 + $0x48] sm:$0xe]  ;;  %v1596_v55 = vrot.slane %v3979_v25, 1  ;;  %v682_v59 = vshll.u32 %v531_v35, 16  ;;  %v926_v60 = vld [vmem:[#allocation2 + $0x60] sm:$0xf] }
  0x6c   : > { %v668_v52 = vsel %vm5202_vm6, %v660_v16, %v667_v29  ;;  %v924_v53 = vsel %vm5194_vm5, %v669_v49, %v923_v62  ;;  %v681_v57 = vrot.slane %v679_v47, 7  ;;  %v4995_v61 = vld [vmem:[%s6396_s3 + $0x118] sm:$0xff]   ;;  %v532_v16 = vld [vmem:[%s5172_s26 + $0x40] sm:$0xf]  ;;  %v930_v35 = vld [vmem:[#allocation2 + $0x68] sm:$0x1] }
  0x6d   : > { %4465 = vmatpush3.bf16.msra.mxu1 %v4974_v4  ;;  %v5524_v51 = vsel %vm1291_vm1, %v1358_v21, %v1362_v3  ;;  %v1070_v12 = vld [vmem:[#allocation2 + $0x4c] sm:$0xf]  ;;  %v4976_v44 = vld [vmem:[#allocation2 + $0x50] ss:$0 sps:$4 sm:$0x11]   ;;  %v4996_v47 = vld [vmem:[%s6396_s3 + $0xd8] sm:$0xff]  }
  0x6e   : > { %4466 = vmatprep.subr.bf16.mxu1 %v4979_v10  ;;  %1917 = vmatprep.mubr.bf16.mxu0 %v5524_v51  ;;  %v5530_v4 = vcombine.low %v1069_v13, %v1070_v12  ;;  %v3980_v54 = vcombine.low %v1117_v41, %v1070_v12  ;;  %922 = vst [vmem:[#allocation2 + $0x58] sm:$0xf] %v668_v52  ;;  %925 = vst [vmem:[#allocation2 + $0x5c] sm:$0x1] %v924_v53  ;;  %v673_v10 = vrot.slane %v671_v9, 7 }
  0x6f   : > { %1918 = vmatmul.mubr.bf16.gmra.mxu0 %v5482_v2  ;;  %v1372_v62 = vshll.u32 %v4976_v44, 16  ;;  %v1600_v18 = vrot.slane %v4976_v44, 1  ;;  %v684_v32 = vor.u32 %v682_v59, %v681_v57  ;;  %v533_v13 = vld [vmem:[%s5172_s26 + $0x44] sm:$0xf]  ;;  %v686_v50 = vrot.slane %v681_v57, 4 }
  0x70   : > { %4755 = vmatmul.mubr.bf16.gmra.mxu1 %v5513_v22  ;;  %v1365_v0 = vshrl.u32 %v5530_v4, 16  ;;  %v1367_v3 = vshll.u32 %v5530_v4, 16  ;;  %v1599_v11 = vrot.slane %v3980_v54, 1  ;;  %v676_v21 = vor.u32 %v674_v14, %v673_v10  ;;  %v933_v14 = vld [vmem:[#allocation2 + $0x6c] sm:$0xf]  ;;  %v5010_v44 = vld [vmem:[%s6396_s3 + $0x140] sm:$0xff]  }
  0x71   : > { %4758 = vmatprep.mubr.bf16.mxu1 %v5527_v37  ;;  %4467 = vmatpush3.bf16.msra.mxu1 %v4980_v63  ;;  %v677_v25 = vrot.slane %v673_v10, 4  ;;  %v1374_v49 = vrot.slane %v1372_v62, 1  ;;  %v688_v41 = vshrl.u32 %v532_v16, 16  ;;  %v5552_v9 = vsel %vm1580_vm9, %v1596_v55, %v1597_v58  ;;  %v1071_v52 = vld [vmem:[#allocation2 + $0x54] sm:$0xf] }
  0x72   : > { %4468 = vmatprep.subr.bf16.mxu1 %v4986_v28  ;;  %v1369_v29 = vrot.slane %v1367_v3, 1  ;;  %v927_v28 = vsel %vm5207_vm8, %v676_v21, %v926_v60  ;;  %v691_v12 = vshll.u32 %v532_v16, 16  ;;  %v1118_v58 = vld [vmem:[#allocation2 + $0x54] sm:$0xe]  ;;  %v931_v53 = vsel %vm5194_vm5, %v686_v50, %v930_v35  ;;  %v937_v59 = vld [vmem:[#allocation2 + $0x74] sm:$0x1]  ;;  %4796 = vmatprep.subr.bf16.mxu0 %v5010_v44 }
  0x73   : > { %v685_v63 = vsel %vm5202_vm6, %v677_v25, %v684_v32  ;;  %928 = vst [vmem:[#allocation2 + $0x60] sm:$0xf] %v927_v28  ;;  %v690_v54 = vrot.slane %v688_v41, 7  ;;  %v696_v55 = vshrl.u32 %v533_v13, 16  ;;  %v5567_v10 = vsel %vm1580_vm9, %v1599_v11, %v1600_v18  ;;  %932 = vst [vmem:[#allocation2 + $0x68] sm:$0x1] %v931_v53  ;;  %4797 = vmatpush3.bf16.msra.mxu0 %v5010_v44 }
  0x74   : > { %v1370_v19 = vor.u32 %v1369_v29, %v1365_v0  ;;  %929 = vst [vmem:[#allocation2 + $0x64] sm:$0xf] %v685_v63  ;;  %v699_v57 = vshll.u32 %v533_v13, 16  ;;  %v5003_v60 = vld [vmem:[%s6396_s3 + $0x110] sm:$0xff]   ;;  %v534_v21 = vld [vmem:[%s5172_s26 + $0x48] sm:$0xf] }
  0x75   : > { %4469 = vmatpush3.bf16.msra.mxu1 %v4987_v15  ;;  %v1072_v0 = vld [vmem:[#allocation2 + $0x58] sm:$0xf]  ;;  %v693_v3 = vor.u32 %v691_v12, %v690_v54  ;;  %v694_v62 = vrot.slane %v690_v54, 4  ;;  %v698_v16 = vrot.slane %v696_v55, 7  ;;  %v705_v13 = vshrl.u32 %v534_v21, 16  ;;  %v5004_v63 = vld [vmem:[%s6396_s3 + $0xd0] sm:$0xff]  }
  0x76   : > { %4470 = vmatprep.subr.bf16.mxu1 %v4995_v61  ;;  %v5573_v15 = vsel %vm1291_vm1, %v1370_v19, %v1374_v49  ;;  %v5577_v11 = vcombine.low %v1071_v52, %v1072_v0  ;;  %v4983_v61 = vld [vmem:[#allocation2 + $0x5c] ss:$0 sps:$4 sm:$0x11]   ;;  %v3981_v18 = vcombine.low %v1118_v58, %v1072_v0  ;;  %v535_v44 = vld [vmem:[%s5172_s26 + $0x4c] sm:$0xf] }
  0x77   : > { %1925 = vmatprep.mubr.bf16.mxu0 %v5573_v15  ;;  %v701_v25 = vor.u32 %v699_v57, %v698_v16  ;;  %v703_v32 = vrot.slane %v698_v16, 4  ;;  %v934_v35 = vsel %vm5207_vm8, %v693_v3, %v933_v14  ;;  %v1384_v50 = vshll.u32 %v4983_v61, 16  ;;  %v5008_v52 = vld [vmem:[%s6396_s3 + $0x108] sm:$0xff]   ;;  %v536_v55 = vld [vmem:[%s5172_s26 + $0x50] sm:$0xf] }
  0x78   : > { %4759 = vmatmul.mubr.bf16.gmra.mxu1 %v5552_v9  ;;  %1926 = vmatmul.mubr.bf16.gmra.mxu0 %v5530_v4  ;;  %v1377_v29 = vshrl.u32 %v5577_v11, 16  ;;  %v1379_v49 = vshll.u32 %v5577_v11, 16  ;;  %v1602_v41 = vrot.slane %v3981_v18, 1  ;;  %935 = vst [vmem:[#allocation2 + $0x6c] sm:$0xf] %v934_v35  ;;  %v1603_v28 = vrot.slane %v4983_v61, 1 }
  0x79   : > { %4762 = vmatprep.mubr.bf16.mxu1 %v5567_v10  ;;  %4471 = vmatpush3.bf16.msra.mxu1 %v4996_v47  ;;  %v702_v12 = vsel %vm5202_vm6, %v694_v62, %v701_v25  ;;  %v938_v14 = vsel %vm5194_vm5, %v703_v32, %v937_v59  ;;  %v5594_v19 = vrot.slane %v705_v13, 7  ;;  %v1386_v58 = vrot.slane %v1384_v50, 1  ;;  %v5009_v32 = vld [vmem:[%s6396_s3 + $0xc8] sm:$0xff]  }
  0x7a   : > { %4472 = vmatprep.subr.bf16.mxu1 %v5003_v60  ;;  %v1381_v47 = vrot.slane %v1379_v49, 1  ;;  %v1073_v53 = vld [vmem:[#allocation2 + $0x60] sm:$0xf]  ;;  %936 = vst [vmem:[#allocation2 + $0x70] sm:$0xf] %v702_v12  ;;  %v5601_v57 = vsel %vm1580_vm9, %v1602_v41, %v1603_v28  ;;  %v708_v3 = vshll.u32 %v534_v21, 16 }
  0x7b   : > { %v1074_v54 = vld [vmem:[#allocation2 + $0x64] sm:$0xf]  ;;  %939 = vst [vmem:[#allocation2 + $0x74] sm:$0x1] %v938_v14  ;;  %v940_v60 = vld [vmem:[#allocation2 + $0x78] sm:$0xf] }
  0x7c   : > { %v5603_v0 = vcombine.low %v1073_v53, %v1074_v54  ;;  %v4990_v59 = vld [vmem:[#allocation2 + $0x68] ss:$0 sps:$4 sm:$0x11]   ;;  %v1382_v62 = vor.u32 %v1381_v47, %v1377_v29  ;;  %v1119_v16 = vld [vmem:[#allocation2 + $0x60] sm:$0xe]  ;;  %v711_v61 = vrot.slane %v5594_v19, 4  ;;  %v710_v12 = vor.u32 %v708_v3, %v5594_v19 }
  0x7d   : > { %v713_v18 = vshrl.u32 %v535_v44, 16  ;;  %v716_v25 = vshll.u32 %v535_v44, 16  ;;  %4473 = vmatpush3.bf16.msra.mxu1 %v5004_v63  ;;  %v1396_v49 = vshll.u32 %v4990_v59, 16  ;;  %v3982_v50 = vcombine.low %v1119_v16, %v1074_v54  ;;  %v944_v41 = vld [vmem:[#allocation2 + $0x80] sm:$0x1] }
  0x7e   : > { %v1389_v35 = vshrl.u32 %v5603_v0, 16  ;;  %v1391_v13 = vshll.u32 %v5603_v0, 16  ;;  %v5612_v21 = vld [vmem:[%s5172_s26 + $0x54] sm:$0xf]  ;;  %4474 = vmatprep.subr.bf16.mxu1 %v5008_v52  ;;  %v5013_v29 = vld [vmem:[%s6396_s3 + $0x100] sm:$0xff]   ;;  %v5618_v63 = vsel %vm1291_vm1, %v1382_v62, %v1386_v58  ;;  %v1606_v28 = vrot.slane %v4990_v59, 1 }
  0x7f   : > { %v715_v14 = vrot.slane %v713_v18, 7  ;;  %v5014_v44 = vld [vmem:[%s6396_s3 + $0xc0] sm:$0xff]   ;;  %1933 = vmatprep.mubr.bf16.mxu0 %v5618_v63  ;;  %v1398_v47 = vrot.slane %v1396_v49, 1  ;;  %v1605_v53 = vrot.slane %v3982_v50, 1  ;;  %v1075_v54 = vld [vmem:[#allocation2 + $0x6c] sm:$0xf]  ;;  %v941_v19 = vsel %vm5207_vm8, %v710_v12, %v940_v60 }
  0x80   : > { %4763 = vmatmul.mubr.bf16.gmra.mxu1 %v5601_v57  ;;  %v1393_v52 = vrot.slane %v1391_v13, 1  ;;  %v722_v16 = vshrl.u32 %v536_v55, 16  ;;  %1934 = vmatmul.mubr.bf16.gmra.mxu0 %v5577_v11  ;;  %v1120_v58 = vld [vmem:[#allocation2 + $0x6c] sm:$0xe]  ;;  %v725_v59 = vshll.u32 %v536_v55, 16  ;;  %v730_v50 = vshrl.u32 %v5612_v21, 16 }
  0x81   : > { %v718_v62 = vor.u32 %v716_v25, %v715_v14  ;;  %v720_v42 = vrot.slane %v715_v14, 4  ;;  %v947_v3 = vld [vmem:[#allocation2 + $0x84] sm:$0xf]  ;;  %4475 = vmatpush3.bf16.msra.mxu1 %v5009_v32  ;;  %v5630_v40 = vsel %vm1580_vm9, %v1605_v53, %v1606_v28  ;;  %v1076_v13 = vld [vmem:[#allocation2 + $0x70] sm:$0xf] }
  0x82   : > { %v1394_v18 = vor.u32 %v1393_v52, %v1389_v35  ;;  %942 = vst [vmem:[#allocation2 + $0x78] sm:$0xf] %v941_v19  ;;  %v724_v49 = vrot.slane %v722_v16, 7  ;;  %4476 = vmatprep.subr.bf16.mxu1 %v5013_v29  ;;  %4766 = vmatprep.mubr.bf16.mxu1 %v5630_v40  ;;  %v5634_v25 = vcombine.low %v1075_v54, %v1076_v13  ;;  %v4993_v14 = vld [vmem:[#allocation2 + $0x74] ss:$0 sps:$4 sm:$0x11]  }
  0x83   : > { %v3983_v23 = vcombine.low %v1120_v58, %v1076_v13  ;;  %v719_v55 = vsel %vm5202_vm6, %v711_v61, %v718_v62  ;;  %v945_v60 = vsel %vm5194_vm5, %v720_v42, %v944_v41  ;;  %v951_v32 = vld [vmem:[#allocation2 + $0x8c] sm:$0x1]  ;;  %v5643_v35 = vld [vmem:[%s6396_s3 + $0x238] sm:$0xff]   ;;  %v732_v52 = vrot.slane %v730_v50, 7 }
  0x84   : > { %v5646_v29 = vsel %vm1291_vm1, %v1394_v18, %v1398_v47  ;;  %943 = vst [vmem:[#allocation2 + $0x7c] sm:$0xf] %v719_v55  ;;  %946 = vst [vmem:[#allocation2 + $0x80] sm:$0x1] %v945_v60  ;;  %v727_v28 = vor.u32 %v725_v59, %v724_v49  ;;  %v728_v12 = vrot.slane %v724_v49, 4  ;;  %v1609_v53 = vrot.slane %v4993_v14, 1 }
  0x85   : > { %1941 = vmatprep.mubr.bf16.mxu0 %v5646_v29  ;;  %v1608_v61 = vrot.slane %v3983_v23, 1  ;;  %v1401_v42 = vshrl.u32 %v5634_v25, 16  ;;  %v1403_v41 = vshll.u32 %v5634_v25, 16  ;;  %4477 = vmatpush3.bf16.msra.mxu1 %v5014_v44  ;;  %v1408_v54 = vshll.u32 %v4993_v14, 16  ;;  %v5016_v62 = vld [vmem:[%s6396_s3 + $0x1f8] sm:$0xff]  }
  0x86   : > { %v733_v16 = vshll.u32 %v5612_v21, 16  ;;  %v737_v58 = vrot.slane %v732_v52, 4  ;;  %v948_v47 = vsel %vm5207_vm8, %v727_v28, %v947_v3  ;;  %4830 = vmatprep.subr.bf16.mxu1 %v5643_v35  ;;  %v1123_v59 = vld [vmem:[#allocation2 + $0x90] sm:$0xe]  ;;  %4598 = vmatprep.subr.bf16.mxu0 %v5016_v62  ;;  %v1126_v62 = vld [vmem:[#allocation2 + $0xb4] sm:$0xe] }
  0x87   : > { %v5659_v23 = vsel %vm1580_vm9, %v1608_v61, %v1609_v53  ;;  %v1405_v19 = vrot.slane %v1403_v41, 1  ;;  %949 = vst [vmem:[#allocation2 + $0x84] sm:$0xf] %v948_v47  ;;  %v1410_v44 = vrot.slane %v1408_v54, 1  ;;  %v1624_v61 = vrot.slane %v5349_v24, 1 }
  0x88   : > { %4767 = vmatmul.mubr.bf16.gmra.mxu1 %v5659_v23  ;;  %v735_v21 = vor.u32 %v733_v16, %v732_v52  ;;  %v952_v18 = vsel %vm5194_vm5, %v737_v58, %v951_v32  ;;  %1942 = vmatmul.mubr.bf16.gmra.mxu0 %v5603_v0  ;;  %v5045_v50 = vld [vmem:[#allocation2 + $0x98] ss:$0 sps:$4 sm:$0x11]   ;;  %v5046_v60 = vld [vmem:[#allocation2 + $0xa4] ss:$0 sps:$4 sm:$0x11]  }
  0x89   : > { %v1406_v3 = vor.u32 %v1405_v19, %v1401_v42  ;;  %v1077_v13 = vld [vmem:[#allocation2 + $0x78] sm:$0xf]  ;;  %953 = vst [vmem:[#allocation2 + $0x8c] sm:$0x1] %v952_v18  ;;  %v1618_v14 = vrot.slane %v5045_v50, 1  ;;  %v1621_v28 = vrot.slane %v5046_v60, 1  ;;  %v3989_v18 = vcombine.low %v1126_v62, %v5407_v39 }
  0x8a   : > { %v1121_v49 = vld [vmem:[#allocation2 + $0x78] sm:$0xe]  ;;  %v736_v55 = vsel %vm5202_vm6, %v728_v12, %v735_v21  ;;  %v5047_v53 = vld [vmem:[#allocation2 + $0x94] sm:$0xf]  ;;  %v1124_v42 = vld [vmem:[#allocation2 + $0x9c] sm:$0xe] }
  0x8b   : > { %v5669_v52 = vsel %vm1291_vm1, %v1406_v3, %v1410_v44  ;;  %v1078_v32 = vld [vmem:[#allocation2 + $0x7c] sm:$0xf]  ;;  %950 = vst [vmem:[#allocation2 + $0x88] sm:$0xf] %v736_v55  ;;  %v3986_v41 = vcombine.low %v1123_v59, %v5047_v53  ;;  %v1125_v47 = vld [vmem:[#allocation2 + $0xa8] sm:$0xe] }
  0x8c   : > { %1949 = vmatprep.mubr.bf16.mxu0 %v5669_v52  ;;  %v5672_v54 = vcombine.low %v1077_v13, %v1078_v32  ;;  %v4998_v16 = vld [vmem:[#allocation2 + $0x80] ss:$0 sps:$4 sm:$0x11]   ;;  %v3984_v58 = vcombine.low %v1121_v49, %v1078_v32  ;;  %v1627_v12 = vrot.slane %v5413_v45, 1  ;;  %v3988_v45 = vcombine.low %v1125_v47, %v5340_v17 }
  0x8d   : > { %v1612_v24 = vrot.slane %v4998_v16, 1  ;;  %v1420_v50 = vshll.u32 %v4998_v16, 16  ;;  %v1617_v55 = vrot.slane %v3986_v41, 1  ;;  %v5048_v60 = vld [vmem:[#allocation2 + $0xa0] sm:$0xf]  ;;  %v1626_v53 = vrot.slane %v3989_v18, 1 }
  0x8e   : > { %v1611_v19 = vrot.slane %v3984_v58, 1  ;;  %v1079_v21 = vld [vmem:[#allocation2 + $0x84] sm:$0xf]  ;;  %v1413_v3 = vshrl.u32 %v5672_v54, 16  ;;  %v1415_v59 = vshll.u32 %v5672_v54, 16  ;;  %v3987_v32 = vcombine.low %v1124_v42, %v5048_v60 }
  0x8f   : > { %v1122_v44 = vld [vmem:[#allocation2 + $0x84] sm:$0xe]  ;;  %v1422_v58 = vrot.slane %v1420_v50, 1  ;;  %v5685_v41 = vsel %vm1580_vm9, %v1626_v53, %v1627_v12  ;;  %v1623_v60 = vrot.slane %v3988_v45, 1  ;;  %v5696_v50 = vsel %vm1580_vm9, %v1617_v55, %v1618_v14  ;;  %v547_v55 = vld [vmem:[%s5172_s26 + $0x7c] sm:$0xf] }
  0x90   : > { %v5679_v13 = vsel %vm1580_vm9, %v1611_v19, %v1612_v24  ;;  %v5001_v49 = vld [vmem:[#allocation2 + $0x8c] ss:$0 sps:$4 sm:$0x11]   ;;  %1950 = vmatmul.mubr.bf16.gmra.mxu0 %v5634_v25  ;;  %v1417_v39 = vrot.slane %v1415_v59, 1  ;;  %v1620_v42 = vrot.slane %v3987_v32, 1  ;;  %v815_v53 = vshrl.u32 %v547_v55, 16 }
  0x91   : > { %4770 = vmatprep.mubr.bf16.mxu1 %v5679_v13  ;;  %v1615_v5 = vrot.slane %v5001_v49, 1  ;;  %v1432_v8 = vshll.u32 %v5001_v49, 16 }
  0x92   : > { %v1080_v62 = vld [vmem:[#allocation2 + $0x88] sm:$0xf]  ;;  %v1418_v24 = vor.u32 %v1417_v39, %v1413_v3  ;;  %v5709_v14 = vsel %vm1580_vm9, %v1620_v42, %v1621_v28  ;;  %v818_v39 = vshll.u32 %v547_v55, 16  ;;  %v5017_v28 = vld [vmem:[%s6396_s3 + $0x1b8] sm:$0xff]  }
  0x93   : > { %v5687_v16 = vcombine.low %v1079_v21, %v1080_v62  ;;  %v3985_v19 = vcombine.low %v1122_v44, %v1080_v62  ;;  %v1434_v44 = vrot.slane %v1432_v8, 1  ;;  %v546_v8 = vld [vmem:[%s5172_s26 + $0x78] sm:$0xf]  ;;  %v817_v62 = vrot.slane %v815_v53, 7  ;;  %v5029_v53 = vld [vmem:[%s6396_s3 + $0x190] sm:$0xff]   ;;  %s6249_s26 = scalar_lea.vmem %s6397_s4, %s4194_s17 }
  0x94   : > { %v5690_v47 = vsel %vm1291_vm1, %v1418_v24, %v1422_v58  ;;  %v807_v32 = vshrl.u32 %v546_v8, 16  ;;  %v810_v45 = vshll.u32 %v546_v8, 16  ;;  %v5018_v24 = vld [vmem:[%s6396_s3 + $0x1f0] sm:$0xff]   ;;  %v5030_v8 = vld [vmem:[%s6396_s3 + $0x220] sm:$0xff]   ;;  %v5027_v55 = vld [vmem:[%s6396_s3 + $0x198] sm:$0xff]  }
  0x95   : > { %v1614_v17 = vrot.slane %v3985_v19, 1  ;;  %v1425_v18 = vshrl.u32 %v5687_v16, 16  ;;  %v1427_v59 = vshll.u32 %v5687_v16, 16  ;;  %1957 = vmatprep.mubr.bf16.mxu0 %v5690_v47  ;;  %v986_v19 = vld [vmem:[#allocation2 + $0xc8] sm:$0x1] }
  0x96   : > { %v809_v58 = vrot.slane %v807_v32, 7  ;;  %v5028_v32 = vld [vmem:[%s6396_s3 + $0x1d0] sm:$0xff]  }
  0x97   : > { %v5699_v12 = vsel %vm1580_vm9, %v1614_v17, %v1615_v5  ;;  %v1429_v21 = vrot.slane %v1427_v59, 1  ;;  %v5712_v5 = vsel %vm1580_vm9, %v1623_v60, %v1624_v61  ;;  %v982_v61 = vld [vmem:[#allocation2 + $0xc0] sm:$0xf]  ;;  %v820_v60 = vor.u32 %v818_v39, %v817_v62  ;;  %v5031_v39 = vld [vmem:[%s6396_s3 + $0x1c8] sm:$0xff]  }
  0x98   : > { %4771 = vmatmul.mubr.bf16.gmra.mxu1 %v5699_v12  ;;  %1958 = vmatmul.mubr.bf16.gmra.mxu0 %v5672_v54  ;;  %v812_v42 = vor.u32 %v810_v45, %v809_v58  ;;  %v822_v17 = vrot.slane %v817_v62, 4  ;;  %v5038_v45 = vld [vmem:[%s6396_s3 + $0x218] sm:$0xff]   ;;  %v5040_v62 = vld [vmem:[%s6396_s3 + $0x208] sm:$0xff]  }
  0x99   : > { %4774 = vmatprep.mubr.bf16.mxu1 %v5696_v50  ;;  %v1430_v3 = vor.u32 %v1429_v21, %v1425_v18 }
  0x9a   : > { %v983_v59 = vsel %vm5207_vm8, %v812_v42, %v982_v61  ;;  %v987_v21 = vsel %vm5194_vm5, %v822_v17, %v986_v19  ;;  %v5032_v61 = vld [vmem:[%s6396_s3 + $0x188] sm:$0xff]   ;;  %v5037_v19 = vld [vmem:[%s6396_s3 + $0x180] sm:$0xff]  }
  0x9b   : > { %v5705_v49 = vsel %vm1291_vm1, %v1430_v3, %v1434_v44  ;;  %v5019_v44 = vld [vmem:[%s6396_s3 + $0x1b0] sm:$0xff]   ;;  %984 = vst [vmem:[#allocation2 + $0xc0] sm:$0xf] %v983_v59  ;;  %988 = vst [vmem:[#allocation2 + $0xc8] sm:$0x1] %v987_v21  ;;  %v5025_v3 = vld [vmem:[%s6396_s3 + $0x228] sm:$0xff]  }
  0x9c   : > { %1965 = vmatprep.mubr.bf16.mxu0 %v5705_v49 }
  0xa0   : > { %4775 = vmatmul.mubr.bf16.gmra.mxu1 %v5709_v14  ;;  %1966 = vmatmul.mubr.bf16.gmra.mxu0 %v5687_v16 }
  0xa1   : > { %4778 = vmatprep.mubr.bf16.mxu1 %v5712_v5  ;;  %4798 = vmatprep.mubr.bf16.mxu0 %v5469_v34  ;;  %v813_v34 = vrot.slane %v809_v58, 4  ;;  %v5036_v58 = vld [vmem:[%s6396_s3 + $0x1c0] sm:$0xff]  }
  0xa3   : > { %v821_v18 = vsel %vm5202_vm6, %v813_v34, %v820_v60  ;;  %v1127_v34 = vld [vmem:[#allocation2 + $0xc0] sm:$0xe]  ;;  %v5817_v60 = vld [vmem:[#allocation2 + $0xc8] ss:$0 sps:$4 sm:$0x11]  }
  0xa4   : > { %985 = vst [vmem:[#allocation2 + $0xc4] sm:$0xf] %v821_v18  ;;  %v1630_v59 = vrot.slane %v5817_v60, 1 }
  0xa8   : > { %4779 = vmatmul.mubr.bf16.gmra.mxu1 %v5685_v41  ;;  %4799 = vmatmul.mubr.bf16.vlgmr.msra.gmra.mxu0 %v5476_v38 }
  0xa9   : > { %2424 = vmatprep.mubr.bf16.mxu1 %v5308_v43  ;;  %4599 = vmatpush3.bf16.msra.mxu0 %v5017_v28  ;;  %v5023_v43 = vld [vmem:[%s6396_s3 + $0x1e0] sm:$0xff]   ;;  %v5039_v28 = vld [vmem:[%s6396_s3 + $0x210] sm:$0xff]  }
  0xaa   : > { %4802 = vmatprep.mubr.bf16.mxu0 %v5513_v22  ;;  %4600 = vmatprep.subr.bf16.mxu0 %v5018_v24  ;;  %v5041_v24 = vld [vmem:[%s6396_s3 + $0x200] sm:$0xff]  }
  0xab   : > { %v1090_v42 = vld [vmem:[#allocation2 + $0xc4] sm:$0xf] }
  0xac   : > { %v3990_v17 = vcombine.low %v1127_v34, %v1090_v42 }
  0xad   : > { %4601 = vmatpush3.bf16.msra.mxu0 %v5019_v44 }
  0xae   : > { %4602 = vmatprep.subr.bf16.mxu0 %v5021_v31  ;;  %v1629_v18 = vrot.slane %v3990_v17, 1  ;;  %v6421_v17 = vld [vmem:[#allocation4_spill] sm:$0xff] }
  0xb0   : > { %2425 = vmatmul.mubr.bf16.vlgmr.msra.gmra.mxu1 %v5272_v1  ;;  %4803 = vmatmul.mubr.bf16.gmra.mxu0 %v5527_v37  ;;  %v5024_v1 = vld [vmem:[%s6396_s3 + $0x1a0] sm:$0xff]   ;;  %v5825_v21 = vsel %vm1580_vm9, %v1629_v18, %v1630_v59  ;;  %v6422_v18 = vld [vmem:[#allocation6_spill] sm:$0xff] }
  0xb1   : > { %4831 = vmatpush3.bf16.msra.mxu1 %v5643_v35  ;;  %2432 = vmatprep.mubr.bf16.mxu1 %v5352_v33  ;;  %v5026_v35 = vld [vmem:[%s6396_s3 + $0x1d8] sm:$0xff]  }
  0xb2   : > { %4832 = vmatprep.subr.bf16.mxu1 %v5020_v27  ;;  %4806 = vmatprep.mubr.bf16.mxu0 %v5552_v9 }
  0xb3   : > { %4603 = vmatpush3.bf16.msra.mxu0 %v5022_v36 }
  0xb4   : > { %4604 = vmatprep.subr.bf16.mxu0 %v5023_v43 }
  0xb5   : > { %4833 = vmatpush3.bf16.msra.mxu1 %v5020_v27 }
  0xb6   : > { %4834 = vmatprep.subr.bf16.mxu1 %v5025_v3 }
  0xb7   : > { %4605 = vmatpush3.bf16.msra.mxu0 %v5024_v1 }
  0xb8   : > { %2433 = vmatmul.mubr.bf16.gmra.mxu1 %v5320_v48  ;;  %4606 = vmatprep.subr.bf16.mxu0 %v5026_v35 }
  0xb9   : > { %2440 = vmatprep.mubr.bf16.mxu1 %v5418_v56  ;;  %4835 = vmatpush3.bf16.msra.mxu1 %v5025_v3 }
  0xba   : > { %4807 = vmatmul.mubr.bf16.gmra.mxu0 %v5567_v10  ;;  %4836 = vmatprep.subr.bf16.mxu1 %v5030_v8 }
  0xbb   : > { %4810 = vmatprep.mubr.bf16.mxu0 %v5601_v57  ;;  %4607 = vmatpush3.bf16.msra.mxu0 %v5027_v55 }
  0xbc   : > { %4608 = vmatprep.subr.bf16.mxu0 %v5028_v32 }
  0xbd   : > { %4837 = vmatpush3.bf16.msra.mxu1 %v5030_v8 }
  0xbe   : > { %4838 = vmatprep.subr.bf16.mxu1 %v5038_v45 }
  0xbf   : > { %4609 = vmatpush3.bf16.msra.mxu0 %v5029_v53 }
  0xc0   : > { %2441 = vmatmul.mubr.bf16.gmra.mxu1 %v5381_v6  ;;  %4610 = vmatprep.subr.bf16.mxu0 %v5031_v39 }
  0xc1   : > { %2448 = vmatprep.mubr.bf16.mxu1 %v5458_v20  ;;  %4839 = vmatpush3.bf16.msra.mxu1 %v5038_v45 }
  0xc2   : > { %4811 = vmatmul.mubr.bf16.gmra.mxu0 %v5630_v40  ;;  %4840 = vmatprep.subr.bf16.mxu1 %v5039_v28 }
  0xc3   : > { %4814 = vmatprep.mubr.bf16.mxu0 %v5659_v23  ;;  %4611 = vmatpush3.bf16.msra.mxu0 %v5032_v61 }
  0xc4   : > { %4612 = vmatprep.subr.bf16.mxu0 %v5036_v58 }
  0xc5   : > { %4841 = vmatpush3.bf16.msra.mxu1 %v5039_v28 }
  0xc6   : > { %4842 = vmatprep.subr.bf16.mxu1 %v5040_v62 }
  0xc7   : > { %4613 = vmatpush3.bf16.msra.mxu0 %v5037_v19 }
  0xc8   : > { %2449 = vmatmul.mubr.bf16.gmra.mxu1 %v5428_v26 }
  0xc9   : > { %2456 = vmatprep.mubr.bf16.mxu1 %v5524_v51  ;;  %4843 = vmatpush3.bf16.msra.mxu1 %v5040_v62 }
  0xca   : > { %4815 = vmatmul.mubr.bf16.gmra.mxu0 %v5679_v13  ;;  %4844 = vmatprep.subr.bf16.mxu1 %v5041_v24 }
  0xcb   : > { %4818 = vmatprep.mubr.bf16.mxu0 %v5699_v12 }
  0xcd   : > { %4845 = vmatpush3.bf16.msra.mxu1 %v5041_v24 }
  0xd0   : > { %2457 = vmatmul.mubr.bf16.gmra.mxu1 %v5482_v2 }
  0xd1   : > { %2464 = vmatprep.mubr.bf16.mxu1 %v5573_v15 }
  0xd2   : > { %4819 = vmatmul.mubr.bf16.gmra.mxu0 %v5696_v50 }
  0xd3   : > { %4822 = vmatprep.mubr.bf16.mxu0 %v5709_v14 }
  0xd8   : > { %2465 = vmatmul.mubr.bf16.gmra.mxu1 %v5530_v4 }
  0xd9   : > { %2472 = vmatprep.mubr.bf16.mxu1 %v5618_v63 }
  0xda   : > { %4823 = vmatmul.mubr.bf16.gmra.mxu0 %v5712_v5 }
  0xdb   : > { %4826 = vmatprep.mubr.bf16.mxu0 %v5685_v41 }
  0xe0   : > { %2473 = vmatmul.mubr.bf16.gmra.mxu1 %v5577_v11 }
  0xe1   : > { %2480 = vmatprep.mubr.bf16.mxu1 %v5646_v29 }
  0xe2   : > { %4827 = vmatmul.mubr.bf16.gmra.mxu0 %v5825_v21 }
  0xe3   : > { %3035 = vmatprep.mubr.bf16.mxu0 %v5352_v33 }
  0xe8   : > { %2481 = vmatmul.mubr.bf16.gmra.mxu1 %v5603_v0 }
  0xe9   : > { %2488 = vmatprep.mubr.bf16.mxu1 %v5669_v52 }
  0xea   : > { %3036 = vmatmul.mubr.bf16.vlgmr.msra.gmra.mxu0 %v5320_v48 }
  0xeb   : > { %3043 = vmatprep.mubr.bf16.mxu0 %v5418_v56 }
  0xef   : > { %v4342_v44 = vpop.f32.mrf.mxu0 }
  0xf0   : > { %2489 = vmatmul.mubr.bf16.gmra.mxu1 %v5634_v25 }
  0xf1   : > { %2496 = vmatprep.mubr.bf16.mxu1 %v5690_v47  ;;  %v4343_v31 = vpop.f32.mrf.mxu0 }
  0xf2   : > { %3044 = vmatmul.mubr.bf16.gmra.mxu0 %v5381_v6  ;;  %v5839_v27 = vadd.f32 %v4343_v31, %v4342_v44 }
  0xf3   : > { %3051 = vmatprep.mubr.bf16.mxu0 %v5458_v20  ;;  %v4345_v33 = vpop.f32.mrf.mxu0 }
  0xf5   : > { %v4346_v36 = vpop.f32.mrf.mxu0 }
  0xf6   : > { %v5841_v43 = vadd.f32 %v4346_v36, %v4345_v33 }
  0xf8   : > { %2497 = vmatmul.mubr.bf16.gmra.mxu1 %v5672_v54 }
  0xf9   : > { %2504 = vmatprep.mubr.bf16.mxu1 %v5705_v49 }
  0xfa   : > { %3052 = vmatmul.mubr.bf16.gmra.mxu0 %v5428_v26 }
  0xfb   : > { %3059 = vmatprep.mubr.bf16.mxu0 %v5524_v51 }
  0xfe   : > { %v4414_v48 = vpop.f32.mrf.mxu1 }
 0x100   : > { %v4415_v56 = vpop.f32.mrf.mxu1  ;;  %2505 = vmatmul.mubr.bf16.gmra.mxu1 %v5687_v16 }
 0x101   : > { %v5847_v6 = vadd.f32 %v4415_v56, %v4414_v48  ;;  %2512 = vmatprep.mubr.bf16.mxu1 %v5281_v7  ;;  %v1492_v56 = vshll.u32 %v5817_v60, 16 }
 0x102   : > { %v4417_v3 = vpop.f32.mrf.mxu1  ;;  %3060 = vmatmul.mubr.bf16.gmra.mxu0 %v5482_v2 }
 0x103   : > { %3067 = vmatprep.mubr.bf16.mxu0 %v5573_v15  ;;  %v1089_v15 = vld [vmem:[#allocation2 + $0xc0] sm:$0xf] }
 0x104   : > { %v4418_v20 = vpop.f32.mrf.mxu1  ;;  %v4348_v35 = vpop.f32.mrf.mxu0  ;;  %v5865_v19 = vcombine.low %v1089_v15, %v1090_v42  ;;  %v6425_v15 = vld [vmem:[#allocation7_spill] sm:$0xff] }
 0x105   : > { %v5852_v1 = vadd.f32 %v4418_v20, %v4417_v3  ;;  %v6423_v20 = vld [vmem:[#allocation5_spill] sm:$0xff] }
 0x106   : > { %v4420_v26 = vpop.f32.mrf.mxu1  ;;  %v4349_v8 = vpop.f32.mrf.mxu0  ;;  %v1487_v31 = vshll.u32 %v5865_v19, 16  ;;  %v1485_v36 = vshrl.u32 %v5865_v19, 16 }
 0x107   : > { %v4350_v51 = vadd.f32 %v4349_v8, %v4348_v35  ;;  %v1494_v8 = vrot.slane %v1492_v56, 1 }
 0x108   : > { %v4421_v55 = vpop.f32.mrf.mxu1  ;;  %v4351_v45 = vpop.f32.mrf.mxu0  ;;  %2513 = vmatmul.mubr.bf16.gmra.mxu1 %v5255_v30  ;;  %v1489_v48 = vrot.slane %v1487_v31, 1 }
 0x109   : > { %v5855_v32 = vadd.f32 %v4421_v55, %v4420_v26  ;;  %2520 = vmatprep.mubr.bf16.mxu1 %v5314_v46 }
 0x10a   : > { %v4423_v53 = vpop.f32.mrf.mxu1  ;;  %v4352_v39 = vpop.f32.mrf.mxu0  ;;  %3068 = vmatmul.mubr.bf16.gmra.mxu0 %v5530_v4 }
 0x10b   : > { %v5859_v28 = vadd.f32 %v4352_v39, %v4351_v45  ;;  %3075 = vmatprep.mubr.bf16.mxu0 %v5618_v63 }
 0x10c   : > { %v4424_v2 = vpop.f32.mrf.mxu1 }
 0x10d   : > { %v5862_v61 = vadd.f32 %v4424_v2, %v4423_v53 }
 0x10e   : > { %v4354_v58 = vpop.f32.mrf.mxu0 }
 0x110   : > { %v4355_v62 = vpop.f32.mrf.mxu0  ;;  %2521 = vmatmul.mubr.bf16.gmra.mxu1 %v6421_v17 }
 0x111   : > { %v5867_v24 = vadd.f32 %v4355_v62, %v4354_v58  ;;  %2528 = vmatprep.mubr.bf16.mxu1 %v6422_v18 }
 0x112   : > { %v4357_v34 = vpop.f32.mrf.mxu0  ;;  %v4426_v59 = vpop.f32.mrf.mxu1  ;;  %3076 = vmatmul.mubr.bf16.gmra.mxu0 %v5577_v11  ;;  %v6424_v11 = vld [vmem:[#allocation8_spill] sm:$0xff] }
 0x113   : > { %3083 = vmatprep.mubr.bf16.mxu0 %v5646_v29  ;;  %v1490_v29 = vor.u32 %v1489_v48, %v1485_v36 }
 0x114   : > { %v4358_v44 = vpop.f32.mrf.mxu0  ;;  %v4427_v63 = vpop.f32.mrf.mxu1 }
 0x115   : > { %v5872_v4 = vadd.f32 %v4358_v44, %v4357_v34  ;;  %v5876_v42 = vadd.f32 %v4427_v63, %v4426_v59  ;;  %v5887_v39 = vsel %vm1291_vm1, %v1490_v29, %v1494_v8 }
 0x116   : > { %v4429_v33 = vpop.f32.mrf.mxu1 }
 0x118   : > { %v4430_v3 = vpop.f32.mrf.mxu1  ;;  %2529 = vmatmul.mubr.bf16.gmra.mxu1 %v6423_v20 }
 0x119   : > { %v5881_v35 = vadd.f32 %v4430_v3, %v4429_v33  ;;  %2536 = vmatprep.mubr.bf16.mxu1 %v6424_v11 }
 0x11a   : > { %v4360_v26 = vpop.f32.mrf.mxu0  ;;  %3084 = vmatmul.mubr.bf16.gmra.mxu0 %v5603_v0 }
 0x11b   : > { %3091 = vmatprep.mubr.bf16.mxu0 %v5669_v52 }
 0x11c   : > { %v4361_v55 = vpop.f32.mrf.mxu0 }
 0x11d   : > { %v4362_v45 = vadd.f32 %v4361_v55, %v4360_v26 }
 0x11e   : > { %v4363_v53 = vpop.f32.mrf.mxu0 }
 0x120   : > { %v4432_v60 = vpop.f32.mrf.mxu1  ;;  %v4364_v2 = vpop.f32.mrf.mxu0  ;;  %2537 = vmatmul.mubr.bf16.gmra.mxu1 %v6425_v15 }
 0x121   : > { %v4365_v58 = vadd.f32 %v4364_v2, %v4363_v53  ;;  %2544 = vmatprep.mubr.bf16.mxu1 %v5887_v39 }
 0x122   : > { %v4433_v62 = vpop.f32.mrf.mxu1  ;;  %3092 = vmatmul.mubr.bf16.gmra.mxu0 %v5634_v25 }
 0x123   : > { %v5892_v0 = vadd.f32 %v4433_v62, %v4432_v60  ;;  %3099 = vmatprep.mubr.bf16.mxu0 %v5690_v47 }
 0x124   : > { %v4435_v34 = vpop.f32.mrf.mxu1 }
 0x126   : > { %v4436_v52 = vpop.f32.mrf.mxu1  ;;  %v4366_v59 = vpop.f32.mrf.mxu0 }
 0x127   : > { %v5895_v44 = vadd.f32 %v4436_v52, %v4435_v34 }
 0x128   : > { %v4752_v31 = vpop.f32.mrf.mxu1  ;;  %v4367_v63 = vpop.f32.mrf.mxu0  ;;  %2545 = vmatmul.mubr.bf16.gmra.mxu1 %v5865_v19 }
 0x129   : > { %v5898_v33 = vadd.f32 %v4752_v31, %v4350_v51  ;;  %v4368_v36 = vadd.f32 %v4367_v63, %v4366_v59  ;;  %4846 = vmatprep.mubr.bf16.mxu1 %v5476_v38 }
 0x12a   : > { %v2040_v48 = vpop.f32.mrf.mxu1  ;;  %v4369_v25 = vpop.f32.mrf.mxu0  ;;  %3100 = vmatmul.mubr.bf16.gmra.mxu0 %v5672_v54 }
 0x12b   : > { %v5903_v56 = vadd.f32 %v5839_v27, %v2040_v48  ;;  %3107 = vmatprep.mubr.bf16.mxu0 %v5705_v49 }
 0x12c   : > { %v4753_v47 = vpop.f32.mrf.mxu1  ;;  %v4370_v3 = vpop.f32.mrf.mxu0 }
 0x12d   : > { %v5907_v26 = vadd.f32 %v4753_v47, %v5859_v28  ;;  %v4371_v29 = vadd.f32 %v4370_v3, %v4369_v25 }
 0x12e   : > { %v2043_v51 = vpop.f32.mrf.mxu1 }
 0x12f   : > { %v5910_v8 = vadd.f32 %v5841_v43, %v2043_v51  ;;  %v4372_v38 = vpop.f32.mrf.mxu0 }
 0x130   : > { %v4756_v55 = vpop.f32.mrf.mxu1  ;;  %4847 = vmatmul.mubr.bf16.vlgmr.msra.gmra.mxu1 %v5513_v22 }
 0x131   : > { %v5913_v54 = vadd.f32 %v4756_v55, %v4362_v45  ;;  %4850 = vmatprep.mubr.bf16.mxu1 %v5527_v37  ;;  %v4373_v27 = vpop.f32.mrf.mxu0 }
 0x132   : > { %v2056_v53 = vpop.f32.mrf.mxu1  ;;  %3108 = vmatmul.mubr.bf16.gmra.mxu0 %v5687_v16  ;;  %v4374_v49 = vadd.f32 %v4373_v27, %v4372_v38  ;;  %v1091_v27 = vld [vmem:[#allocation2 + $0xcc] sm:$0xf] }
 0x133   : > { %v5918_v28 = vadd.f32 %v5867_v24, %v2056_v53  ;;  %v4375_v60 = vpop.f32.mrf.mxu0  ;;  %3115 = vmatprep.mubr.bf16.mxu0 %v5281_v7  ;;  %v5944_v53 = vld [vmem:[#allocation2 + $0xd0] sm:$0xf] }
 0x134   : > { %v4757_v2 = vpop.f32.mrf.mxu1 }
 0x135   : > { %v5921_v43 = vadd.f32 %v4757_v2, %v4365_v58  ;;  %v4376_v62 = vpop.f32.mrf.mxu0  ;;  %v3955_v2 = vcombine.low %v1091_v27, %v5944_v53 }
 0x136   : > { %v2059_v22 = vpop.f32.mrf.mxu1  ;;  %v4377_v45 = vadd.f32 %v4376_v62, %v4375_v60 }
 0x137   : > { %v5924_v34 = vadd.f32 %v5872_v4, %v2059_v22 }
 0x138   : > { %v4760_v37 = vpop.f32.mrf.mxu1  ;;  %4851 = vmatmul.mubr.bf16.gmra.mxu1 %v5552_v9  ;;  %v4378_v16 = vpop.f32.mrf.mxu0 }
 0x139   : > { %v5927_v52 = vadd.f32 %v4760_v37, %v4374_v49  ;;  %4854 = vmatprep.mubr.bf16.mxu1 %v5567_v10 }
 0x13a   : > { %v2072_v24 = vpop.f32.mrf.mxu1  ;;  %3116 = vmatmul.mubr.bf16.gmra.mxu0 %v5255_v30  ;;  %v4379_v7 = vpop.f32.mrf.mxu0 }
 0x13b   : > { %v5931_v58 = vadd.f32 %v4368_v36, %v2072_v24  ;;  %v4380_v59 = vadd.f32 %v4379_v7, %v4378_v16  ;;  %3123 = vmatprep.mubr.bf16.mxu0 %v5314_v46  ;;  %v5043_v16 = vld [vmem:[#allocation2 + $0xd4] ss:$0 sps:$4 sm:$0x11]   ;;  %v1499_v24 = vshll.u32 %v3955_v2, 16 }
 0x13c   : > { %v4761_v31 = vpop.f32.mrf.mxu1  ;;  %v4381_v4 = vpop.f32.mrf.mxu0 }
 0x13d   : > { %v5934_v63 = vadd.f32 %v4761_v31, %v4377_v45 }
 0x13e   : > { %v2075_v48 = vpop.f32.mrf.mxu1  ;;  %v4382_v9 = vpop.f32.mrf.mxu0 }
 0x13f   : > { %v5936_v25 = vadd.f32 %v4371_v29, %v2075_v48  ;;  %v4383_v47 = vadd.f32 %v4382_v9, %v4381_v4  ;;  %v1497_v4 = vshrl.u32 %v3955_v2, 16  ;;  %v1501_v48 = vrot.slane %v1499_v24, 1 }
 0x140   : > { %v4764_v3 = vpop.f32.mrf.mxu1  ;;  %4855 = vmatmul.mubr.bf16.gmra.mxu1 %v5601_v57  ;;  %v4384_v30 = vpop.f32.mrf.mxu0  ;;  %v1504_v9 = vshll.u32 %v5043_v16, 16 }
 0x141   : > { %4858 = vmatprep.mubr.bf16.mxu1 %v5630_v40 }
 0x142   : > { %v2088_v10 = vpop.f32.mrf.mxu1  ;;  %3124 = vmatmul.mubr.bf16.gmra.mxu0 %v6421_v17  ;;  %v4385_v46 = vpop.f32.mrf.mxu0 }
 0x143   : > { %v5941_v36 = vadd.f32 %v4380_v59, %v2088_v10  ;;  %3131 = vmatprep.mubr.bf16.mxu0 %v6422_v18  ;;  %v4386_v38 = vadd.f32 %v4385_v46, %v4384_v30  ;;  %v1502_v10 = vor.u32 %v1501_v48, %v1497_v4  ;;  %v1506_v46 = vrot.slane %v1504_v9, 1 }
 0x144   : > { %v4765_v51 = vpop.f32.mrf.mxu1  ;;  %v4387_v55 = vpop.f32.mrf.mxu0 }
 0x145   : > { %v5946_v49 = vadd.f32 %v4764_v3, %v4386_v38 }
 0x146   : > { %v2091_v29 = vpop.f32.mrf.mxu1  ;;  %v4388_v40 = vpop.f32.mrf.mxu0 }
 0x147   : > { %v5948_v57 = vadd.f32 %v4383_v47, %v2091_v29  ;;  %v4389_v17 = vadd.f32 %v4388_v40, %v4387_v55 }
 0x148   : > { %4859 = vmatmul.mubr.bf16.gmra.mxu1 %v5659_v23  ;;  %v4768_v60 = vpop.f32.mrf.mxu1  ;;  %v4390_v18 = vpop.f32.mrf.mxu0 }
 0x149   : > { %4862 = vmatprep.mubr.bf16.mxu1 %v5679_v13  ;;  %v5953_v62 = vadd.f32 %v4765_v51, %v4389_v17 }
 0x14a   : > { %3132 = vmatmul.mubr.bf16.gmra.mxu0 %v6423_v20  ;;  %v2104_v22 = vpop.f32.mrf.mxu1  ;;  %v4391_v45 = vpop.f32.mrf.mxu0 }
 0x14b   : > { %3139 = vmatprep.mubr.bf16.mxu0 %v6424_v11  ;;  %v4392_v37 = vadd.f32 %v4391_v45, %v4390_v18 }
 0x14c   : > { %v4393_v7 = vpop.f32.mrf.mxu0  ;;  %v4769_v23 = vpop.f32.mrf.mxu1 }
 0x14d   : > { %v5957_v59 = vadd.f32 %v4392_v37, %v2104_v22 }
 0x14e   : > { %v4394_v31 = vpop.f32.mrf.mxu0  ;;  %v2107_v47 = vpop.f32.mrf.mxu1 }
 0x14f   : > { %v4395_v13 = vadd.f32 %v4394_v31, %v4393_v7 }
 0x150   : > { %4863 = vmatmul.mubr.bf16.gmra.mxu1 %v5699_v12  ;;  %v4396_v20 = vpop.f32.mrf.mxu0 }
 0x151   : > { %4866 = vmatprep.mubr.bf16.mxu1 %v5696_v50  ;;  %v5961_v3 = vadd.f32 %v4395_v13, %v2107_v47  ;;  %v1507_v50 = vsel %vm1291_vm1, %v1502_v10, %v1506_v46  ;;  %v1633_v13 = vrot.slane %v5043_v16, 1 }
 0x152   : > { %3140 = vmatmul.mubr.bf16.gmra.mxu0 %v6425_v15  ;;  %v4397_v11 = vpop.f32.mrf.mxu0 }
 0x153   : > { %3147 = vmatprep.mubr.bf16.mxu0 %v5887_v39  ;;  %v4398_v30 = vadd.f32 %v4397_v11, %v4396_v20  ;;  %v1128_v39 = vld [vmem:[#allocation2 + $0xcc] sm:$0xe] }
 0x154   : > { %v4399_v51 = vpop.f32.mrf.mxu0  ;;  %v3991_v45 = vcombine.low %v1128_v39, %v5944_v53 }
 0x155   : > { %v5965_v12 = vadd.f32 %v4768_v60, %v4398_v30 }
 0x156   : > { %v4400_v38 = vpop.f32.mrf.mxu0  ;;  %v1632_v31 = vrot.slane %v3991_v45, 1 }
 0x157   : > { %v4401_v29 = vadd.f32 %v4400_v38, %v4399_v51 }
 0x158   : > { %v4772_v55 = vpop.f32.mrf.mxu1  ;;  %4867 = vmatmul.mubr.bf16.gmra.mxu1 %v5709_v14  ;;  %v4402_v27 = vpop.f32.mrf.mxu0 }
 0x159   : > { %4870 = vmatprep.mubr.bf16.mxu1 %v5712_v5  ;;  %v5970_v40 = vadd.f32 %v4769_v23, %v4401_v29 }
 0x15a   : > { %v2120_v15 = vpop.f32.mrf.mxu1  ;;  %3148 = vmatmul.mubr.bf16.gmra.mxu0 %v5865_v19  ;;  %v4403_v17 = vpop.f32.mrf.mxu0 }
 0x15b   : > { %3155 = vmatprep.mubr.bf16.mxu0 %v1507_v50  ;;  %v4404_v18 = vadd.f32 %v4403_v17, %v4402_v27 }
 0x15c   : > { %v4773_v60 = vpop.f32.mrf.mxu1  ;;  %v4405_v22 = vpop.f32.mrf.mxu0 }
 0x15d   : > { %v5974_v37 = vadd.f32 %v4404_v18, %v2120_v15 }
 0x15e   : > { %v2123_v14 = vpop.f32.mrf.mxu1  ;;  %v4406_v24 = vpop.f32.mrf.mxu0 }
 0x15f   : > { %v4407_v5 = vadd.f32 %v4406_v24, %v4405_v22 }
 0x160   : > { %v4776_v7 = vpop.f32.mrf.mxu1  ;;  %4871 = vmatmul.mubr.bf16.gmra.mxu1 %v5685_v41  ;;  %v4408_v19 = vpop.f32.mrf.mxu0 }
 0x161   : > { %v5978_v23 = vadd.f32 %v4776_v7, %v5855_v32  ;;  %4874 = vmatprep.mubr.bf16.mxu1 %v5825_v21  ;;  %v5981_v48 = vadd.f32 %v4407_v5, %v2123_v14  ;;  %v1634_v32 = vsel %vm1580_vm9, %v1632_v31, %v1633_v13 }
 0x162   : > { %v2136_v4 = vpop.f32.mrf.mxu1  ;;  %3156 = vmatmul.mubr.bf16.gmra.mxu0 %v3955_v2  ;;  %v4409_v9 = vpop.f32.mrf.mxu0 }
 0x163   : > { %v5984_v53 = vadd.f32 %v5847_v6, %v2136_v4  ;;  %v4410_v20 = vadd.f32 %v4409_v9, %v4408_v19 }
 0x164   : > { %v4777_v47 = vpop.f32.mrf.mxu1  ;;  %v4411_v11 = vpop.f32.mrf.mxu0 }
 0x165   : > { %v5987_v41 = vadd.f32 %v4777_v47, %v5862_v61  ;;  %v5990_v30 = vadd.f32 %v4772_v55, %v4410_v20 }
 0x166   : > { %v2139_v21 = vpop.f32.mrf.mxu1  ;;  %v4412_v10 = vpop.f32.mrf.mxu0 }
 0x167   : > { %v5993_v16 = vadd.f32 %v5852_v1, %v2139_v21  ;;  %v4413_v6 = vadd.f32 %v4412_v10, %v4411_v11 }
 0x168   : > { %v4780_v2 = vpop.f32.mrf.mxu1  ;;  %4875 = vmatmul.mubr.bf16.gmra.mxu1 %v1634_v32  ;;  %v4800_v51 = vpop.f32.mrf.mxu0 }
 0x169   : > { %v5996_v46 = vadd.f32 %v4780_v2, %v5892_v0  ;;  %v5998_v61 = vadd.f32 %v4773_v60, %v4413_v6 }
 0x16a   : > { %v2152_v38 = vpop.f32.mrf.mxu1  ;;  %v2587_v50 = vpop.f32.mrf.mxu0 }
 0x16b   : > { %v6001_v29 = vadd.f32 %v5876_v42, %v2152_v38 }
 0x16c   : > { %v4781_v55 = vpop.f32.mrf.mxu1  ;;  %v4801_v1 = vpop.f32.mrf.mxu0 }
 0x16d   : > { %v6004_v27 = vadd.f32 %v4781_v55, %v5895_v44 }
 0x16e   : > { %v2155_v15 = vpop.f32.mrf.mxu1  ;;  %v2590_v17 = vpop.f32.mrf.mxu0 }
 0x16f   : > { %6426 = vst [vmem:[#allocation4_spill] sm:$0xff] %v6004_v27  ;;  %v6007_v39 = vadd.f32 %v5881_v35, %v2155_v15 }
 0x170   : > { %v4478_v0 = vpop.f32.mrf.mxu1  ;;  %v4804_v22 = vpop.f32.mrf.mxu0 }
 0x172   : > { %v4479_v18 = vpop.f32.mrf.mxu1  ;;  %v2603_v14 = vpop.f32.mrf.mxu0 }
 0x173   : > { %v4480_v45 = vadd.f32 %v4479_v18, %v4478_v0 }
 0x174   : > { %v4481_v60 = vpop.f32.mrf.mxu1  ;;  %v4805_v7 = vpop.f32.mrf.mxu0 }
 0x175   : > { %v2588_v24 = vadd.f32 %v4480_v45, %v2587_v50 }
 0x176   : > { %v4482_v42 = vpop.f32.mrf.mxu1  ;;  %v2606_v31 = vpop.f32.mrf.mxu0 }
 0x177   : > { %v6010_v5 = vadd.f32 %v2588_v24, %v5903_v56  ;;  %v4483_v44 = vadd.f32 %v4482_v42, %v4481_v60 }
 0x178   : > { %v4484_v19 = vpop.f32.mrf.mxu1 }
 0x179   : > { %v2591_v13 = vadd.f32 %v4483_v44, %v2590_v17 }
 0x17a   : > { %v4485_v4 = vpop.f32.mrf.mxu1  ;;  %v4808_v35 = vpop.f32.mrf.mxu0 }
 0x17b   : > { %v6013_v9 = vadd.f32 %v2591_v13, %v5910_v8  ;;  %v4486_v47 = vadd.f32 %v4485_v4, %v4484_v19 }
 0x17c   : > { %v4487_v20 = vpop.f32.mrf.mxu1  ;;  %v2619_v32 = vpop.f32.mrf.mxu0 }
 0x17d   : > { %v2596_v11 = vadd.f32 %v4800_v51, %v4486_v47 }
 0x17e   : > { %v4488_v21 = vpop.f32.mrf.mxu1  ;;  %v4809_v10 = vpop.f32.mrf.mxu0 }
 0x17f   : > { %v4489_v2 = vadd.f32 %v4488_v21, %v4487_v20  ;;  %v6016_v6 = vadd.f32 %v2596_v11, %v5898_v33 }
 0x180   : > { %v4490_v56 = vpop.f32.mrf.mxu1  ;;  %v2622_v38 = vpop.f32.mrf.mxu0 }
 0x181   : > { %v2599_v50 = vadd.f32 %v4801_v1, %v4489_v2 }
 0x182   : > { %v4491_v55 = vpop.f32.mrf.mxu1  ;;  %v6018_v15 = vpop.f32.mrf.mxu0 }
 0x183   : > { %v4492_v17 = vadd.f32 %v4491_v55, %v4490_v56  ;;  %v6021_v8 = vadd.f32 %v2599_v50, %v5907_v26 }
 0x184   : > { %v4493_v0 = vpop.f32.mrf.mxu1  ;;  %v2635_v18 = vpop.f32.mrf.mxu0 }
 0x185   : > { %v2604_v45 = vadd.f32 %v4492_v17, %v2603_v14 }
 0x186   : > { %v4494_v51 = vpop.f32.mrf.mxu1  ;;  %v6023_v60 = vpop.f32.mrf.mxu0 }
 0x187   : > { %v4495_v24 = vadd.f32 %v4494_v51, %v4493_v0  ;;  %v6026_v33 = vadd.f32 %v2604_v45, %v5918_v28 }
 0x188   : > { %v4496_v42 = vpop.f32.mrf.mxu1  ;;  %v2638_v44 = vpop.f32.mrf.mxu0 }
 0x189   : > { %v2607_v1 = vadd.f32 %v4495_v24, %v2606_v31 }
 0x18a   : > { %v4497_v19 = vpop.f32.mrf.mxu1  ;;  %v6028_v13 = vpop.f32.mrf.mxu0 }
 0x18b   : > { %v4498_v4 = vadd.f32 %v4497_v19, %v4496_v42  ;;  %v6031_v26 = vadd.f32 %v2607_v1, %v5924_v34 }
 0x18c   : > { %v4499_v47 = vpop.f32.mrf.mxu1  ;;  %v6033_v20 = vpop.f32.mrf.mxu0 }
 0x18d   : > { %v2612_v14 = vadd.f32 %v4804_v22, %v4498_v4 }
 0x18e   : > { %v4500_v11 = vpop.f32.mrf.mxu1  ;;  %v6035_v21 = vpop.f32.mrf.mxu0 }
 0x18f   : > { %v4501_v2 = vadd.f32 %v4500_v11, %v4499_v47  ;;  %v6038_v28 = vadd.f32 %v2612_v14, %v5913_v54 }
 0x190   : > { %v4502_v56 = vpop.f32.mrf.mxu1  ;;  %v6040_v31 = vpop.f32.mrf.mxu0 }
 0x191   : > { %v2615_v50 = vadd.f32 %v4805_v7, %v4501_v2 }
 0x192   : > { %v4503_v55 = vpop.f32.mrf.mxu1  ;;  %v6042_v17 = vpop.f32.mrf.mxu0 }
 0x193   : > { %v4504_v34 = vadd.f32 %v4503_v55, %v4502_v56  ;;  %v6045_v0 = vadd.f32 %v2615_v50, %v5921_v43 }
 0x194   : > { %v4505_v45 = vpop.f32.mrf.mxu1  ;;  %v6047_v22 = vpop.f32.mrf.mxu0 }
 0x195   : > { %v2620_v51 = vadd.f32 %v4504_v34, %v2619_v32 }
 0x196   : > { %v4506_v24 = vpop.f32.mrf.mxu1  ;;  %v6049_v42 = vpop.f32.mrf.mxu0 }
 0x197   : > { %v4507_v54 = vadd.f32 %v4506_v24, %v4505_v45  ;;  %v6052_v1 = vadd.f32 %v2620_v51, %v5931_v58 }
 0x198   : > { %v4508_v19 = vpop.f32.mrf.mxu1  ;;  %v6054_v7 = vpop.f32.mrf.mxu0 }
 0x199   : > { %v2623_v4 = vadd.f32 %v4507_v54, %v2622_v38 }
 0x19a   : > { %v4509_v47 = vpop.f32.mrf.mxu1  ;;  %v6056_v14 = vpop.f32.mrf.mxu0 }
 0x19b   : > { %v4510_v43 = vadd.f32 %v4509_v47, %v4508_v19  ;;  %v6059_v11 = vadd.f32 %v2623_v4, %v5936_v25 }
 0x19c   : > { %v4511_v2 = vpop.f32.mrf.mxu1  ;;  %v6061_v32 = vpop.f32.mrf.mxu0 }
 0x19d   : > { %6427 = vst [vmem:[#allocation6_spill] sm:$0xff] %v6059_v11  ;;  %v2628_v56 = vadd.f32 %v4808_v35, %v4510_v43 }
 0x19e   : > { %v4512_v50 = vpop.f32.mrf.mxu1  ;;  %v6063_v55 = vpop.f32.mrf.mxu0 }
 0x19f   : > { %v4513_v58 = vadd.f32 %v4512_v50, %v4511_v2  ;;  %v6066_v34 = vadd.f32 %v2628_v56, %v5927_v52 }
 0x1a0   : > { %v4514_v45 = vpop.f32.mrf.mxu1  ;;  %v6068_v38 = vpop.f32.mrf.mxu0 }
 0x1a1   : > { %v2631_v51 = vadd.f32 %v4809_v10, %v4513_v58 }
 0x1a2   : > { %v4515_v24 = vpop.f32.mrf.mxu1  ;;  %v6070_v54 = vpop.f32.mrf.mxu0 }
 0x1a3   : > { %v4516_v25 = vadd.f32 %v4515_v24, %v4514_v45  ;;  %v6073_v19 = vadd.f32 %v2631_v51, %v5934_v63 }
 0x1a4   : > { %v4517_v4 = vpop.f32.mrf.mxu1  ;;  %v6075_v35 = vpop.f32.mrf.mxu0 }
 0x1a5   : > { %v2636_v47 = vadd.f32 %v4516_v25, %v2635_v18 }
 0x1a6   : > { %v4518_v43 = vpop.f32.mrf.mxu1  ;;  %v6077_v2 = vpop.f32.mrf.mxu0 }
 0x1a7   : > { %6428 = vst [vmem:[#allocation5_spill] sm:$0xff] %v6077_v2  ;;  %v4519_v52 = vadd.f32 %v4518_v43, %v4517_v4  ;;  %v6080_v56 = vadd.f32 %v2636_v47, %v5941_v36 }
 0x1a8   : > { %v4520_v50 = vpop.f32.mrf.mxu1  ;;  %v6082_v10 = vpop.f32.mrf.mxu0 }
 0x1a9   : > { %v2639_v58 = vadd.f32 %v4519_v52, %v2638_v44 }
 0x1aa   : > { %v4521_v27 = vpop.f32.mrf.mxu1  ;;  %v4614_v45 = vpop.f32.mrf.mxu0 }
 0x1ab   : > { %v4522_v24 = vadd.f32 %v4521_v27, %v4520_v50  ;;  %v6085_v63 = vadd.f32 %v2639_v58, %v5948_v57 }
 0x1ac   : > { %v4523_v51 = vpop.f32.mrf.mxu1  ;;  %v4615_v11 = vpop.f32.mrf.mxu0 }
 0x1ad   : > { %v2644_v18 = vadd.f32 %v6018_v15, %v4522_v24  ;;  %v6088_v25 = vadd.f32 %v4615_v11, %v4614_v45 }
 0x1ae   : > { %v4524_v4 = vpop.f32.mrf.mxu1  ;;  %v4617_v43 = vpop.f32.mrf.mxu0 }
 0x1af   : > { %v4525_v36 = vadd.f32 %v4524_v4, %v4523_v51  ;;  %v6091_v47 = vadd.f32 %v2644_v18, %v5946_v49 }
 0x1b0   : > { %v4526_v2 = vpop.f32.mrf.mxu1  ;;  %v4618_v44 = vpop.f32.mrf.mxu0 }
 0x1b1   : > { %v2647_v52 = vadd.f32 %v6023_v60, %v4525_v36  ;;  %v6094_v27 = vadd.f32 %v4618_v44, %v4617_v43 }
 0x1b2   : > { %v4527_v57 = vpop.f32.mrf.mxu1  ;;  %v6096_v50 = vpop.f32.mrf.mxu0 }
 0x1b3   : > { %v4528_v58 = vadd.f32 %v4527_v57, %v4526_v2  ;;  %v6099_v15 = vadd.f32 %v2647_v52, %v5953_v62 }
 0x1b4   : > { %v4529_v11 = vpop.f32.mrf.mxu1  ;;  %v6101_v45 = vpop.f32.mrf.mxu0 }
 0x1b5   : > { %v2652_v24 = vadd.f32 %v4528_v58, %v6033_v20 }
 0x1b6   : > { %v4530_v49 = vpop.f32.mrf.mxu1  ;;  %v6104_v51 = vpop.f32.mrf.mxu0 }
 0x1b7   : > { %v4531_v18 = vadd.f32 %v4530_v49, %v4529_v11  ;;  %v6107_v60 = vadd.f32 %v2652_v24, %v5957_v59 }
 0x1b8   : > { %v4532_v4 = vpop.f32.mrf.mxu1  ;;  %v6109_v43 = vpop.f32.mrf.mxu0 }
 0x1b9   : > { %v2655_v2 = vadd.f32 %v4531_v18, %v6040_v31 }
 0x1ba   : > { %v4533_v36 = vpop.f32.mrf.mxu1  ;;  %v6112_v62 = vpop.f32.mrf.mxu0 }
 0x1bb   : > { %v4534_v44 = vadd.f32 %v4533_v36, %v4532_v4  ;;  %v6115_v52 = vadd.f32 %v2655_v2, %v5961_v3 }
 0x1bc   : > { %v4535_v20 = vpop.f32.mrf.mxu1  ;;  %v6117_v57 = vpop.f32.mrf.mxu0 }
 0x1bd   : > { %6429 = vst [vmem:[#allocation8_spill] sm:$0xff] %v6115_v52  ;;  %v2660_v58 = vadd.f32 %v6028_v13, %v4534_v44 }
 0x1be   : > { %v4536_v11 = vpop.f32.mrf.mxu1  ;;  %v6120_v59 = vpop.f32.mrf.mxu0 }
 0x1bf   : > { %v4537_v24 = vadd.f32 %v4536_v11, %v4535_v20  ;;  %v6123_v49 = vadd.f32 %v2660_v58, %v5965_v12 }
 0x1c0   : > { %v4538_v31 = vpop.f32.mrf.mxu1  ;;  %v6125_v18 = vpop.f32.mrf.mxu0 }
 0x1c1   : > { %6430 = vst [vmem:[#allocation7_spill] sm:$0xff] %v6123_v49  ;;  %v2663_v4 = vadd.f32 %v6035_v21, %v4537_v24 }
 0x1c2   : > { %v4539_v36 = vpop.f32.mrf.mxu1  ;;  %v6128_v3 = vpop.f32.mrf.mxu0 }
 0x1c3   : > { %v4540_v2 = vadd.f32 %v4539_v36, %v4538_v31  ;;  %v6131_v52 = vadd.f32 %v2663_v4, %v5970_v40 }
 0x1c4   : > { %v4541_v13 = vpop.f32.mrf.mxu1  ;;  %v6133_v44 = vpop.f32.mrf.mxu0 }
 0x1c5   : > { %6431 = vst [vmem:[#allocation9_spill] sm:$0xff] %v6131_v52  ;;  %v2668_v20 = vadd.f32 %v4540_v2, %v6047_v22 }
 0x1c6   : > { %v4542_v11 = vpop.f32.mrf.mxu1  ;;  %v6136_v12 = vpop.f32.mrf.mxu0 }
 0x1c7   : > { %v4543_v58 = vadd.f32 %v4542_v11, %v4541_v13  ;;  %v6139_v49 = vadd.f32 %v2668_v20, %v5974_v37 }
 0x1c8   : > { %v4544_v21 = vpop.f32.mrf.mxu1  ;;  %v6141_v24 = vpop.f32.mrf.mxu0 }
 0x1c9   : > { %6432 = vst [vmem:[#allocation10_spill] sm:$0xff] %v6139_v49  ;;  %v2671_v31 = vadd.f32 %v4543_v58, %v6054_v7 }
 0x1ca   : > { %v4545_v36 = vpop.f32.mrf.mxu1  ;;  %v6144_v40 = vpop.f32.mrf.mxu0 }
 0x1cb   : > { %v4546_v4 = vadd.f32 %v4545_v36, %v4544_v21  ;;  %v6147_v52 = vadd.f32 %v2671_v31, %v5981_v48 }
 0x1cc   : > { %v4547_v22 = vpop.f32.mrf.mxu1  ;;  %v6149_v2 = vpop.f32.mrf.mxu0 }
 0x1cd   : > { %6433 = vst [vmem:[#allocation11_spill] sm:$0xff] %v6147_v52  ;;  %v2676_v13 = vadd.f32 %v6042_v17, %v4546_v4 }
 0x1ce   : > { %v4548_v11 = vpop.f32.mrf.mxu1  ;;  %v6152_v37 = vpop.f32.mrf.mxu0 }
 0x1cf   : > { %v4549_v20 = vadd.f32 %v4548_v11, %v4547_v22  ;;  %v6155_v49 = vadd.f32 %v2676_v13, %v5990_v30 }
 0x1d0   : > { %v4550_v7 = vpop.f32.mrf.mxu1  ;;  %v6157_v58 = vpop.f32.mrf.mxu0 }
 0x1d1   : > { %6434 = vst [vmem:[#allocation12_spill] sm:$0xff] %v6155_v49  ;;  %v2679_v21 = vadd.f32 %v6049_v42, %v4549_v20 }
 0x1d2   : > { %v4551_v36 = vpop.f32.mrf.mxu1  ;;  %v6160_v48 = vpop.f32.mrf.mxu0 }
 0x1d3   : > { %v4552_v31 = vadd.f32 %v4551_v36, %v4550_v7  ;;  %v6163_v52 = vadd.f32 %v2679_v21, %v5998_v61 }
 0x1d4   : > { %v4553_v17 = vpop.f32.mrf.mxu1  ;;  %v6165_v4 = vpop.f32.mrf.mxu0 }
 0x1d5   : > { %6435 = vst [vmem:[#allocation13_spill] sm:$0xff] %v6163_v52  ;;  %v2684_v22 = vadd.f32 %v4552_v31, %v6061_v32 }
 0x1d6   : > { %v4554_v11 = vpop.f32.mrf.mxu1  ;;  %v6168_v30 = vpop.f32.mrf.mxu0 }
 0x1d7   : > { %v4555_v13 = vadd.f32 %v4554_v11, %v4553_v17  ;;  %v6171_v49 = vadd.f32 %v2684_v22, %v5984_v53 }
 0x1d8   : > { %v4556_v42 = vpop.f32.mrf.mxu1  ;;  %v6173_v20 = vpop.f32.mrf.mxu0 }
 0x1d9   : > { %6436 = vst [vmem:[#allocation14_spill] sm:$0xff] %v6171_v49  ;;  %v2687_v7 = vadd.f32 %v4555_v13, %v6068_v38 }
 0x1da   : > { %v4557_v36 = vpop.f32.mrf.mxu1  ;;  %v6176_v61 = vpop.f32.mrf.mxu0 }
 0x1db   : > { %v4558_v21 = vadd.f32 %v4557_v36, %v4556_v42  ;;  %v6179_v52 = vadd.f32 %v2687_v7, %v5993_v16 }
 0x1dc   : > { %v4559_v32 = vpop.f32.mrf.mxu1  ;;  %v6181_v31 = vpop.f32.mrf.mxu0 }
 0x1dd   : > { %6437 = vst [vmem:[#allocation15_spill] sm:$0xff] %v6179_v52  ;;  %v2692_v17 = vadd.f32 %v6056_v14, %v4558_v21 }
 0x1de   : > { %v4560_v11 = vpop.f32.mrf.mxu1  ;;  %v6184_v53 = vpop.f32.mrf.mxu0 }
 0x1df   : > { %v4561_v22 = vadd.f32 %v4560_v11, %v4559_v32  ;;  %v6187_v49 = vadd.f32 %v2692_v17, %v5978_v23 }
 0x1e0   : > { %v4562_v38 = vpop.f32.mrf.mxu1  ;;  %v6189_v13 = vpop.f32.mrf.mxu0 }
 0x1e1   : > { %6438 = vst [vmem:[#allocation16_spill] sm:$0xff] %v6187_v49  ;;  %v2695_v42 = vadd.f32 %v6063_v55, %v4561_v22 }
 0x1e2   : > { %v4563_v36 = vpop.f32.mrf.mxu1  ;;  %v6192_v16 = vpop.f32.mrf.mxu0 }
 0x1e3   : > { %v4564_v7 = vadd.f32 %v4563_v36, %v4562_v38  ;;  %v6195_v52 = vadd.f32 %v2695_v42, %v5987_v41 }
 0x1e4   : > { %v4565_v14 = vpop.f32.mrf.mxu1  ;;  %v6197_v21 = vpop.f32.mrf.mxu0 }
 0x1e5   : > { %6439 = vst [vmem:[#allocation17_spill] sm:$0xff] %v6195_v52  ;;  %v2700_v32 = vadd.f32 %v4564_v7, %v6075_v35 }
 0x1e6   : > { %v4566_v11 = vpop.f32.mrf.mxu1  ;;  %v6200_v23 = vpop.f32.mrf.mxu0 }
 0x1e7   : > { %v4567_v17 = vadd.f32 %v4566_v11, %v4565_v14  ;;  %v6203_v49 = vadd.f32 %v2700_v32, %v6001_v29 }
 0x1e8   : > { %v4568_v55 = vpop.f32.mrf.mxu1  ;;  %v6205_v22 = vpop.f32.mrf.mxu0 }
 0x1e9   : > { %6440 = vst [vmem:[#allocation18_spill] sm:$0xff] %v6203_v49  ;;  %v2703_v38 = vadd.f32 %v4567_v17, %v6082_v10 }
 0x1ea   : > { %v4569_v36 = vpop.f32.mrf.mxu1  ;;  %v6208_v41 = vpop.f32.mrf.mxu0 }
 0x1eb   : > { %v4570_v42 = vadd.f32 %v4569_v36, %v4568_v55  ;;  %v6211_v52 = vadd.f32 %v2703_v38, %v6007_v39  ;;  %v4622_v39 = vadd.f32 %v6101_v45, %v6096_v50 }
 0x1ec   : > { %v6213_v35 = vpop.f32.mrf.mxu1  ;;  %v6215_v7 = vpop.f32.mrf.mxu0 }
 0x1ed   : > { %6441 = vst [vmem:[#allocation19_spill] sm:$0xff] %v6211_v52  ;;  %6442 = vst [vmem:[#allocation20_spill] sm:$0xff] %v6213_v35  ;;  %v2708_v14 = vadd.f32 %v6070_v54, %v4570_v42  ;;  %v4625_v54 = vadd.f32 %v6109_v43, %v6104_v51  ;;  %v4634_v51 = vadd.f32 %v6133_v44, %v6128_v3 }
 0x1ee   : > { %v6218_v29 = vpop.f32.mrf.mxu1  ;;  %v6220_v32 = vpop.f32.mrf.mxu0 }
 0x1ef   : > { %6443 = vst [vmem:[#allocation21_spill] sm:$0xff] %v6218_v29  ;;  %v6223_v11 = vadd.f32 %v2708_v14, %v5996_v46 }
 0x1f0   : > { %v4848_v10 = vpop.f32.mrf.mxu1  ;;  %v6225_v17 = vpop.f32.mrf.mxu0 }
 0x1f1   : > { %6444 = vst [vmem:[#allocation22_spill] sm:$0xff] %v6223_v11  ;;  %v3207_v36 = vadd.f32 %v4848_v10, %v4622_v39 }
 0x1f2   : > { %v3198_v55 = vpop.f32.mrf.mxu1  ;;  %v6229_v38 = vpop.f32.mrf.mxu0 }
 0x1f3   : > { %v3199_v42 = vadd.f32 %v6088_v25, %v3198_v55  ;;  %v3359_v50 = vadd.f32 %v3207_v36, %v6016_v6 }
 0x1f4   : > { %v4849_v52 = vpop.f32.mrf.mxu1  ;;  %v6234_v49 = vpop.f32.mrf.mxu0 }
 0x1f5   : > { %v3357_v46 = vadd.f32 %v3199_v42, %v6010_v5  ;;  %v3210_v14 = vadd.f32 %v4849_v52, %v4625_v54  ;;  %v4631_v54 = vadd.f32 %v6125_v18, %v6120_v59 }
 0x1f6   : > { %v3201_v11 = vpop.f32.mrf.mxu1  ;;  %v6237_v29 = vpop.f32.mrf.mxu0 }
 0x1f7   : > { %v3360_v45 = vadd.f32 %v3210_v14, %v6021_v8  ;;  %v3202_v35 = vadd.f32 %v6094_v27, %v3201_v11  ;;  %v4628_v8 = vadd.f32 %v6117_v57, %v6112_v62  ;;  %v4637_v27 = vadd.f32 %v6141_v24, %v6136_v12 }
 0x1f8   : > { %v4852_v5 = vpop.f32.mrf.mxu1  ;;  %v6251_v25 = vpop.f32.mrf.mxu0  ;;  %v3651_v11 = vmul.f32 %v3357_v46, %v3357_v46  ;;  %v3653_v62 = vmul.f32 %v3359_v50, %v3359_v50 }
 0x1f9   : > { %v4239_v43 = vpack.c.bf16 %v3360_v45, %v3359_v50  ;;  %v3358_v6 = vadd.f32 %v3202_v35, %v6013_v9  ;;  %v3223_v52 = vadd.f32 %v4852_v5, %v4634_v51  ;;  %v3654_v42 = vmul.f32 %v3360_v45, %v3360_v45 }
 0x1fa   : > { %v3214_v3 = vpop.f32.mrf.mxu1  ;;  %v6258_v44 = vpop.f32.mrf.mxu0 }
 0x1fb   : > { %4311 = vst [vmem:[%s6249_s26 + $0x8] sm:$0xff] %v4239_v43   ;;  %v4234_v10 = vpack.c.bf16 %v3358_v6, %v3357_v46  ;;  %v3613_v39 = vadd.f32 %v3358_v6, %v3357_v46  ;;  %v3652_v55 = vmul.f32 %v3358_v6, %v3358_v6  ;;  %v3215_v9 = vadd.f32 %v4628_v8, %v3214_v3 }
 0x1fc   : > { %v4853_v35 = vpop.f32.mrf.mxu1  ;;  %v6263_v36 = vpop.f32.mrf.mxu0  ;;  %v3363_v14 = vadd.f32 %v3223_v52, %v6038_v28  ;;  %v4640_v8 = vadd.f32 %v6149_v2, %v6144_v40 }
 0x1fd   : > { %4235 = vst [vmem:[%s6249_s26] sm:$0xff] %v4234_v10   ;;  %v3614_v57 = vadd.f32 %v3613_v39, %v3359_v50  ;;  %v3683_v12 = vadd.f32 %v3652_v55, %v3651_v11  ;;  %v3226_v24 = vadd.f32 %v4853_v35, %v4637_v27  ;;  %v3361_v51 = vadd.f32 %v3215_v9, %v6026_v33 }
 0x1fe   : > { %v3217_v5 = vpop.f32.mrf.mxu1  ;;  %v6268_v46 = vpop.f32.mrf.mxu0  ;;  %v4646_v50 = vadd.f32 %v6165_v4, %v6160_v48 }
 0x1ff   : > { %v3684_v43 = vadd.f32 %v3683_v12, %v3653_v62  ;;  %v3615_v6 = vadd.f32 %v3614_v57, %v3360_v45  ;;  %v3364_v59 = vadd.f32 %v3226_v24, %v6045_v0  ;;  %v3218_v18 = vadd.f32 %v4631_v54, %v3217_v5 }
 0x200   : > { %v4856_v27 = vpop.f32.mrf.mxu1  ;;  %v6275_v3 = vpop.f32.mrf.mxu0  ;;  %v3655_v33 = vmul.f32 %v3361_v51, %v3361_v51  ;;  %v4649_v0 = vadd.f32 %v6173_v20, %v6168_v30  ;;  %v3657_v57 = vmul.f32 %v3363_v14, %v3363_v14 }
 0x201   : > { %v3616_v28 = vadd.f32 %v3615_v6, %v3361_v51  ;;  %v3685_v52 = vadd.f32 %v3684_v43, %v3654_v42  ;;  %v4249_v11 = vpack.c.bf16 %v3364_v59, %v3363_v14  ;;  %v3362_v10 = vadd.f32 %v3218_v18, %v6031_v26 }
 0x202   : > { %v3230_v45 = vpop.f32.mrf.mxu1  ;;  %v6278_v39 = vpop.f32.mrf.mxu0  ;;  %v3239_v2 = vadd.f32 %v4856_v27, %v4646_v50  ;;  %v4643_v26 = vadd.f32 %v6157_v58, %v6152_v37  ;;  %v3658_v6 = vmul.f32 %v3364_v59, %v3364_v59  ;;  %v6445_v27 = vld [vmem:[#allocation6_spill] sm:$0xff] }
 0x203   : > { %v3686_v40 = vadd.f32 %v3685_v52, %v3655_v33  ;;  %4313 = vst [vmem:[%s6249_s26 + $0x18] sm:$0xff] %v4249_v11   ;;  %v3231_v48 = vadd.f32 %v4640_v8, %v3230_v45  ;;  %v4244_v4 = vpack.c.bf16 %v3362_v10, %v3361_v51  ;;  %v3617_v55 = vadd.f32 %v3616_v28, %v3362_v10 }
 0x204   : > { %v3656_v54 = vmul.f32 %v3362_v10, %v3362_v10  ;;  %v4857_v9 = vpop.f32.mrf.mxu1  ;;  %v6283_v35 = vpop.f32.mrf.mxu0  ;;  %v3367_v51 = vadd.f32 %v3239_v2, %v6066_v34  ;;  %v4661_v34 = vadd.f32 %v6205_v22, %v6200_v23  ;;  %v4655_v23 = vadd.f32 %v6189_v13, %v6184_v53 }
 0x205   : > { %v3242_v62 = vadd.f32 %v4857_v9, %v4649_v0  ;;  %4312 = vst [vmem:[%s6249_s26 + $0x10] sm:$0xff] %v4244_v4   ;;  %v3618_v12 = vadd.f32 %v3617_v55, %v3363_v14  ;;  %v3365_v30 = vadd.f32 %v3231_v48, %v6052_v1  ;;  %v4652_v14 = vadd.f32 %v6181_v31, %v6176_v61 }
 0x206   : > { %v3687_v24 = vadd.f32 %v3686_v40, %v3656_v54  ;;  %v3233_v20 = vpop.f32.mrf.mxu1  ;;  %v6289_v42 = vpop.f32.mrf.mxu0  ;;  %v4658_v1 = vadd.f32 %v6197_v21, %v6192_v16  ;;  %v3661_v2 = vmul.f32 %v3367_v51, %v3367_v51 }
 0x207   : > { %v3368_v5 = vadd.f32 %v3242_v62, %v6073_v19  ;;  %v3234_v43 = vadd.f32 %v4643_v26, %v3233_v20  ;;  %v3619_v8 = vadd.f32 %v3618_v12, %v3364_v59  ;;  %v3659_v33 = vmul.f32 %v3365_v30, %v3365_v30 }
 0x208   : > { %v3688_v18 = vadd.f32 %v3687_v24, %v3657_v57  ;;  %v4860_v37 = vpop.f32.mrf.mxu1  ;;  %v6293_v58 = vpop.f32.mrf.mxu0  ;;  %v4664_v20 = vadd.f32 %v6215_v7, %v6208_v41 }
 0x209   : > { %v4259_v50 = vpack.c.bf16 %v3368_v5, %v3367_v51  ;;  %v3366_v28 = vadd.f32 %v3234_v43, %v6445_v27  ;;  %v3620_v19 = vadd.f32 %v3619_v8, %v3365_v30  ;;  %v3255_v61 = vadd.f32 %v4860_v37, %v4658_v1 }
 0x20a   : > { %v3689_v52 = vadd.f32 %v3688_v18, %v3658_v6  ;;  %v3246_v59 = vpop.f32.mrf.mxu1  ;;  %v6302_v11 = vpop.f32.mrf.mxu0  ;;  %v3662_v12 = vmul.f32 %v3368_v5, %v3368_v5 }
 0x20b   : > { %4315 = vst [vmem:[%s6249_s26 + $0x28] sm:$0xff] %v4259_v50   ;;  %v4254_v10 = vpack.c.bf16 %v3366_v28, %v3365_v30  ;;  %v3660_v45 = vmul.f32 %v3366_v28, %v3366_v28  ;;  %v3247_v31 = vadd.f32 %v4652_v14, %v3246_v59  ;;  %v3621_v16 = vadd.f32 %v3620_v19, %v3366_v28 }
 0x20c   : > { %v3690_v0 = vadd.f32 %v3689_v52, %v3659_v33  ;;  %v4861_v21 = vpop.f32.mrf.mxu1  ;;  %v6305_v40 = vpop.f32.mrf.mxu0  ;;  %v3371_v26 = vadd.f32 %v3255_v61, %v6091_v47  ;;  %v4673_v47 = vadd.f32 %v6251_v25, %v6237_v29  ;;  %v6446_v52 = vld [vmem:[#allocation7_spill] sm:$0xff] }
 0x20d   : > { %4314 = vst [vmem:[%s6249_s26 + $0x20] sm:$0xff] %v4254_v10   ;;  %v3258_v22 = vadd.f32 %v4861_v21, %v4661_v34  ;;  %v3622_v48 = vadd.f32 %v3621_v16, %v3367_v51  ;;  %v3369_v55 = vadd.f32 %v3247_v31, %v6080_v56  ;;  %v4670_v56 = vadd.f32 %v6234_v49, %v6229_v38  ;;  %v6447_v10 = vld [vmem:[#allocation9_spill] sm:$0xff] }
 0x20e   : > { %v3691_v4 = vadd.f32 %v3690_v0, %v3660_v45  ;;  %v3249_v54 = vpop.f32.mrf.mxu1  ;;  %v6311_v9 = vpop.f32.mrf.mxu0  ;;  %v3665_v25 = vmul.f32 %v3371_v26, %v3371_v26 }
 0x20f   : > { %v3372_v62 = vadd.f32 %v3258_v22, %v6099_v15  ;;  %v3250_v57 = vadd.f32 %v4655_v23, %v3249_v54  ;;  %v3623_v30 = vadd.f32 %v3622_v48, %v3368_v5  ;;  %v3663_v6 = vmul.f32 %v3369_v55, %v3369_v55  ;;  %v6448_v22 = vld [vmem:[#allocation8_spill] sm:$0xff] }
 0x210   : > { %v3692_v24 = vadd.f32 %v3691_v4, %v3661_v2  ;;  %v4864_v53 = vpop.f32.mrf.mxu1  ;;  %v6315_v13 = vpop.f32.mrf.mxu0  ;;  %v4682_v23 = vadd.f32 %v6283_v35, %v6278_v39  ;;  %v4685_v48 = vadd.f32 %v6293_v58, %v6289_v42 }
 0x211   : > { %v4269_v51 = vpack.c.bf16 %v3372_v62, %v3371_v26  ;;  %v3370_v43 = vadd.f32 %v3250_v57, %v6085_v63  ;;  %v3624_v15 = vadd.f32 %v3623_v30, %v3369_v55  ;;  %v3271_v41 = vadd.f32 %v4864_v53, %v4670_v56 }
 0x212   : > { %v3693_v18 = vadd.f32 %v3692_v24, %v3662_v12  ;;  %v3262_v5 = vpop.f32.mrf.mxu1  ;;  %v6324_v8 = vpop.f32.mrf.mxu0  ;;  %v4667_v63 = vadd.f32 %v6225_v17, %v6220_v32  ;;  %v3666_v31 = vmul.f32 %v3372_v62, %v3372_v62  ;;  %v4676_v17 = vadd.f32 %v6263_v36, %v6258_v44 }
 0x213   : > { %4317 = vst [vmem:[%s6249_s26 + $0x38] sm:$0xff] %v4269_v51   ;;  %v4264_v37 = vpack.c.bf16 %v3370_v43, %v3369_v55  ;;  %v3664_v14 = vmul.f32 %v3370_v43, %v3370_v43  ;;  %v3263_v7 = vadd.f32 %v4664_v20, %v3262_v5  ;;  %v3625_v49 = vadd.f32 %v3624_v15, %v3370_v43  ;;  %v6449_v51 = vld [vmem:[#allocation10_spill] sm:$0xff]  ;;  %v6451_v5 = vld [vmem:[#allocation13_spill] sm:$0xff] }
 0x214   : > { %v3694_v1 = vadd.f32 %v3693_v18, %v3663_v6  ;;  %v4865_v38 = vpop.f32.mrf.mxu1  ;;  %v4693_v50 = vpop.f32.mrf.mxu0  ;;  %v3375_v59 = vadd.f32 %v3271_v41, %v6446_v52  ;;  %v4679_v53 = vadd.f32 %v6275_v3, %v6268_v46  ;;  %v6450_v6 = vld [vmem:[#allocation12_spill] sm:$0xff] }
 0x215   : > { %4316 = vst [vmem:[%s6249_s26 + $0x30] sm:$0xff] %v4264_v37   ;;  %v3274_v29 = vadd.f32 %v4865_v38, %v4673_v47  ;;  %v3626_v27 = vadd.f32 %v3625_v49, %v3371_v26  ;;  %v3373_v34 = vadd.f32 %v3263_v7, %v6107_v60  ;;  %v4688_v49 = vadd.f32 %v6305_v40, %v6302_v11 }
 0x216   : > { %v3695_v28 = vadd.f32 %v3694_v1, %v3664_v14  ;;  %v3265_v19 = vpop.f32.mrf.mxu1  ;;  %v4695_v33 = vpop.f32.mrf.mxu0  ;;  %v3669_v58 = vmul.f32 %v3375_v59, %v3375_v59  ;;  %v4694_v38 = vadd.f32 %v4693_v50, %v6324_v8  ;;  %v6453_v8 = vld [vmem:[#allocation20_spill] sm:$0xff]  ;;  %v6454_v50 = vld [vmem:[#allocation21_spill] sm:$0xff] }
 0x217   : > { %v3376_v45 = vadd.f32 %v3274_v29, %v6447_v10  ;;  %v3266_v61 = vadd.f32 %v4667_v63, %v3265_v19  ;;  %v3627_v16 = vadd.f32 %v3626_v27, %v3372_v62  ;;  %v3667_v55 = vmul.f32 %v3373_v34, %v3373_v34  ;;  %v6452_v29 = vld [vmem:[#allocation11_spill] sm:$0xff] }
 0x218   : > { %v3696_v0 = vadd.f32 %v3695_v28, %v3665_v25  ;;  %v4868_v21 = vpop.f32.mrf.mxu1  ;;  %v4696_v32 = vpop.f32.mrf.mxu0 }
 0x219   : > { %v4279_v60 = vpack.c.bf16 %v3376_v45, %v3375_v59  ;;  %v3374_v2 = vadd.f32 %v3266_v61, %v6448_v22  ;;  %v3628_v4 = vadd.f32 %v3627_v16, %v3373_v34  ;;  %v3287_v44 = vadd.f32 %v4868_v21, %v4682_v23  ;;  %v6455_v22 = vld [vmem:[#allocation14_spill] sm:$0xff] }
 0x21a   : > { %v3697_v54 = vadd.f32 %v3696_v0, %v3666_v31  ;;  %v3278_v26 = vpop.f32.mrf.mxu1  ;;  %v6340_v62 = vpop.f32.mrf.mxu0  ;;  %v3670_v41 = vmul.f32 %v3376_v45, %v3376_v45  ;;  %v4697_v19 = vadd.f32 %v4696_v32, %v4695_v33  ;;  %v4573_v21 = vadd.f32 %v6454_v50, %v6453_v8 }
 0x21b   : > { %4319 = vst [vmem:[%s6249_s26 + $0x48] sm:$0xff] %v4279_v60   ;;  %v4274_v57 = vpack.c.bf16 %v3374_v2, %v3373_v34  ;;  %v3668_v12 = vmul.f32 %v3374_v2, %v3374_v2  ;;  %v3279_v36 = vadd.f32 %v4676_v17, %v3278_v26  ;;  %v3629_v39 = vadd.f32 %v3628_v4, %v3374_v2  ;;  %v6457_v26 = vld [vmem:[#allocation17_spill] sm:$0xff] }
 0x21c   : > { %v3698_v24 = vadd.f32 %v3697_v54, %v3667_v55  ;;  %v4869_v35 = vpop.f32.mrf.mxu1  ;;  %v4699_v30 = vpop.f32.mrf.mxu0  ;;  %v3379_v18 = vadd.f32 %v3287_v44, %v6450_v6  ;;  %v4691_v17 = vadd.f32 %v6315_v13, %v6311_v9  ;;  %v6456_v55 = vld [vmem:[#allocation16_spill] sm:$0xff] }
 0x21d   : > { %4318 = vst [vmem:[%s6249_s26 + $0x40] sm:$0xff] %v4274_v57   ;;  %v3290_v42 = vadd.f32 %v4869_v35, %v4685_v48  ;;  %v3630_v20 = vadd.f32 %v3629_v39, %v3375_v59  ;;  %v3377_v43 = vadd.f32 %v3279_v36, %v6449_v51  ;;  %v6458_v35 = vld [vmem:[#allocation5_spill] sm:$0xff] }
 0x21e   : > { %v3699_v56 = vadd.f32 %v3698_v24, %v3668_v12  ;;  %v3281_v47 = vpop.f32.mrf.mxu1  ;;  %v6347_v15 = vpop.f32.mrf.mxu0  ;;  %v3673_v33 = vmul.f32 %v3379_v18, %v3379_v18 }
 0x21f   : > { %v3380_v37 = vadd.f32 %v3290_v42, %v6451_v5  ;;  %v3282_v14 = vadd.f32 %v4679_v53, %v3281_v47  ;;  %v3631_v1 = vadd.f32 %v3630_v20, %v3376_v45  ;;  %v3671_v28 = vmul.f32 %v3377_v43, %v3377_v43  ;;  %v6459_v20 = vld [vmem:[#allocation15_spill] sm:$0xff] }
 0x220   : > { %v3700_v7 = vadd.f32 %v3699_v56, %v3669_v58  ;;  %v4872_v46 = vpop.f32.mrf.mxu1  ;;  %v4702_v3 = vpop.f32.mrf.mxu0  ;;  %v2711_v53 = vadd.f32 %v6458_v35, %v4573_v21  ;;  %v4700_v42 = vadd.f32 %v4699_v30, %v6340_v62 }
 0x221   : > { %v4289_v63 = vpack.c.bf16 %v3380_v37, %v3379_v18  ;;  %v3378_v25 = vadd.f32 %v3282_v14, %v6452_v29  ;;  %v3632_v27 = vadd.f32 %v3631_v1, %v3377_v43  ;;  %v3303_v61 = vadd.f32 %v4872_v46, %v4694_v38 }
 0x222   : > { %v3701_v34 = vadd.f32 %v3700_v7, %v3670_v41  ;;  %v3294_v52 = vpop.f32.mrf.mxu1  ;;  %v4704_v59 = vpop.f32.mrf.mxu0  ;;  %v3674_v36 = vmul.f32 %v3380_v37, %v3380_v37  ;;  %v4703_v62 = vadd.f32 %v4702_v3, %v6347_v15 }
 0x223   : > { %4321 = vst [vmem:[%s6249_s26 + $0x58] sm:$0xff] %v4289_v63   ;;  %v4284_v10 = vpack.c.bf16 %v3378_v25, %v3377_v43  ;;  %v3672_v45 = vmul.f32 %v3378_v25, %v3378_v25  ;;  %v3295_v31 = vadd.f32 %v4688_v49, %v3294_v52  ;;  %v3633_v16 = vadd.f32 %v3632_v27, %v3378_v25  ;;  %v6460_v49 = vld [vmem:[#allocation4_spill] sm:$0xff]  ;;  %v6461_v27 = vld [vmem:[#allocation18_spill] sm:$0xff] }
 0x224   : > { %v3702_v0 = vadd.f32 %v3701_v34, %v3671_v28  ;;  %v4873_v11 = vpop.f32.mrf.mxu1  ;;  %v4705_v40 = vpop.f32.mrf.mxu0  ;;  %v3383_v54 = vadd.f32 %v3303_v61, %v6456_v55  ;;  %v2777_v38 = vadd.f32 %v2711_v53, %v6460_v49 }
 0x225   : > { %4320 = vst [vmem:[%s6249_s26 + $0x50] sm:$0xff] %v4284_v10   ;;  %v3306_v23 = vadd.f32 %v4873_v11, %v4697_v19  ;;  %v3634_v32 = vadd.f32 %v3633_v16, %v3379_v18  ;;  %v3381_v2 = vadd.f32 %v3295_v31, %v6455_v22  ;;  %v4706_v44 = vadd.f32 %v4705_v40, %v4704_v59  ;;  %v6462_v19 = vld [vmem:[#allocation22_spill] sm:$0xff]  ;;  %v6463_v16 = vld [vmem:[#allocation19_spill] sm:$0xff] }
 0x226   : > { %v3703_v60 = vadd.f32 %v3702_v0, %v3672_v45  ;;  %v3297_v48 = vpop.f32.mrf.mxu1  ;;  %v4707_v4 = vpop.f32.mrf.mxu0  ;;  %v3677_v63 = vmul.f32 %v3383_v54, %v3383_v54 }
 0x227   : > { %v3384_v57 = vadd.f32 %v3306_v23, %v6457_v26  ;;  %v3298_v12 = vadd.f32 %v4691_v17, %v3297_v48  ;;  %v3635_v39 = vadd.f32 %v3634_v32, %v3380_v37  ;;  %v3675_v43 = vmul.f32 %v3381_v2, %v3381_v2 }
 0x228   : > { %v3704_v24 = vadd.f32 %v3703_v60, %v3673_v33  ;;  %v4876_v9 = vpop.f32.mrf.mxu1  ;;  %v4708_v13 = vpop.f32.mrf.mxu0 }
 0x229   : > { %v4299_v58 = vpack.c.bf16 %v3384_v57, %v3383_v54  ;;  %v3382_v56 = vadd.f32 %v3298_v12, %v6459_v20  ;;  %v3636_v51 = vadd.f32 %v3635_v39, %v3381_v2  ;;  %v4709_v18 = vadd.f32 %v4708_v13, %v4707_v4 }
 0x22a   : > { %v3705_v47 = vadd.f32 %v3704_v24, %v3674_v36  ;;  %v3310_v6 = vpop.f32.mrf.mxu1  ;;  %v3319_v41 = vadd.f32 %v4876_v9, %v4706_v44  ;;  %v3678_v45 = vmul.f32 %v3384_v57, %v3384_v57 }
 0x22b   : > { %4323 = vst [vmem:[%s6249_s26 + $0x68] sm:$0xff] %v4299_v58   ;;  %v4294_v5 = vpack.c.bf16 %v3382_v56, %v3381_v2  ;;  %v3676_v14 = vmul.f32 %v3382_v56, %v3382_v56  ;;  %v3311_v37 = vadd.f32 %v4700_v42, %v3310_v6  ;;  %v3637_v1 = vadd.f32 %v3636_v51, %v3382_v56 }
 0x22c   : > { %v3706_v7 = vadd.f32 %v3705_v47, %v3675_v43  ;;  %v4877_v46 = vpop.f32.mrf.mxu1  ;;  %v3387_v52 = vadd.f32 %v3319_v41, %v6462_v19 }
 0x22d   : > { %4322 = vst [vmem:[%s6249_s26 + $0x60] sm:$0xff] %v4294_v5   ;;  %v3322_v30 = vadd.f32 %v4877_v46, %v4709_v18  ;;  %v3638_v29 = vadd.f32 %v3637_v1, %v3383_v54  ;;  %v3385_v28 = vadd.f32 %v3311_v37, %v6461_v27 }
 0x22e   : > { %v3707_v25 = vadd.f32 %v3706_v7, %v3676_v14  ;;  %v3313_v34 = vpop.f32.mrf.mxu1  ;;  %v3681_v23 = vmul.f32 %v3387_v52, %v3387_v52 }
 0x22f   : > { %v3388_v59 = vadd.f32 %v3322_v30, %v2777_v38  ;;  %v3314_v10 = vadd.f32 %v4703_v62, %v3313_v34  ;;  %v3639_v31 = vadd.f32 %v3638_v29, %v3384_v57  ;;  %v3679_v11 = vmul.f32 %v3385_v28, %v3385_v28 }
 0x230   : > { %v3708_v61 = vadd.f32 %v3707_v25, %v3677_v63 }
 0x231   : > { %v4309_v0 = vpack.c.bf16 %v3388_v59, %v3387_v52  ;;  %v3386_v15 = vadd.f32 %v3314_v10, %v6463_v16  ;;  %v3640_v3 = vadd.f32 %v3639_v31, %v3385_v28  ;;  %v3682_v60 = vmul.f32 %v3388_v59, %v3388_v59 }
 0x232   : > { %v3709_v40 = vadd.f32 %v3708_v61, %v3678_v45 }
 0x233   : > { %4325 = vst [vmem:[%s6249_s26 + $0x78] sm:$0xff] %v4309_v0   ;;  %v4304_v8 = vpack.c.bf16 %v3386_v15, %v3385_v28  ;;  %v3680_v50 = vmul.f32 %v3386_v15, %v3386_v15  ;;  %v3641_v17 = vadd.f32 %v3640_v3, %v3386_v15 }
 0x234   : > { %v3710_v21 = vadd.f32 %v3709_v40, %v3679_v11 }
 0x235   : > { %4324 = vst [vmem:[%s6249_s26 + $0x70] sm:$0xff] %v4304_v8   ;;  %v3642_v33 = vadd.f32 %v3641_v17, %v3387_v52 }
 0x236   : > { %v3711_v32 = vadd.f32 %v3710_v21, %v3680_v50 }
 0x237   : > { %v3643_v22 = vadd.f32 %v3642_v33, %v3388_v59 }
 0x238   : > { %v3712_v2 = vadd.f32 %v3711_v32, %v3681_v23 }
 0x239   : > { %v3644_v48 = vrot.slane %v3643_v22, 4 }
 0x23a   : > { %v3713_v4 = vadd.f32 %v3712_v2, %v3682_v60 }
 0x23b   : > { %v3645_v55 = vadd.f32 %v3644_v48, %v3643_v22 }
 0x23c   : > { %v3714_v54 = vrot.slane %v3713_v4, 4 }
 0x23d   : > { %v3646_v26 = vrot.slane %v3645_v55, 2 }
 0x23e   : > { %v3715_v57 = vadd.f32 %v3714_v54, %v3713_v4 }
 0x23f   : > { %v3647_v12 = vadd.f32 %v3646_v26, %v3645_v55 }
 0x240   : > { %v3716_v44 = vrot.slane %v3715_v57, 2 }
 0x241   : > { %v3648_v36 = vrot.slane %v3647_v12, 1 }
 0x242   : > { %v3717_v24 = vadd.f32 %v3716_v44, %v3715_v57 }
 0x243   : > { %v3649_v39 = vadd.f32 %v3648_v36, %v3647_v12 }
 0x244   : > { %v3718_v9 = vrot.slane %v3717_v24, 1 }
 0x245   : > { %3650 = vst [vmem:[%s454_s30] sm:$0x1] %v3649_v39 }
 0x246   : > { %v3719_v13 = vadd.f32 %v3718_v9, %v3717_v24 }
 0x248   : > { %3720 = vst [vmem:[%s460_s9] sm:$0x1] %v3719_v13 }
 0x249 PF: > { %s17_s1 = sadd.s32 1, %s5071_s1   ;;  %s6464_s21 = smov %s5067_s22 }
 0x24a   : > { %p14_p5 = scmp.ge.s32.totalorder %s17_s1, 4   ;;  %s6465_s22 = smov %s6467_s2 }
 0x24c   :  { %16 = sbr.rel (!%p14_p5) target bundleno = 2 (0x2), region = 109 }

</bundles_post_ra>
